<compile_context>
chip_gen: v6e
topology: v6e:2x2x1
jax: 0.10.0
libtpu: 0.0.40
codegen_flags: <defaults>
</compile_context>

<pallas_src>
import math
from functools import partial

import jax
import jax.numpy as jnp
from jax.experimental import pallas as pl
from jax.experimental.pallas import tpu as pltpu

# ---------------------------------------------------------------------------
# model hyper-parameters (small, consistent with the module's constructor)
# ---------------------------------------------------------------------------
NUM_NODE   = 256     # N
FEAT_DIM   = 32      # F
HIDDEN     = 32      # H   (== FEAT_DIM -> first Dense residual path exercised)
NCLASS     = 8       # C
NUM_HOPS   = 3
N_LAYERS_2 = 3       # FeedForwardNetII depth: Dense, GraphConvolution, Dense
ALPHA      = 0.5
PRELU_A    = 0.25    # nn.PReLU default init
BN_EPS     = 1e-5


def _round_up(x, m):
    return ((x + m - 1) // m) * m


def _pick_tile_n(n):
    """Rows per grid step.

    v5e/v6e: one TensorCore -> fewest, largest grid steps (amortize ~0.35us/step).
    v7x:     two TensorCores -> keep >=2 'parallel' tiles (cdiv(n,2)), cap raised
             to 8192 rows (per review: ~a few MiB of double-buffered blocks with
             this layout, far under the 64 MiB v7x VMEM).
    """
    try:
        kind = jax.devices()[0].device_kind.lower()
    except Exception:   # pragma: no cover - defensive
        kind = ""
    dual_core = "v7" in kind
    cap = 8192
    t = -(-n // 2) if dual_core else n          # cdiv(n, 2) for two cores
    t = max(8, min(t, cap))
    return _round_up(t, 8)


# ---------------------------------------------------------------------------
# fused kernel: recursive hop attention + FeedForwardNetII
# ---------------------------------------------------------------------------
def _r_gamlp_kernel(
    *refs,
    num_hops, feat_dim, hidden, nclass, n_mid, alpha, cdtype, approx_recip,
):
    # refs = [x_hop0 .. x_hop{H-1}] + [w_att, scalars, wcomb, bn0_scale,
    #          bn0_shift, wmid, wlast, bnl_scale, bnl_shift] + [out]
    feat_refs = refs[:num_hops]
    (w_att_ref,      # [hops*F, 2*hops]  block-diagonal attention projections
     scalars_ref,    # [2] SMEM: [lr_att bias, PReLU slope]
     wcomb_ref,      # [hops*F, H(+F)]   vstack of w0 (+ identity cols if F==H)
     bn0_scale_ref,  # [1, H]
     bn0_shift_ref,  # [1, H]
     wmid_ref,       # [n_mid, H, H]
     wlast_ref,      # [H, C]
     bnl_scale_ref,  # [1, C]
     bnl_shift_ref,  # [1, C]
     out_ref,        # [TILE_N, C]
     ) = refs[num_hops:]

    f32 = jnp.float32
    b_att = scalars_ref[0]       # lr_att bias (scalar, SMEM)
    prelu_a = scalars_ref[1]     # PReLU slope (scalar, SMEM)

    def prelu(v):
        return jnp.where(v >= 0.0, v, prelu_a * v)

    def softmax_list(cols):
        m = cols[0]
        for c_ in cols[1:]:
            m = jnp.maximum(m, c_)
        es = [jnp.exp(c_ - m) for c_ in cols]
        denom = es[0]
        for e in es[1:]:
            denom = denom + e
        inv = pl.reciprocal(denom, approx=approx_recip)   # EUP slot in fast mode
        return [e * inv for e in es]

    # Per-hop node features, lane-concatenated once in VMEM (no HBM relayout).
    xs = [r[...] for r in feat_refs]                               # hops x [T, F]
    feat_cat = xs[0] if num_hops == 1 else jnp.concatenate(xs, axis=1)

    # ---- fused attention projections on the MXU ---------------------------
    # block-diag RHS: proj[:, h] = x_h . w_l, proj[:, hops+h] = x_h . w_r
    # Kept f32 (only 2*hops live output lanes; feeds exp()).
    proj = jnp.dot(feat_cat, w_att_ref[...], preferred_element_type=f32)
    p_l = [proj[:, h:h + 1] for h in range(num_hops)]
    p_r = [proj[:, num_hops + h:num_hops + h + 1] for h in range(num_hops)]

    # ---- recursive hop attention (eval: att_drop = identity) --------------
    # history.w_l = sum_j att_j * (x_j.w_l)  (same math as the reference, FP
    # summation order differs -- fine at test tolerance).
    scores = [jnp.maximum(p_l[0] + p_r[0] + b_att, 0.0)]           # cat([x0, x0])
    for i in range(1, num_hops):
        att = softmax_list(scores[:i])
        hist_l = att[0] * p_l[0]
        for j in range(1, i):
            hist_l = hist_l + att[j] * p_l[j]
        scores.append(jnp.maximum(hist_l + p_r[i] + b_att, 0.0))

    att = softmax_list(scores)

    # ---- hop-weighted sum folded into the first Dense ---------------------
    # w_cat = [att_0*x_0 | ... | att_{h-1}*x_{h-1}]  -> one K=hops*F MXU push.
    # wcomb columns [0:H]   = vstack([w0]*hops)   -> final @ w0
    # wcomb columns [H:H+F] = vstack([I_F]*hops)  -> final (Dense residual, F==H)
    if num_hops == 1:
        w_cat = xs[0] * att[0]
    else:
        w_cat = jnp.concatenate([xs[h] * att[h] for h in range(num_hops)], axis=1)
    y0 = jnp.dot(w_cat.astype(cdtype), wcomb_ref[...], preferred_element_type=f32)

    # Dense(feat_dim, hidden): matmul + folded eval-BN (+ residual iff square)
    x = y0[:, :hidden] * bn0_scale_ref[...] + bn0_shift_ref[...]
    if feat_dim == hidden:
        x = x + y0[:, hidden:hidden + feat_dim]          # == final
    h0 = x

    # GraphConvolution(hidden, hidden, alpha) middle layers (bns=False)
    for li in range(n_mid):
        xin = prelu(x)
        support = (1.0 - alpha) * xin + alpha * h0
        x = jnp.dot(support.astype(cdtype), wmid_ref[li],
                    preferred_element_type=f32) + xin

    # Dense(hidden, nclass) -- unpadded output block (byte-exact stores)
    xin = prelu(x)
    out = jnp.dot(xin.astype(cdtype), wlast_ref[...], preferred_element_type=f32)
    out = out * bnl_scale_ref[...] + bnl_shift_ref[...]
    if hidden == nclass:
        out = out + xin
    out_ref[...] = out.astype(out_ref.dtype)


# ---------------------------------------------------------------------------
# wrapper: parameter folding / re-layout, BlockSpecs, grid
# ---------------------------------------------------------------------------
def r_gamlp_forward(feature_list, params, *, tile_n=None, exact=False):
    """exact=False (default): bf16 MXU matmuls + approx-reciprocal softmax.
       exact=True: f32 matmuls + exact divides (reference-faithful)."""
    feature_list = [jnp.asarray(x, jnp.float32) for x in feature_list]
    num_hops = len(feature_list)
    n, f = feature_list[0].shape
    h = params["w0"].shape[1]
    c = params["wlast"].shape[1]
    n_mid = params["wmid"].shape[0]

    cdtype = jnp.float32 if exact else jnp.bfloat16
    approx_recip = not exact

    if tile_n is None:
        tile_n = _pick_tile_n(n)
    tile_n = _round_up(min(tile_n, _round_up(n, 8)), 8)
    grid = (pl.cdiv(n, tile_n),)        # partial last block OK: rows independent

    # ---- wrapper-side parameter plumbing (tiny, no feature-tensor copies) --
    # torch lr_att.weight is [1, 2F]: first F cols act on history, last F on x_i.
    # Build block-diagonal [hops*F, 2*hops]: col h <- w_l for hop h, col hops+h <- w_r.
    w_l = params["lr_att_w"][0, :f].astype(jnp.float32)
    w_r = params["lr_att_w"][0, f:].astype(jnp.float32)
    w_att = jnp.zeros((num_hops * f, 2 * num_hops), jnp.float32)
    for hop in range(num_hops):
        w_att = w_att.at[hop * f:(hop + 1) * f, hop].set(w_l)
        w_att = w_att.at[hop * f:(hop + 1) * f, num_hops + hop].set(w_r)

    scalars = jnp.concatenate([params["lr_att_b"].reshape(1).astype(jnp.float32),
                               jnp.asarray(params["prelu_a"], jnp.float32).reshape(1)])

    def bn_fold(gamma, beta, mean, var):   # eval BatchNorm1d -> affine
        scale = gamma / jnp.sqrt(var + BN_EPS)
        shift = beta - mean * scale
        return (scale[None, :].astype(jnp.float32),
                shift[None, :].astype(jnp.float32))

    bn0_scale, bn0_shift = bn_fold(params["bn0_gamma"], params["bn0_beta"],
                                   params["bn0_mean"], params["bn0_var"])
    bnl_scale, bnl_shift = bn_fold(params["bnl_gamma"], params["bnl_beta"],
                                   params["bnl_mean"], params["bnl_var"])

    # Combined first-Dense weight: vstack([w0]*hops) (+ identity cols if F==H so
    # the same MXU push also yields `final` for the Dense residual).
    w0 = params["w0"].astype(jnp.float32)
    if f == h:
        wcomb_block = jnp.concatenate([w0, jnp.eye(f, dtype=jnp.float32)], axis=1)
    else:
        wcomb_block = w0
    wcomb = jnp.concatenate([wcomb_block] * num_hops, axis=0).astype(cdtype)
    wmid = params["wmid"].astype(cdtype)
    wlast = params["wlast"].astype(cdtype)

    kernel = partial(_r_gamlp_kernel, num_hops=num_hops, feat_dim=f, hidden=h,
                     nclass=c, n_mid=n_mid, alpha=ALPHA, cdtype=cdtype,
                     approx_recip=approx_recip)

    def full(shape):
        return pl.BlockSpec(shape, lambda i: (0,) * len(shape))

    in_specs = [pl.BlockSpec((tile_n, f), lambda i: (i, 0)) for _ in range(num_hops)]
    in_specs += [
        full(w_att.shape),                                      # w_att (block-diag)
        pl.BlockSpec(memory_space=pltpu.MemorySpace.SMEM),      # scalars
        full(wcomb.shape),                                      # wcomb
        full((1, h)),                                           # bn0_scale
        full((1, h)),                                           # bn0_shift
        full(wmid.shape),                                       # wmid
        full(wlast.shape),                                      # wlast
        full((1, c)),                                           # bnl_scale
        full((1, c)),                                           # bnl_shift
    ]

    grid_spec = pltpu.PrefetchScalarGridSpec(
        num_scalar_prefetch=0,
        grid=grid,
        in_specs=in_specs,
        # unpadded output block: nclass equals the full last dim -> legal,
        # byte-exact stores (no 16x write amplification, no follow-up slice op)
        out_specs=pl.BlockSpec((tile_n, c), lambda i: (i, 0)),
    )

    out = pl.pallas_call(
        kernel,
        out_shape=jax.ShapeDtypeStruct((n, c), jnp.float32),
        grid_spec=grid_spec,
        compiler_params=pltpu.CompilerParams(
            dimension_semantics=("parallel",),
            vmem_limit_bytes=48 * 1024 * 1024,   # above all scoped defaults, < v7x's 64 MiB
        ),
    )(*feature_list, w_att, scalars, wcomb, bn0_scale, bn0_shift,
      wmid, wlast, bnl_scale, bnl_shift)

    return out


# ---------------------------------------------------------------------------
# pure-JAX reference (torch-faithful math) for the correctness check
# ---------------------------------------------------------------------------
def reference(feature_list, p):
    xs = [jnp.asarray(x, jnp.float32) for x in feature_list]
    num_hops = len(xs)
    w = p["lr_att_w"]              # [1, 2F]
    b = p["lr_att_b"]              # [1]
    a = p["prelu_a"]

    def score(hist, xi):
        return jnp.maximum(jnp.concatenate([hist, xi], axis=1) @ w.T + b, 0.0)

    scores = [score(xs[0], xs[0])]
    for i in range(1, num_hops):
        att = jax.nn.softmax(jnp.concatenate(scores[:i], axis=1), axis=1)
        hist = sum(xs[j] * att[:, j:j + 1] for j in range(i))
        scores.append(score(hist, xs[i]))
    att = jax.nn.softmax(jnp.concatenate(scores, axis=1), axis=1)
    final = sum(xs[i] * att[:, i:i + 1] for i in range(num_hops))

    def bn(x, gamma, beta, mean, var):
        return (x - mean) / jnp.sqrt(var + BN_EPS) * gamma + beta

    def prelu(x):
        return jnp.where(x >= 0.0, x, a * x)

    x = bn(final @ p["w0"], p["bn0_gamma"], p["bn0_beta"], p["bn0_mean"], p["bn0_var"])
    if final.shape[1] == x.shape[1]:
        x = x + final
    h0 = x
    for li in range(p["wmid"].shape[0]):
        xin = prelu(x)
        x = ((1.0 - ALPHA) * xin + ALPHA * h0) @ p["wmid"][li] + xin
    xin = prelu(x)
    out = bn(xin @ p["wlast"], p["bnl_gamma"], p["bnl_beta"], p["bnl_mean"], p["bnl_var"])
    if xin.shape[1] == out.shape[1]:
        out = out + xin
    return out


# ---------------------------------------------------------------------------
# deterministic parameter construction (matching the module's init)
# ---------------------------------------------------------------------------
def make_params(key):
    ks = jax.random.split(key, 4)
    relu_gain = math.sqrt(2.0)

    def xavier(k, shape, fan_in, fan_out, gain=1.0):
        bound = gain * math.sqrt(6.0 / (fan_in + fan_out))
        return jax.random.uniform(k, shape, jnp.float32, -bound, bound)

    def dense_w(k, fin, fout):                 # Dense / GCN: U(-1/sqrt(out), 1/sqrt(out))
        stdv = 1.0 / math.sqrt(fout)
        return jax.random.uniform(k, (fin, fout), jnp.float32, -stdv, stdv)

    n_mid = N_LAYERS_2 - 2
    return {
        # lr_att: Linear(2F, 1), xavier_uniform(gain=relu), zero bias
        "lr_att_w": xavier(ks[0], (1, 2 * FEAT_DIM), 2 * FEAT_DIM, 1, relu_gain),
        "lr_att_b": jnp.zeros((1,), jnp.float32),
        "prelu_a": jnp.asarray(PRELU_A, jnp.float32),
        # FeedForwardNetII: Dense(F,H) [+BN], GCN(H,H) x n_mid, Dense(H,C) [+BN]
        "w0": dense_w(ks[1], FEAT_DIM, HIDDEN),
        "bn0_gamma": jnp.ones((HIDDEN,), jnp.float32),
        "bn0_beta": jnp.zeros((HIDDEN,), jnp.float32),
        "bn0_mean": jnp.zeros((HIDDEN,), jnp.float32),
        "bn0_var": jnp.ones((HIDDEN,), jnp.float32),
        "wmid": jnp.stack([dense_w(jax.random.fold_in(ks[2], i), HIDDEN, HIDDEN)
                           for i in range(n_mid)]),
        "wlast": dense_w(ks[3], HIDDEN, NCLASS),
        "bnl_gamma": jnp.ones((NCLASS,), jnp.float32),
        "bnl_beta": jnp.zeros((NCLASS,), jnp.float32),
        "bnl_mean": jnp.zeros((NCLASS,), jnp.float32),
        "bnl_var": jnp.ones((NCLASS,), jnp.float32),
    }


if __name__ == "__main__":
    key = jax.random.PRNGKey(0)
    kf, kp = jax.random.split(key)

    # R_GAMLP input: feature_list of num_hops tensors [N, feat_dim]
    feature_list = [
        jax.random.normal(jax.random.fold_in(kf, hop), (NUM_NODE, FEAT_DIM), jnp.float32)
        for hop in range(NUM_HOPS)
    ]
    params = make_params(kp)

    ref = jax.block_until_ready(reference(feature_list, params))

    # 1) exact path: f32 matmuls + exact softmax divides -> tight tolerance
    out_exact = jax.block_until_ready(r_gamlp_forward(feature_list, params, exact=True))
    assert out_exact.shape == (NUM_NODE, NCLASS)
    assert jnp.allclose(out_exact, ref, atol=1e-4, rtol=1e-4), \
        float(jnp.max(jnp.abs(out_exact - ref)))

    # 2) default fast path: bf16 MXU matmuls + approx-reciprocal softmax
    #    (looser tolerance appropriate for bf16 inputs with f32 accumulation)
    out_fast = jax.block_until_ready(r_gamlp_forward(feature_list, params))
    assert out_fast.shape == (NUM_NODE, NCLASS)
    assert jnp.allclose(out_fast, ref, atol=1e-1, rtol=1e-1), \
        float(jnp.max(jnp.abs(out_fast - ref)))

    print("KERNEL_OK")
</pallas_src>

<mosaic_0001>
module attributes {stable_mosaic.version = 11 : i64} {
  func.func @_r_gamlp_kernel(%arg0: i32, %arg1: memref<256x32xf32, #tpu.memory_space<vmem>>, %arg2: memref<256x32xf32, #tpu.memory_space<vmem>>, %arg3: memref<256x32xf32, #tpu.memory_space<vmem>>, %arg4: memref<96x6xf32, #tpu.memory_space<vmem>>, %arg5: memref<2xf32, #tpu.memory_space<smem>>, %arg6: memref<96x64xf32, #tpu.memory_space<vmem>>, %arg7: memref<1x32xf32, #tpu.memory_space<vmem>>, %arg8: memref<1x32xf32, #tpu.memory_space<vmem>>, %arg9: memref<1x32x32xf32, #tpu.memory_space<vmem>>, %arg10: memref<32x8xf32, #tpu.memory_space<vmem>>, %arg11: memref<1x8xf32, #tpu.memory_space<vmem>>, %arg12: memref<1x8xf32, #tpu.memory_space<vmem>>, %arg13: memref<256x8xf32, #tpu.memory_space<vmem>>) attributes {dimension_semantics = [#tpu.dimension_semantics<parallel>], iteration_bounds = array<i64: 1>, scalar_prefetch = 0 : i64, scratch_operands = 0 : i64, tpu.core_type = #tpu.core_type<tc>, window_params = [{transform_indices = @transform_0, window_bounds = array<i64: 256, 32>}, {transform_indices = @transform_1, window_bounds = array<i64: 256, 32>}, {transform_indices = @transform_2, window_bounds = array<i64: 256, 32>}, {pipeline_mode = #tpu.pipeline_mode<synchronous>, transform_indices = @transform_3, window_bounds = array<i64: 96, 6>}, {transform_indices = @transform_4, window_bounds = array<i64: 2>}, {pipeline_mode = #tpu.pipeline_mode<synchronous>, transform_indices = @transform_5, window_bounds = array<i64: 96, 64>}, {pipeline_mode = #tpu.pipeline_mode<synchronous>, transform_indices = @transform_6, window_bounds = array<i64: 1, 32>}, {pipeline_mode = #tpu.pipeline_mode<synchronous>, transform_indices = @transform_7, window_bounds = array<i64: 1, 32>}, {pipeline_mode = #tpu.pipeline_mode<synchronous>, transform_indices = @transform_8, window_bounds = array<i64: 1, 32, 32>}, {pipeline_mode = #tpu.pipeline_mode<synchronous>, transform_indices = @transform_9, window_bounds = array<i64: 32, 8>}, {pipeline_mode = #tpu.pipeline_mode<synchronous>, transform_indices = @transform_10, window_bounds = array<i64: 1, 8>}, {pipeline_mode = #tpu.pipeline_mode<synchronous>, transform_indices = @transform_11, window_bounds = array<i64: 1, 8>}, {transform_indices = @transform_12, window_bounds = array<i64: 256, 8>}]} {
    %c0 = arith.constant 0 : index
    %0 = memref.load %arg5[%c0] : memref<2xf32, #tpu.memory_space<smem>>
    %c1 = arith.constant 1 : index
    %1 = memref.load %arg5[%c1] : memref<2xf32, #tpu.memory_space<smem>>
    %c0_0 = arith.constant 0 : index
    %c0_1 = arith.constant 0 : index
    %2 = vector.load %arg1[%c0_0, %c0_1] : memref<256x32xf32, #tpu.memory_space<vmem>>, vector<256x32xf32>
    %c0_2 = arith.constant 0 : index
    %c0_3 = arith.constant 0 : index
    %3 = vector.load %arg2[%c0_2, %c0_3] : memref<256x32xf32, #tpu.memory_space<vmem>>, vector<256x32xf32>
    %c0_4 = arith.constant 0 : index
    %c0_5 = arith.constant 0 : index
    %4 = vector.load %arg3[%c0_4, %c0_5] : memref<256x32xf32, #tpu.memory_space<vmem>>, vector<256x32xf32>
    %5 = tpu.concatenate %2, %3, %4 in 1 : vector<256x32xf32>, vector<256x32xf32>, vector<256x32xf32> -> vector<256x96xf32>
    %c0_6 = arith.constant 0 : index
    %c0_7 = arith.constant 0 : index
    %6 = vector.load %arg4[%c0_6, %c0_7] : memref<96x6xf32, #tpu.memory_space<vmem>>, vector<96x6xf32>
    %cst = arith.constant dense<0.000000e+00> : vector<256x6xf32>
    %7 = tpu.matmul %5, %6, %cst {dimension_numbers = #tpu.dot_dimension_numbers<[1], [0], [0], [1], [0, 0, 1, 1], [], []>} : vector<256x96xf32>, vector<96x6xf32>, vector<256x6xf32> -> vector<256x6xf32>
    %8 = vector.extract_strided_slice %7 {offsets = [0, 0], sizes = [256, 1], strides = [1, 1]} : vector<256x6xf32> to vector<256x1xf32>
    %9 = vector.extract_strided_slice %7 {offsets = [0, 1], sizes = [256, 1], strides = [1, 1]} : vector<256x6xf32> to vector<256x1xf32>
    %10 = vector.extract_strided_slice %7 {offsets = [0, 3], sizes = [256, 1], strides = [1, 1]} : vector<256x6xf32> to vector<256x1xf32>
    %11 = vector.extract_strided_slice %7 {offsets = [0, 4], sizes = [256, 1], strides = [1, 1]} : vector<256x6xf32> to vector<256x1xf32>
    %12 = vector.extract_strided_slice %7 {offsets = [0, 5], sizes = [256, 1], strides = [1, 1]} : vector<256x6xf32> to vector<256x1xf32>
    %13 = arith.addf %8, %10 : vector<256x1xf32>
    %14 = vector.broadcast %0 : f32 to vector<256x1xf32>
    %15 = arith.addf %13, %14 : vector<256x1xf32>
    %cst_8 = arith.constant 0.000000e+00 : f32
    %16 = vector.broadcast %cst_8 : f32 to vector<256x1xf32>
    %17 = arith.maximumf %15, %16 : vector<256x1xf32>
    %18 = arith.subf %17, %17 : vector<256x1xf32>
    %19 = math.exp %18 : vector<256x1xf32>
    %20 = tpu.reciprocal %19 : vector<256x1xf32> -> vector<256x1xf32>
    %21 = arith.mulf %19, %20 : vector<256x1xf32>
    %22 = arith.mulf %21, %8 : vector<256x1xf32>
    %23 = arith.addf %22, %11 : vector<256x1xf32>
    %24 = vector.broadcast %0 : f32 to vector<256x1xf32>
    %25 = arith.addf %23, %24 : vector<256x1xf32>
    %cst_9 = arith.constant 0.000000e+00 : f32
    %26 = vector.broadcast %cst_9 : f32 to vector<256x1xf32>
    %27 = arith.maximumf %25, %26 : vector<256x1xf32>
    %28 = arith.maximumf %17, %27 : vector<256x1xf32>
    %29 = arith.subf %17, %28 : vector<256x1xf32>
    %30 = math.exp %29 : vector<256x1xf32>
    %31 = arith.subf %27, %28 : vector<256x1xf32>
    %32 = math.exp %31 : vector<256x1xf32>
    %33 = arith.addf %30, %32 : vector<256x1xf32>
    %34 = tpu.reciprocal %33 : vector<256x1xf32> -> vector<256x1xf32>
    %35 = arith.mulf %30, %34 : vector<256x1xf32>
    %36 = arith.mulf %32, %34 : vector<256x1xf32>
    %37 = arith.mulf %35, %8 : vector<256x1xf32>
    %38 = arith.mulf %36, %9 : vector<256x1xf32>
    %39 = arith.addf %37, %38 : vector<256x1xf32>
    %40 = arith.addf %39, %12 : vector<256x1xf32>
    %41 = vector.broadcast %0 : f32 to vector<256x1xf32>
    %42 = arith.addf %40, %41 : vector<256x1xf32>
    %cst_10 = arith.constant 0.000000e+00 : f32
    %43 = vector.broadcast %cst_10 : f32 to vector<256x1xf32>
    %44 = arith.maximumf %42, %43 : vector<256x1xf32>
    %45 = arith.maximumf %17, %27 : vector<256x1xf32>
    %46 = arith.maximumf %45, %44 : vector<256x1xf32>
    %47 = arith.subf %17, %46 : vector<256x1xf32>
    %48 = math.exp %47 : vector<256x1xf32>
    %49 = arith.subf %27, %46 : vector<256x1xf32>
    %50 = math.exp %49 : vector<256x1xf32>
    %51 = arith.subf %44, %46 : vector<256x1xf32>
    %52 = math.exp %51 : vector<256x1xf32>
    %53 = arith.addf %48, %50 : vector<256x1xf32>
    %54 = arith.addf %53, %52 : vector<256x1xf32>
    %55 = tpu.reciprocal %54 : vector<256x1xf32> -> vector<256x1xf32>
    %56 = arith.mulf %48, %55 : vector<256x1xf32>
    %57 = arith.mulf %50, %55 : vector<256x1xf32>
    %58 = arith.mulf %52, %55 : vector<256x1xf32>
    %59 = vector.broadcast %56 : vector<256x1xf32> to vector<256x32xf32>
    %60 = arith.mulf %2, %59 : vector<256x32xf32>
    %61 = vector.broadcast %57 : vector<256x1xf32> to vector<256x32xf32>
    %62 = arith.mulf %3, %61 : vector<256x32xf32>
    %63 = vector.broadcast %58 : vector<256x1xf32> to vector<256x32xf32>
    %64 = arith.mulf %4, %63 : vector<256x32xf32>
    %65 = tpu.concatenate %60, %62, %64 in 1 : vector<256x32xf32>, vector<256x32xf32>, vector<256x32xf32> -> vector<256x96xf32>
    %c0_11 = arith.constant 0 : index
    %c0_12 = arith.constant 0 : index
    %66 = vector.load %arg6[%c0_11, %c0_12] : memref<96x64xf32, #tpu.memory_space<vmem>>, vector<96x64xf32>
    %cst_13 = arith.constant dense<0.000000e+00> : vector<256x64xf32>
    %67 = tpu.matmul %65, %66, %cst_13 {dimension_numbers = #tpu.dot_dimension_numbers<[1], [0], [0], [1], [0, 0, 1, 1], [], []>} : vector<256x96xf32>, vector<96x64xf32>, vector<256x64xf32> -> vector<256x64xf32>
    %68 = vector.extract_strided_slice %67 {offsets = [0, 0], sizes = [256, 32], strides = [1, 1]} : vector<256x64xf32> to vector<256x32xf32>
    %c0_14 = arith.constant 0 : index
    %c0_15 = arith.constant 0 : index
    %69 = vector.load %arg7[%c0_14, %c0_15] : memref<1x32xf32, #tpu.memory_space<vmem>>, vector<1x32xf32>
    %70 = vector.broadcast %69 : vector<1x32xf32> to vector<256x32xf32>
    %71 = arith.mulf %68, %70 : vector<256x32xf32>
    %c0_16 = arith.constant 0 : index
    %c0_17 = arith.constant 0 : index
    %72 = vector.load %arg8[%c0_16, %c0_17] : memref<1x32xf32, #tpu.memory_space<vmem>>, vector<1x32xf32>
    %73 = vector.broadcast %72 : vector<1x32xf32> to vector<256x32xf32>
    %74 = arith.addf %71, %73 : vector<256x32xf32>
    %75 = vector.extract_strided_slice %67 {offsets = [0, 32], sizes = [256, 32], strides = [1, 1]} : vector<256x64xf32> to vector<256x32xf32>
    %76 = arith.addf %74, %75 : vector<256x32xf32>
    %cst_18 = arith.constant 0.000000e+00 : f32
    %77 = vector.broadcast %cst_18 : f32 to vector<256x32xf32>
    %78 = arith.cmpf oge, %76, %77 : vector<256x32xf32>
    %79 = vector.broadcast %1 : f32 to vector<256x32xf32>
    %80 = arith.mulf %79, %76 : vector<256x32xf32>
    %81 = arith.select %78, %76, %80 : vector<256x32xi1>, vector<256x32xf32>
    %cst_19 = arith.constant 5.000000e-01 : f32
    %82 = vector.broadcast %cst_19 : f32 to vector<256x32xf32>
    %83 = arith.mulf %82, %81 : vector<256x32xf32>
    %cst_20 = arith.constant 5.000000e-01 : f32
    %84 = vector.broadcast %cst_20 : f32 to vector<256x32xf32>
    %85 = arith.mulf %84, %76 : vector<256x32xf32>
    %86 = arith.addf %83, %85 : vector<256x32xf32>
    %c0_21 = arith.constant 0 : index
    %c0_22 = arith.constant 0 : index
    %c0_23 = arith.constant 0 : index
    %87 = vector.load %arg9[%c0_21, %c0_22, %c0_23] : memref<1x32x32xf32, #tpu.memory_space<vmem>>, vector<1x32x32xf32>
    %88 = vector.shape_cast %87 : vector<1x32x32xf32> to vector<32x32xf32>
    %cst_24 = arith.constant dense<0.000000e+00> : vector<256x32xf32>
    %89 = tpu.matmul %86, %88, %cst_24 {dimension_numbers = #tpu.dot_dimension_numbers<[1], [0], [0], [1], [0, 0, 1, 1], [], []>} : vector<256x32xf32>, vector<32x32xf32>, vector<256x32xf32> -> vector<256x32xf32>
    %90 = arith.addf %89, %81 : vector<256x32xf32>
    %cst_25 = arith.constant 0.000000e+00 : f32
    %91 = vector.broadcast %cst_25 : f32 to vector<256x32xf32>
    %92 = arith.cmpf oge, %90, %91 : vector<256x32xf32>
    %93 = vector.broadcast %1 : f32 to vector<256x32xf32>
    %94 = arith.mulf %93, %90 : vector<256x32xf32>
    %95 = arith.select %92, %90, %94 : vector<256x32xi1>, vector<256x32xf32>
    %c0_26 = arith.constant 0 : index
    %c0_27 = arith.constant 0 : index
    %96 = vector.load %arg10[%c0_26, %c0_27] : memref<32x8xf32, #tpu.memory_space<vmem>>, vector<32x8xf32>
    %cst_28 = arith.constant dense<0.000000e+00> : vector<256x8xf32>
    %97 = tpu.matmul %95, %96, %cst_28 {dimension_numbers = #tpu.dot_dimension_numbers<[1], [0], [0], [1], [0, 0, 1, 1], [], []>} : vector<256x32xf32>, vector<32x8xf32>, vector<256x8xf32> -> vector<256x8xf32>
    %c0_29 = arith.constant 0 : index
    %c0_30 = arith.constant 0 : index
    %98 = vector.load %arg11[%c0_29, %c0_30] : memref<1x8xf32, #tpu.memory_space<vmem>>, vector<1x8xf32>
    %99 = vector.broadcast %98 : vector<1x8xf32> to vector<256x8xf32>
    %100 = arith.mulf %97, %99 : vector<256x8xf32>
    %c0_31 = arith.constant 0 : index
    %c0_32 = arith.constant 0 : index
    %101 = vector.load %arg12[%c0_31, %c0_32] : memref<1x8xf32, #tpu.memory_space<vmem>>, vector<1x8xf32>
    %102 = vector.broadcast %101 : vector<1x8xf32> to vector<256x8xf32>
    %103 = arith.addf %100, %102 : vector<256x8xf32>
    %c0_33 = arith.constant 0 : index
    %c0_34 = arith.constant 0 : index
    %104 = vector.load %arg13[%c0_33, %c0_34] : memref<256x8xf32, #tpu.memory_space<vmem>>, vector<256x8xf32>
    tpu.vector_store %arg13[%c0_33, %c0_34], %103 {strides = array<i32>} : memref<256x8xf32, #tpu.memory_space<vmem>>, vector<256x8xf32>,
    return
  }
  func.func @transform_0(%arg0: i32) -> (i32, i32) {
    %c0_i32 = arith.constant 0 : i32
    %c0_i32_0 = arith.constant 0 : i32
    return %arg0, %c0_i32 : i32, i32
  }
  func.func @transform_1(%arg0: i32) -> (i32, i32) {
    %c0_i32 = arith.constant 0 : i32
    %c0_i32_0 = arith.constant 0 : i32
    return %arg0, %c0_i32 : i32, i32
  }
  func.func @transform_2(%arg0: i32) -> (i32, i32) {
    %c0_i32 = arith.constant 0 : i32
    %c0_i32_0 = arith.constant 0 : i32
    return %arg0, %c0_i32 : i32, i32
  }
  func.func @transform_3(%arg0: i32) -> (i32, i32) {
    %c0_i32 = arith.constant 0 : i32
    %c0_i32_0 = arith.constant 0 : i32
    %c0_i32_1 = arith.constant 0 : i32
    return %c0_i32, %c0_i32_0 : i32, i32
  }
  func.func @transform_4(%arg0: i32) -> i32 {
    %c0_i32 = arith.constant 0 : i32
    %c0_i32_0 = arith.constant 0 : i32
    return %c0_i32 : i32
  }
  func.func @transform_5(%arg0: i32) -> (i32, i32) {
    %c0_i32 = arith.constant 0 : i32
    %c0_i32_0 = arith.constant 0 : i32
    %c0_i32_1 = arith.constant 0 : i32
    return %c0_i32, %c0_i32_0 : i32, i32
  }
  func.func @transform_6(%arg0: i32) -> (i32, i32) {
    %c0_i32 = arith.constant 0 : i32
    %c0_i32_0 = arith.constant 0 : i32
    %c0_i32_1 = arith.constant 0 : i32
    return %c0_i32, %c0_i32_0 : i32, i32
  }
  func.func @transform_7(%arg0: i32) -> (i32, i32) {
    %c0_i32 = arith.constant 0 : i32
    %c0_i32_0 = arith.constant 0 : i32
    %c0_i32_1 = arith.constant 0 : i32
    return %c0_i32, %c0_i32_0 : i32, i32
  }
  func.func @transform_8(%arg0: i32) -> (i32, i32, i32) {
    %c0_i32 = arith.constant 0 : i32
    %c0_i32_0 = arith.constant 0 : i32
    %c0_i32_1 = arith.constant 0 : i32
    %c0_i32_2 = arith.constant 0 : i32
    return %c0_i32, %c0_i32_0, %c0_i32_1 : i32, i32, i32
  }
  func.func @transform_9(%arg0: i32) -> (i32, i32) {
    %c0_i32 = arith.constant 0 : i32
    %c0_i32_0 = arith.constant 0 : i32
    %c0_i32_1 = arith.constant 0 : i32
    return %c0_i32, %c0_i32_0 : i32, i32
  }
  func.func @transform_10(%arg0: i32) -> (i32, i32) {
    %c0_i32 = arith.constant 0 : i32
    %c0_i32_0 = arith.constant 0 : i32
    %c0_i32_1 = arith.constant 0 : i32
    return %c0_i32, %c0_i32_0 : i32, i32
  }
  func.func @transform_11(%arg0: i32) -> (i32, i32) {
    %c0_i32 = arith.constant 0 : i32
    %c0_i32_0 = arith.constant 0 : i32
    %c0_i32_1 = arith.constant 0 : i32
    return %c0_i32, %c0_i32_0 : i32, i32
  }
  func.func @transform_12(%arg0: i32) -> (i32, i32) {
    %c0_i32 = arith.constant 0 : i32
    %c0_i32_0 = arith.constant 0 : i32
    return %arg0, %c0_i32 : i32, i32
  }
}

</mosaic_0001>

<bundles_post_ra>
// kernel: tpu_custom_call.1
= control target key start
LH: loop header
LB: loop body
LE: loop exit
PB: predicated region body
PF: predicated region fallthrough
CT: control target
= control target key end

     0   :  { %17 = vsyncpa [#allocation3], 0  ;;  %s10623_s0 = inlined_call_operand.vmem [shape: f32[256,32], index: 0, kind: input, shape index: {}]   ;;  %s10624_s1 = inlined_call_operand.vmem [shape: f32[256,32], index: 1, kind: input, shape index: {}]   ;;  %s10625_s2 = inlined_call_operand.vmem [shape: f32[256,32], index: 2, kind: input, shape index: {}]   ;;  %s10626_s3 = inlined_call_operand.vmem [shape: f32[96,6], index: 3, kind: input, shape index: {}]   ;;  %s10627_s4 = inlined_call_operand.vmem [shape: f32[2], index: 4, kind: input, shape index: {}]   ;;  %s10628_s5 = inlined_call_operand.vmem [shape: f32[96,64], index: 5, kind: input, shape index: {}]   ;;  %s10629_s6 = inlined_call_operand.vmem [shape: f32[1,32], index: 6, kind: input, shape index: {}]   ;;  %s10630_s7 = inlined_call_operand.vmem [shape: f32[1,32], index: 7, kind: input, shape index: {}]   ;;  %s10631_s8 = inlined_call_operand.vmem [shape: f32[1,32,32], index: 8, kind: input, shape index: {}]   ;;  %s10632_s9 = inlined_call_operand.vmem [shape: f32[32,8], index: 9, kind: input, shape index: {}]   ;;  %s10633_s10 = inlined_call_operand.vmem [shape: f32[1,8], index: 10, kind: input, shape index: {}]   ;;  %s10634_s11 = inlined_call_operand.vmem [shape: f32[1,8], index: 11, kind: input, shape index: {}]   ;;  %s10635_s12 = inlined_call_operand.vmem [shape: f32[256,8], index: 12, kind: output, shape index: {}]  }
   0x1   :  { %s32_s23 = sshll.u32 %s10627_s4, 4  ;;  %s33_s23 = int_to_ptr.vmem [resolvable:$true] %s32_s23 }
   0x2   :  { %s6419_s24 = scalar_lea.vmem %s33_s23, 16  ;;  %p6424_p1 = scmp.lt.s32.totalorder %s33_s23, %s33_s23 }
   0x3   :  { %p6420_p0 = scmp.ne.s32.totalorder %s33_s23, %s6419_s24  ;;  %p6425_p2 = scmp.lt.s32.totalorder %s6419_s24, %s6419_s24 }
   0x5   :  { %p6426_p3 = por %p6425_p2, %p6424_p1 }
   0x7   :  { %p6427_p4 = pnand %p6426_p3, %p6420_p0 }
   0x9   :  { %6430 = shalt.err (!%p6427_p4)
}
   0xa   :  { %s6433_s25 = smov [#allocation2]  }
   0xb   :  { %35 = dma.vmem_to_smem %s33_s23, 16, %s6433_s25, [#allocation3]  }
   0xc   :  { %6431 = dma.done.wait [#allocation3], 16  }
   0xd   :  { %6432 = vsyncadd [#allocation3], 4294967280 }
   0xe   :  { %53 = sfence }
   0xf   :  { %v88_v0 = vld [vmem:[%s10624_s1] sm:$0xff]  ;;  %s6434_s4 = smov 32   ;;  %s6435_s30 = smov 64   ;;  %v89_v2 = vld [vmem:[%s10624_s1 + $0x8] sm:$0xff]  ;;  %v90_v4 = vld [vmem:[%s10624_s1 + $0x10] sm:$0xff]  ;;  %vm408_vm0 = vcmask 261120  }
  0x10   :  { %v120_v1 = vld [vmem:[%s10625_s2] sm:$0xff]  ;;  %184 = vrot.lane.b32.xlu0 %v88_v0, %s6434_s4  ;;  %v121_v3 = vld [vmem:[%s10625_s2 + $0x8] sm:$0xff]  ;;  %v91_v5 = vld [vmem:[%s10624_s1 + $0x18] sm:$0xff]  ;;  %vm441_vm1 = vcmask 523264   ;;  %vm486_vm2 = vcmask 785408   ;;  %s6436_s29 = smov 125  }
  0x11   :  { %312 = vrot.lane.b32.xlu1 %v120_v1, %s6435_s30  ;;  %v122_v6 = vld [vmem:[%s10625_s2 + $0x10] sm:$0xff]  ;;  %v123_v7 = vld [vmem:[%s10625_s2 + $0x18] sm:$0xff]  ;;  %v483_v10 = vld [vmem:[%s10626_s3 + $0x48] sm:$0xff]  ;;  %s6437_s13 = smov 124   ;;  %s6438_s14 = smov 127  }
  0x12   :  { %v485_v8 = vld [vmem:[%s10626_s3 + $0x58] sm:$0xff]  ;;  %v484_v9 = vld [vmem:[%s10626_s3 + $0x50] sm:$0xff]  ;;  %v92_v11 = vld [vmem:[%s10624_s1 + $0x20] sm:$0xff]  ;;  %s6439_s15 = smov 123   ;;  %s54_s16 = sld [smem:[#allocation2]] }
  0x13   :  { %5480 = vmatprep.subr.mxu0 %v485_v8  ;;  %v93_v12 = vld [vmem:[%s10624_s1 + $0x28] sm:$0xff]  ;;  %v482_v13 = vld [vmem:[%s10626_s3 + $0x40] sm:$0xff]  ;;  %v481_v16 = vld [vmem:[%s10626_s3 + $0x38] sm:$0xff] }
  0x14   :  { %186 = vrot.lane.b32.xlu0 %v89_v2, %s6434_s4  ;;  %5481 = vmatpush3.msra.mxu0 %v485_v8  ;;  %v124_v14 = vld [vmem:[%s10625_s2 + $0x20] sm:$0xff]  ;;  %v125_v15 = vld [vmem:[%s10625_s2 + $0x28] sm:$0xff]  ;;  %v480_v17 = vld [vmem:[%s10626_s3 + $0x30] sm:$0xff] }
  0x15   :  { %314 = vrot.lane.b32.xlu1 %v121_v3, %s6435_s30  ;;  %5482 = vmatprep.subr.mxu0 %v484_v9  ;;  %v94_v18 = vld [vmem:[%s10624_s1 + $0x30] sm:$0xff]  ;;  %v95_v19 = vld [vmem:[%s10624_s1 + $0x38] sm:$0xff]  ;;  %v479_v20 = vld [vmem:[%s10626_s3 + $0x28] sm:$0xff] }
  0x16   :  { %5483 = vmatpush3.msra.mxu0 %v484_v9  ;;  %v126_v21 = vld [vmem:[%s10625_s2 + $0x30] sm:$0xff]  ;;  %v127_v22 = vld [vmem:[%s10625_s2 + $0x38] sm:$0xff]  ;;  %v478_v23 = vld [vmem:[%s10626_s3 + $0x20] sm:$0xff] }
  0x17   :  { %5484 = vmatprep.subr.mxu0 %v483_v10  ;;  %v477_v24 = vld [vmem:[%s10626_s3 + $0x18] sm:$0xff]  ;;  %v96_v25 = vld [vmem:[%s10624_s1 + $0x40] sm:$0xff]  ;;  %v97_v26 = vld [vmem:[%s10624_s1 + $0x48] sm:$0xff] }
  0x18   :  { %188 = vrot.lane.b32.xlu0 %v90_v4, %s6434_s4  ;;  %5485 = vmatpush3.msra.mxu0 %v483_v10  ;;  %v476_v27 = vld [vmem:[%s10626_s3 + $0x10] sm:$0xff]  ;;  %v128_v28 = vld [vmem:[%s10625_s2 + $0x40] sm:$0xff]  ;;  %v129_v29 = vld [vmem:[%s10625_s2 + $0x48] sm:$0xff] }
  0x19   :  { %190 = vrot.lane.b32.xlu1 %v91_v5, %s6434_s4  ;;  %5486 = vmatprep.subr.mxu0 %v482_v13  ;;  %v475_v30 = vld [vmem:[%s10626_s3 + $0x8] sm:$0xff]  ;;  %v474_v31 = vld [vmem:[%s10626_s3] sm:$0xff]  ;;  %v98_v32 = vld [vmem:[%s10624_s1 + $0x50] sm:$0xff] }
  0x1a   :  { %5487 = vmatpush3.msra.mxu0 %v482_v13  ;;  %v99_v33 = vld [vmem:[%s10624_s1 + $0x58] sm:$0xff]  ;;  %v130_v34 = vld [vmem:[%s10625_s2 + $0x50] sm:$0xff]  ;;  %v100_v36 = vld [vmem:[%s10624_s1 + $0x60] sm:$0xff] }
  0x1b   :  { %5488 = vmatprep.subr.mxu0 %v481_v16  ;;  %v131_v35 = vld [vmem:[%s10625_s2 + $0x58] sm:$0xff]  ;;  %v101_v37 = vld [vmem:[%s10624_s1 + $0x68] sm:$0xff]  ;;  %v132_v38 = vld [vmem:[%s10625_s2 + $0x60] sm:$0xff] }
  0x1c   :  { %316 = vrot.lane.b32.xlu0 %v122_v6, %s6435_s30  ;;  %5489 = vmatpush3.msra.mxu0 %v481_v16  ;;  %v133_v39 = vld [vmem:[%s10625_s2 + $0x68] sm:$0xff]  ;;  %v102_v40 = vld [vmem:[%s10624_s1 + $0x70] sm:$0xff]  ;;  %v103_v41 = vld [vmem:[%s10624_s1 + $0x78] sm:$0xff] }
  0x1d   :  { %318 = vrot.lane.b32.xlu1 %v123_v7, %s6435_s30  ;;  %5490 = vmatprep.subr.mxu0 %v480_v17  ;;  %v134_v42 = vld [vmem:[%s10625_s2 + $0x70] sm:$0xff]  ;;  %v135_v43 = vld [vmem:[%s10625_s2 + $0x78] sm:$0xff]  ;;  %v104_v44 = vld [vmem:[%s10624_s1 + $0x80] sm:$0xff] }
  0x1e   :  { %5491 = vmatpush3.msra.mxu0 %v480_v17  ;;  %v105_v45 = vld [vmem:[%s10624_s1 + $0x88] sm:$0xff]  ;;  %v136_v46 = vld [vmem:[%s10625_s2 + $0x80] sm:$0xff]  ;;  %v106_v48 = vld [vmem:[%s10624_s1 + $0x90] sm:$0xff] }
  0x1f   :  { %5492 = vmatprep.subr.mxu0 %v479_v20  ;;  %v137_v47 = vld [vmem:[%s10625_s2 + $0x88] sm:$0xff]  ;;  %v107_v49 = vld [vmem:[%s10624_s1 + $0x98] sm:$0xff]  ;;  %v138_v50 = vld [vmem:[%s10625_s2 + $0x90] sm:$0xff] }
  0x20   :  { %192 = vrot.lane.b32.xlu0 %v92_v11, %s6434_s4  ;;  %5493 = vmatpush3.msra.mxu0 %v479_v20  ;;  %v139_v51 = vld [vmem:[%s10625_s2 + $0x98] sm:$0xff]  ;;  %v108_v52 = vld [vmem:[%s10624_s1 + $0xa0] sm:$0xff]  ;;  %v109_v53 = vld [vmem:[%s10624_s1 + $0xa8] sm:$0xff] }
  0x21   :  { %194 = vrot.lane.b32.xlu1 %v93_v12, %s6434_s4  ;;  %5494 = vmatprep.subr.mxu0 %v478_v23  ;;  %v140_v54 = vld [vmem:[%s10625_s2 + $0xa0] sm:$0xff]  ;;  %v141_v55 = vld [vmem:[%s10625_s2 + $0xa8] sm:$0xff]  ;;  %v110_v56 = vld [vmem:[%s10624_s1 + $0xb0] sm:$0xff] }
  0x22   :  { %5495 = vmatpush3.msra.mxu0 %v478_v23  ;;  %v111_v57 = vld [vmem:[%s10624_s1 + $0xb8] sm:$0xff]  ;;  %v142_v58 = vld [vmem:[%s10625_s2 + $0xb0] sm:$0xff]  ;;  %v112_v60 = vld [vmem:[%s10624_s1 + $0xc0] sm:$0xff] }
  0x23   :  { %5496 = vmatprep.subr.mxu0 %v477_v24  ;;  %v143_v59 = vld [vmem:[%s10625_s2 + $0xb8] sm:$0xff]  ;;  %v113_v61 = vld [vmem:[%s10624_s1 + $0xc8] sm:$0xff]  ;;  %v144_v62 = vld [vmem:[%s10625_s2 + $0xc0] sm:$0xff] }
  0x24   :  { %320 = vrot.lane.b32.xlu0 %v124_v14, %s6435_s30  ;;  %5497 = vmatpush3.msra.mxu0 %v477_v24  ;;  %v145_v63 = vld [vmem:[%s10625_s2 + $0xc8] sm:$0xff]  ;;  %v114_v0 = vld [vmem:[%s10624_s1 + $0xd0] sm:$0xff]  ;;  %v115_v1 = vld [vmem:[%s10624_s1 + $0xd8] sm:$0xff] }
  0x25   :  { %322 = vrot.lane.b32.xlu1 %v125_v15, %s6435_s30  ;;  %5498 = vmatprep.subr.mxu0 %v476_v27  ;;  %v146_v2 = vld [vmem:[%s10625_s2 + $0xd0] sm:$0xff]  ;;  %v147_v3 = vld [vmem:[%s10625_s2 + $0xd8] sm:$0xff]  ;;  %v116_v4 = vld [vmem:[%s10624_s1 + $0xe0] sm:$0xff] }
  0x26   :  { %5499 = vmatpush3.msra.mxu0 %v476_v27  ;;  %v117_v5 = vld [vmem:[%s10624_s1 + $0xe8] sm:$0xff]  ;;  %v56_v6 = vld [vmem:[%s10623_s0] sm:$0xff]  ;;  %v118_v14 = vld [vmem:[%s10624_s1 + $0xf0] sm:$0xff] }
  0x27   :  { %5500 = vmatprep.subr.mxu0 %v475_v30  ;;  %v148_v7 = vld [vmem:[%s10625_s2 + $0xe0] sm:$0xff]  ;;  %v149_v8 = vld [vmem:[%s10625_s2 + $0xe8] sm:$0xff]  ;;  %v119_v15 = vld [vmem:[%s10624_s1 + $0xf8] sm:$0xff] }
  0x28   :  { %196 = vrot.lane.b32.xlu0 %v94_v18, %s6434_s4  ;;  %5501 = vmatpush3.msra.mxu0 %v475_v30  ;;  %v57_v13 = vld [vmem:[%s10623_s0 + $0x8] sm:$0xff]  ;;  %v58_v20 = vld [vmem:[%s10623_s0 + $0x10] sm:$0xff]  ;;  %v151_v23 = vld [vmem:[%s10625_s2 + $0xf8] sm:$0xff] }
  0x29   :  { %198 = vrot.lane.b32.xlu1 %v95_v19, %s6434_s4  ;;  %5502 = vmatprep.subr.mxu0 %v474_v31 }
  0x2a   :  { %5503 = vmatpush3.msra.mxu0 %v474_v31 }
  0x2c   :  { %324 = vrot.lane.b32.xlu0 %v126_v21, %s6435_s30  ;;  %v59_v21 = vld [vmem:[%s10623_s0 + $0x18] sm:$0xff] }
  0x2d   :  { %326 = vrot.lane.b32.xlu1 %v127_v22, %s6435_s30  ;;  %v150_v22 = vld [vmem:[%s10625_s2 + $0xf0] sm:$0xff] }
  0x30   :  { %200 = vrot.lane.b32.xlu0 %v96_v25, %s6434_s4 }
  0x31   :  { %202 = vrot.lane.b32.xlu1 %v97_v26, %s6434_s4 }
  0x34   :  { %328 = vrot.lane.b32.xlu0 %v128_v28, %s6435_s30 }
  0x35   :  { %330 = vrot.lane.b32.xlu1 %v129_v29, %s6435_s30 }
  0x38   :  { %204 = vrot.lane.b32.xlu0 %v98_v32, %s6434_s4  ;;  %v60_v32 = vld [vmem:[%s10623_s0 + $0x20] sm:$0xff] }
  0x39   :  { %206 = vrot.lane.b32.xlu1 %v99_v33, %s6434_s4  ;;  %v61_v33 = vld [vmem:[%s10623_s0 + $0x28] sm:$0xff] }
  0x3c   :  { %332 = vrot.lane.b32.xlu0 %v130_v34, %s6435_s30 }
  0x3d   :  { %334 = vrot.lane.b32.xlu1 %v131_v35, %s6435_s30 }
  0x40   :  { %208 = vrot.lane.b32.xlu0 %v100_v36, %s6434_s4 }
  0x41   :  { %210 = vrot.lane.b32.xlu1 %v101_v37, %s6434_s4 }
  0x44   :  { %336 = vrot.lane.b32.xlu0 %v132_v38, %s6435_s30 }
  0x45   :  { %338 = vrot.lane.b32.xlu1 %v133_v39, %s6435_s30 }
  0x48   :  { %212 = vrot.lane.b32.xlu0 %v102_v40, %s6434_s4 }
  0x49   :  { %214 = vrot.lane.b32.xlu1 %v103_v41, %s6434_s4 }
  0x4c   :  { %340 = vrot.lane.b32.xlu0 %v134_v42, %s6435_s30  ;;  %v62_v42 = vld [vmem:[%s10623_s0 + $0x30] sm:$0xff] }
  0x4d   :  { %342 = vrot.lane.b32.xlu1 %v135_v43, %s6435_s30  ;;  %v63_v43 = vld [vmem:[%s10623_s0 + $0x38] sm:$0xff] }
  0x50   :  { %216 = vrot.lane.b32.xlu0 %v104_v44, %s6434_s4 }
  0x51   :  { %218 = vrot.lane.b32.xlu1 %v105_v45, %s6434_s4 }
  0x54   :  { %344 = vrot.lane.b32.xlu0 %v136_v46, %s6435_s30 }
  0x55   :  { %346 = vrot.lane.b32.xlu1 %v137_v47, %s6435_s30 }
  0x58   :  { %220 = vrot.lane.b32.xlu0 %v106_v48, %s6434_s4 }
  0x59   :  { %222 = vrot.lane.b32.xlu1 %v107_v49, %s6434_s4 }
  0x5c   :  { %348 = vrot.lane.b32.xlu0 %v138_v50, %s6435_s30 }
  0x5d   :  { %350 = vrot.lane.b32.xlu1 %v139_v51, %s6435_s30 }
  0x60   :  { %224 = vrot.lane.b32.xlu0 %v108_v52, %s6434_s4  ;;  %v64_v52 = vld [vmem:[%s10623_s0 + $0x40] sm:$0xff] }
  0x61   :  { %226 = vrot.lane.b32.xlu1 %v109_v53, %s6434_s4  ;;  %v65_v53 = vld [vmem:[%s10623_s0 + $0x48] sm:$0xff] }
  0x64   :  { %352 = vrot.lane.b32.xlu0 %v140_v54, %s6435_s30 }
  0x65   :  { %354 = vrot.lane.b32.xlu1 %v141_v55, %s6435_s30 }
  0x68   :  { %228 = vrot.lane.b32.xlu0 %v110_v56, %s6434_s4 }
  0x69   :  { %230 = vrot.lane.b32.xlu1 %v111_v57, %s6434_s4 }
  0x6c   :  { %356 = vrot.lane.b32.xlu0 %v142_v58, %s6435_s30 }
  0x6d   :  { %358 = vrot.lane.b32.xlu1 %v143_v59, %s6435_s30 }
  0x70   :  { %232 = vrot.lane.b32.xlu0 %v112_v60, %s6434_s4 }
  0x71   :  { %234 = vrot.lane.b32.xlu1 %v113_v61, %s6434_s4 }
  0x74   :  { %360 = vrot.lane.b32.xlu0 %v144_v62, %s6435_s30  ;;  %v66_v62 = vld [vmem:[%s10623_s0 + $0x50] sm:$0xff] }
  0x75   :  { %362 = vrot.lane.b32.xlu1 %v145_v63, %s6435_s30  ;;  %v67_v63 = vld [vmem:[%s10623_s0 + $0x58] sm:$0xff] }
  0x78   :  { %236 = vrot.lane.b32.xlu0 %v114_v0, %s6434_s4 }
  0x79   :  { %238 = vrot.lane.b32.xlu1 %v115_v1, %s6434_s4 }
  0x7c   :  { %364 = vrot.lane.b32.xlu0 %v146_v2, %s6435_s30 }
  0x7d   :  { %366 = vrot.lane.b32.xlu1 %v147_v3, %s6435_s30 }
  0x80   :  { %240 = vrot.lane.b32.xlu0 %v116_v4, %s6434_s4 }
  0x81   :  { %242 = vrot.lane.b32.xlu1 %v117_v5, %s6434_s4 }
  0x82   :  { %v185_v9 = vpop.permute.xlu0 %184 }
  0x83   :  { %v313_v10 = vpop.permute.xlu1 %312  ;;  %v409_v11 = vsel %vm408_vm0, %v56_v6, %v185_v9  ;;  %v69_v9 = vld [vmem:[%s10623_s0 + $0x68] sm:$0xff] }
  0x84   :  { %v442_v12 = vsel %vm441_vm1, %v409_v11, %v313_v10  ;;  %368 = vrot.lane.b32.xlu0 %v148_v7, %s6435_s30 }
  0x85   :  { %370 = vrot.lane.b32.xlu1 %v149_v8, %s6435_s30  ;;  %5504 = vmatprep.mubr.msk.f32.mxu0 %vm486_vm2, %v442_v12  ;;  %v68_v8 = vld [vmem:[%s10623_s0 + $0x60] sm:$0xff] }
  0x86   :  { %v187_v16 = vpop.permute.xlu0 %186 }
  0x87   :  { %v315_v17 = vpop.permute.xlu1 %314  ;;  %v410_v18 = vsel %vm408_vm0, %v57_v13, %v187_v16 }
  0x88   :  { %v443_v19 = vsel %vm441_vm1, %v410_v18, %v315_v17  ;;  %244 = vrot.lane.b32.xlu0 %v118_v14, %s6434_s4  ;;  %v70_v18 = vld [vmem:[%s10623_s0 + $0x70] sm:$0xff] }
  0x89   :  { %246 = vrot.lane.b32.xlu1 %v119_v15, %s6434_s4  ;;  %5505 = vmatmul.mubr.msk.f32.vlgmr.msra.gmra.mxu0 %vm486_vm2, %v443_v19  ;;  %v71_v19 = vld [vmem:[%s10623_s0 + $0x78] sm:$0xff] }
  0x8a   :  { %v189_v24 = vpop.permute.xlu0 %188 }
  0x8b   :  { %v191_v25 = vpop.permute.xlu1 %190  ;;  %v411_v26 = vsel %vm408_vm0, %v58_v20, %v189_v24 }
  0x8c   :  { %v412_v27 = vsel %vm408_vm0, %v59_v21, %v191_v25  ;;  %372 = vrot.lane.b32.xlu0 %v150_v22, %s6435_s30 }
  0x8d   :  { %374 = vrot.lane.b32.xlu1 %v151_v23, %s6435_s30 }
  0x8e   :  { %v317_v28 = vpop.permute.xlu0 %316 }
  0x8f   :  { %v319_v29 = vpop.permute.xlu1 %318  ;;  %v444_v30 = vsel %vm441_vm1, %v411_v26, %v317_v28  ;;  %v72_v28 = vld [vmem:[%s10623_s0 + $0x80] sm:$0xff] }
  0x90   :  { %v445_v31 = vsel %vm441_vm1, %v412_v27, %v319_v29  ;;  %5507 = vmatprep.mubr.msk.f32.mxu0 %vm486_vm2, %v444_v30  ;;  %v73_v29 = vld [vmem:[%s10623_s0 + $0x88] sm:$0xff] }
  0x91   :  { %5508 = vmatmul.mubr.msk.f32.gmra.mxu0 %vm486_vm2, %v445_v31 }
  0x92   :  { %v193_v34 = vpop.permute.xlu0 %192 }
  0x93   :  { %v195_v35 = vpop.permute.xlu1 %194  ;;  %v413_v36 = vsel %vm408_vm0, %v60_v32, %v193_v34 }
  0x94   :  { %v414_v37 = vsel %vm408_vm0, %v61_v33, %v195_v35 }
  0x96   :  { %v321_v38 = vpop.permute.xlu0 %320 }
  0x97   :  { %v323_v39 = vpop.permute.xlu1 %322  ;;  %v446_v40 = vsel %vm441_vm1, %v413_v36, %v321_v38  ;;  %v74_v38 = vld [vmem:[%s10623_s0 + $0x90] sm:$0xff] }
  0x98   :  { %v447_v41 = vsel %vm441_vm1, %v414_v37, %v323_v39  ;;  %5510 = vmatprep.mubr.msk.f32.mxu0 %vm486_vm2, %v446_v40  ;;  %v75_v39 = vld [vmem:[%s10623_s0 + $0x98] sm:$0xff] }
  0x99   :  { %5511 = vmatmul.mubr.msk.f32.gmra.mxu0 %vm486_vm2, %v447_v41 }
  0x9a   :  { %v197_v44 = vpop.permute.xlu0 %196 }
  0x9b   :  { %v199_v45 = vpop.permute.xlu1 %198  ;;  %v415_v46 = vsel %vm408_vm0, %v62_v42, %v197_v44 }
  0x9c   :  { %v416_v47 = vsel %vm408_vm0, %v63_v43, %v199_v45 }
  0x9e   :  { %v325_v48 = vpop.permute.xlu0 %324 }
  0x9f   :  { %v327_v49 = vpop.permute.xlu1 %326  ;;  %v448_v50 = vsel %vm441_vm1, %v415_v46, %v325_v48  ;;  %v76_v48 = vld [vmem:[%s10623_s0 + $0xa0] sm:$0xff] }
  0xa0   :  { %v449_v51 = vsel %vm441_vm1, %v416_v47, %v327_v49  ;;  %5513 = vmatprep.mubr.msk.f32.mxu0 %vm486_vm2, %v448_v50  ;;  %v77_v49 = vld [vmem:[%s10623_s0 + $0xa8] sm:$0xff] }
  0xa1   :  { %5514 = vmatmul.mubr.msk.f32.gmra.mxu0 %vm486_vm2, %v449_v51 }
  0xa2   :  { %v201_v54 = vpop.permute.xlu0 %200 }
  0xa3   :  { %v203_v55 = vpop.permute.xlu1 %202  ;;  %v417_v56 = vsel %vm408_vm0, %v64_v52, %v201_v54 }
  0xa4   :  { %v418_v57 = vsel %vm408_vm0, %v65_v53, %v203_v55 }
  0xa6   :  { %v329_v58 = vpop.permute.xlu0 %328 }
  0xa7   :  { %v331_v59 = vpop.permute.xlu1 %330  ;;  %v450_v60 = vsel %vm441_vm1, %v417_v56, %v329_v58  ;;  %v78_v58 = vld [vmem:[%s10623_s0 + $0xb0] sm:$0xff] }
  0xa8   :  { %v451_v61 = vsel %vm441_vm1, %v418_v57, %v331_v59  ;;  %5516 = vmatprep.mubr.msk.f32.mxu0 %vm486_vm2, %v450_v60  ;;  %v79_v59 = vld [vmem:[%s10623_s0 + $0xb8] sm:$0xff] }
  0xa9   :  { %5517 = vmatmul.mubr.msk.f32.gmra.mxu0 %vm486_vm2, %v451_v61 }
  0xaa   :  { %v205_v0 = vpop.permute.xlu0 %204 }
  0xab   :  { %v207_v1 = vpop.permute.xlu1 %206  ;;  %v419_v2 = vsel %vm408_vm0, %v66_v62, %v205_v0 }
  0xac   :  { %v420_v3 = vsel %vm408_vm0, %v67_v63, %v207_v1 }
  0xae   :  { %v333_v4 = vpop.permute.xlu0 %332 }
  0xaf   :  { %v335_v5 = vpop.permute.xlu1 %334  ;;  %v452_v6 = vsel %vm441_vm1, %v419_v2, %v333_v4  ;;  %v80_v4 = vld [vmem:[%s10623_s0 + $0xc0] sm:$0xff] }
  0xb0   :  { %v453_v7 = vsel %vm441_vm1, %v420_v3, %v335_v5  ;;  %5519 = vmatprep.mubr.msk.f32.mxu0 %vm486_vm2, %v452_v6  ;;  %v81_v5 = vld [vmem:[%s10623_s0 + $0xc8] sm:$0xff] }
  0xb1   :  { %5520 = vmatmul.mubr.msk.f32.gmra.mxu0 %vm486_vm2, %v453_v7 }
  0xb2   :  { %v209_v10 = vpop.permute.xlu0 %208 }
  0xb3   :  { %v211_v11 = vpop.permute.xlu1 %210  ;;  %v421_v12 = vsel %vm408_vm0, %v68_v8, %v209_v10 }
  0xb4   :  { %v422_v13 = vsel %vm408_vm0, %v69_v9, %v211_v11 }
  0xb6   :  { %v337_v14 = vpop.permute.xlu0 %336 }
  0xb7   :  { %v339_v15 = vpop.permute.xlu1 %338  ;;  %v454_v16 = vsel %vm441_vm1, %v421_v12, %v337_v14  ;;  %v82_v14 = vld [vmem:[%s10623_s0 + $0xd0] sm:$0xff] }
  0xb8   :  { %v455_v17 = vsel %vm441_vm1, %v422_v13, %v339_v15  ;;  %5522 = vmatprep.mubr.msk.f32.mxu0 %vm486_vm2, %v454_v16  ;;  %v83_v15 = vld [vmem:[%s10623_s0 + $0xd8] sm:$0xff] }
  0xb9   :  { %5523 = vmatmul.mubr.msk.f32.gmra.mxu0 %vm486_vm2, %v455_v17 }
  0xba   :  { %v213_v20 = vpop.permute.xlu0 %212 }
  0xbb   :  { %v215_v21 = vpop.permute.xlu1 %214  ;;  %v423_v22 = vsel %vm408_vm0, %v70_v18, %v213_v20 }
  0xbc   :  { %v424_v23 = vsel %vm408_vm0, %v71_v19, %v215_v21 }
  0xbe   :  { %v341_v24 = vpop.permute.xlu0 %340 }
  0xbf   :  { %v343_v25 = vpop.permute.xlu1 %342  ;;  %v456_v26 = vsel %vm441_vm1, %v423_v22, %v341_v24  ;;  %v84_v24 = vld [vmem:[%s10623_s0 + $0xe0] sm:$0xff] }
  0xc0   :  { %v457_v27 = vsel %vm441_vm1, %v424_v23, %v343_v25  ;;  %5525 = vmatprep.mubr.msk.f32.mxu0 %vm486_vm2, %v456_v26  ;;  %v85_v25 = vld [vmem:[%s10623_s0 + $0xe8] sm:$0xff] }
  0xc1   :  { %5526 = vmatmul.mubr.msk.f32.gmra.mxu0 %vm486_vm2, %v457_v27 }
  0xc2   :  { %v217_v30 = vpop.permute.xlu0 %216 }
  0xc3   :  { %v219_v31 = vpop.permute.xlu1 %218  ;;  %v425_v32 = vsel %vm408_vm0, %v72_v28, %v217_v30 }
  0xc4   :  { %v426_v33 = vsel %vm408_vm0, %v73_v29, %v219_v31 }
  0xc6   :  { %v345_v34 = vpop.permute.xlu0 %344 }
  0xc7   :  { %v347_v35 = vpop.permute.xlu1 %346  ;;  %v458_v36 = vsel %vm441_vm1, %v425_v32, %v345_v34  ;;  %v86_v34 = vld [vmem:[%s10623_s0 + $0xf0] sm:$0xff] }
  0xc8   :  { %v459_v37 = vsel %vm441_vm1, %v426_v33, %v347_v35  ;;  %5528 = vmatprep.mubr.msk.f32.mxu0 %vm486_vm2, %v458_v36  ;;  %v87_v35 = vld [vmem:[%s10623_s0 + $0xf8] sm:$0xff] }
  0xc9   :  { %5529 = vmatmul.mubr.msk.f32.gmra.mxu0 %vm486_vm2, %v459_v37 }
  0xca   :  { %v221_v40 = vpop.permute.xlu0 %220 }
  0xcb   :  { %v223_v41 = vpop.permute.xlu1 %222  ;;  %v427_v42 = vsel %vm408_vm0, %v74_v38, %v221_v40 }
  0xcc   :  { %v428_v43 = vsel %vm408_vm0, %v75_v39, %v223_v41 }
  0xce   :  { %v349_v44 = vpop.permute.xlu0 %348 }
  0xcf   :  { %v351_v45 = vpop.permute.xlu1 %350  ;;  %v460_v46 = vsel %vm441_vm1, %v427_v42, %v349_v44 }
  0xd0   :  { %v461_v47 = vsel %vm441_vm1, %v428_v43, %v351_v45  ;;  %5531 = vmatprep.mubr.msk.f32.mxu0 %vm486_vm2, %v460_v46 }
  0xd1   :  { %5532 = vmatmul.mubr.msk.f32.gmra.mxu0 %vm486_vm2, %v461_v47 }
  0xd2   :  { %v225_v50 = vpop.permute.xlu0 %224 }
  0xd3   :  { %v227_v51 = vpop.permute.xlu1 %226  ;;  %v429_v52 = vsel %vm408_vm0, %v76_v48, %v225_v50 }
  0xd4   :  { %v430_v53 = vsel %vm408_vm0, %v77_v49, %v227_v51 }
  0xd6   :  { %v353_v54 = vpop.permute.xlu0 %352 }
  0xd7   :  { %v355_v55 = vpop.permute.xlu1 %354  ;;  %v462_v56 = vsel %vm441_vm1, %v429_v52, %v353_v54 }
  0xd8   :  { %v463_v57 = vsel %vm441_vm1, %v430_v53, %v355_v55  ;;  %5534 = vmatprep.mubr.msk.f32.mxu0 %vm486_vm2, %v462_v56 }
  0xd9   :  { %5535 = vmatmul.mubr.msk.f32.gmra.mxu0 %vm486_vm2, %v463_v57 }
  0xda   :  { %v229_v60 = vpop.permute.xlu0 %228 }
  0xdb   :  { %v231_v61 = vpop.permute.xlu1 %230  ;;  %v431_v62 = vsel %vm408_vm0, %v78_v58, %v229_v60 }
  0xdc   :  { %v432_v63 = vsel %vm408_vm0, %v79_v59, %v231_v61  ;;  %v7140_v61 = vstv %s54_s16 }
  0xde   :  { %v357_v0 = vpop.permute.xlu0 %356 }
  0xdf   :  { %v359_v1 = vpop.permute.xlu1 %358  ;;  %v464_v2 = vsel %vm441_vm1, %v431_v62, %v357_v0 }
  0xe0   :  { %v465_v3 = vsel %vm441_vm1, %v432_v63, %v359_v1  ;;  %5537 = vmatprep.mubr.msk.f32.mxu0 %vm486_vm2, %v464_v2 }
  0xe1   :  { %5538 = vmatmul.mubr.msk.f32.gmra.mxu0 %vm486_vm2, %v465_v3 }
  0xe2   :  { %v233_v6 = vpop.permute.xlu0 %232 }
  0xe3   :  { %v235_v7 = vpop.permute.xlu1 %234  ;;  %v433_v8 = vsel %vm408_vm0, %v80_v4, %v233_v6 }
  0xe4   :  { %v434_v9 = vsel %vm408_vm0, %v81_v5, %v235_v7 }
  0xe6   :  { %v361_v10 = vpop.permute.xlu0 %360 }
  0xe7   :  { %v363_v11 = vpop.permute.xlu1 %362  ;;  %v466_v12 = vsel %vm441_vm1, %v433_v8, %v361_v10 }
  0xe8   :  { %v467_v13 = vsel %vm441_vm1, %v434_v9, %v363_v11  ;;  %5540 = vmatprep.mubr.msk.f32.mxu0 %vm486_vm2, %v466_v12 }
  0xe9   :  { %5541 = vmatmul.mubr.msk.f32.gmra.mxu0 %vm486_vm2, %v467_v13 }
  0xea   :  { %v237_v16 = vpop.permute.xlu0 %236 }
  0xeb   :  { %v239_v17 = vpop.permute.xlu1 %238  ;;  %v435_v18 = vsel %vm408_vm0, %v82_v14, %v237_v16 }
  0xec   :  { %v436_v19 = vsel %vm408_vm0, %v83_v15, %v239_v17 }
  0xee   :  { %v365_v20 = vpop.permute.xlu0 %364 }
  0xef   :  { %v367_v21 = vpop.permute.xlu1 %366  ;;  %v468_v22 = vsel %vm441_vm1, %v435_v18, %v365_v20 }
  0xf0   :  { %v469_v23 = vsel %vm441_vm1, %v436_v19, %v367_v21  ;;  %5543 = vmatprep.mubr.msk.f32.mxu0 %vm486_vm2, %v468_v22 }
  0xf1   :  { %5544 = vmatmul.mubr.msk.f32.gmra.mxu0 %vm486_vm2, %v469_v23 }
  0xf2   :  { %v241_v26 = vpop.permute.xlu0 %240 }
  0xf3   :  { %v243_v27 = vpop.permute.xlu1 %242  ;;  %v437_v28 = vsel %vm408_vm0, %v84_v24, %v241_v26 }
  0xf4   :  { %v438_v29 = vsel %vm408_vm0, %v85_v25, %v243_v27 }
  0xf6   :  { %v369_v30 = vpop.permute.xlu0 %368 }
  0xf7   :  { %v371_v31 = vpop.permute.xlu1 %370  ;;  %v470_v32 = vsel %vm441_vm1, %v437_v28, %v369_v30 }
  0xf8   :  { %v471_v33 = vsel %vm441_vm1, %v438_v29, %v371_v31  ;;  %5546 = vmatprep.mubr.msk.f32.mxu0 %vm486_vm2, %v470_v32 }
  0xf9   :  { %5547 = vmatmul.mubr.msk.f32.gmra.mxu0 %vm486_vm2, %v471_v33 }
  0xfa   :  { %v245_v36 = vpop.permute.xlu0 %244 }
  0xfb   :  { %v247_v37 = vpop.permute.xlu1 %246  ;;  %v439_v38 = vsel %vm408_vm0, %v86_v34, %v245_v36 }
  0xfc   :  { %v440_v39 = vsel %vm408_vm0, %v87_v35, %v247_v37 }
  0xfe   :  { %v373_v40 = vpop.permute.xlu0 %372 }
  0xff   :  { %v375_v41 = vpop.permute.xlu1 %374  ;;  %v472_v42 = vsel %vm441_vm1, %v439_v38, %v373_v40 }
 0x100   :  { %v473_v43 = vsel %vm441_vm1, %v440_v39, %v375_v41  ;;  %5549 = vmatprep.mubr.msk.f32.mxu0 %vm486_vm2, %v472_v42 }
 0x101   :  { %5550 = vmatmul.mubr.msk.f32.gmra.mxu0 %vm486_vm2, %v473_v43 }
 0x149   :  { %v6994_v44 = vpop.f32.mrf.mxu0 }
 0x14a   :  { %842 = vrot.lane.b32.xlu1 %v6994_v44, %s6436_s29 }
 0x14b   :  { %v6998_v45 = vpop.f32.mrf.mxu0 }
 0x14c   :  { %840 = vrot.lane.b32.xlu0 %v6998_v45, %s6436_s29 }
 0x14e   :  { %1227 = vrot.lane.b32.xlu1 %v6994_v44, %s6437_s13 }
 0x150   :  { %1225 = vrot.lane.b32.xlu0 %v6998_v45, %s6437_s13 }
 0x151   :  { %v7010_v46 = vpop.f32.mrf.mxu0 }
 0x152   :  { %1803 = vrot.lane.b32.xlu1 %v6994_v44, %s6438_s14 }
 0x153   :  { %v7016_v47 = vpop.f32.mrf.mxu0 }
 0x154   :  { %1961 = vrot.lane.b32.xlu0 %v6998_v45, %s6439_s15 }
 0x156   :  { %1963 = vrot.lane.b32.xlu1 %v6994_v44, %s6439_s15 }
 0x158   :  { %1807 = vrot.lane.b32.xlu0 %v7010_v46, %s6438_s14 }
 0x159   :  { %v7030_v48 = vpop.f32.mrf.mxu0 }
 0x15a   :  { %1801 = vrot.lane.b32.xlu1 %v6998_v45, %s6438_s14 }
 0x15b   :  { %v7036_v49 = vpop.f32.mrf.mxu0 }
 0x15c   :  { %844 = vrot.lane.b32.xlu0 %v7016_v47, %s6436_s29 }
 0x15e   :  { %846 = vrot.lane.b32.xlu1 %v7010_v46, %s6436_s29 }
 0x160   :  { %1229 = vrot.lane.b32.xlu0 %v7016_v47, %s6437_s13 }
 0x161   :  { %v7050_v50 = vpop.f32.mrf.mxu0 }
 0x162   :  { %1231 = vrot.lane.b32.xlu1 %v7010_v46, %s6437_s13 }
 0x163   :  { %v7056_v51 = vpop.f32.mrf.mxu0 }
 0x164   :  { %1965 = vrot.lane.b32.xlu0 %v7016_v47, %s6439_s15 }
 0x166   :  { %1967 = vrot.lane.b32.xlu1 %v7010_v46, %s6439_s15 }
 0x168   :  { %1811 = vrot.lane.b32.xlu0 %v7030_v48, %s6438_s14 }
 0x169   :  { %v7070_v52 = vpop.f32.mrf.mxu0 }
 0x16a   :  { %1805 = vrot.lane.b32.xlu1 %v7016_v47, %s6438_s14 }
 0x16b   :  { %v7076_v53 = vpop.f32.mrf.mxu0 }
 0x16c   :  { %848 = vrot.lane.b32.xlu0 %v7036_v49, %s6436_s29 }
 0x16e   :  { %850 = vrot.lane.b32.xlu1 %v7030_v48, %s6436_s29 }
 0x170   :  { %1233 = vrot.lane.b32.xlu0 %v7036_v49, %s6437_s13 }
 0x171   :  { %v7086_v54 = vpop.f32.mrf.mxu0 }
 0x172   :  { %1235 = vrot.lane.b32.xlu1 %v7030_v48, %s6437_s13 }
 0x173   :  { %v7092_v55 = vpop.f32.mrf.mxu0 }
 0x174   :  { %1969 = vrot.lane.b32.xlu0 %v7036_v49, %s6439_s15 }
 0x176   :  { %1971 = vrot.lane.b32.xlu1 %v7030_v48, %s6439_s15 }
 0x178   :  { %1815 = vrot.lane.b32.xlu0 %v7050_v50, %s6438_s14 }
 0x179   :  { %v7106_v56 = vpop.f32.mrf.mxu0 }
 0x17a   :  { %1809 = vrot.lane.b32.xlu1 %v7036_v49, %s6438_s14 }
 0x17b   :  { %v7112_v57 = vpop.f32.mrf.mxu0 }
 0x17c   :  { %852 = vrot.lane.b32.xlu0 %v7056_v51, %s6436_s29 }
 0x17e   :  { %854 = vrot.lane.b32.xlu1 %v7050_v50, %s6436_s29 }
 0x180   :  { %1237 = vrot.lane.b32.xlu0 %v7056_v51, %s6437_s13 }
 0x181   :  { %v7126_v58 = vpop.f32.mrf.mxu0 }
 0x182   :  { %1239 = vrot.lane.b32.xlu1 %v7050_v50, %s6437_s13  ;;  %10748 = vst [vmem:[#allocation5_spill] sm:$0xff] %v7126_v58 }
 0x183   :  { %v7132_v59 = vpop.f32.mrf.mxu0 }
 0x184   :  { %1973 = vrot.lane.b32.xlu0 %v7056_v51, %s6439_s15  ;;  %10749 = vst [vmem:[#allocation6_spill] sm:$0xff] %v7132_v59 }
 0x186   :  { %1975 = vrot.lane.b32.xlu1 %v7050_v50, %s6439_s15 }
 0x188   :  { %1819 = vrot.lane.b32.xlu0 %v7070_v52, %s6438_s14 }
 0x189   :  { %v7156_v5 = vpop.f32.mrf.mxu0 }
 0x18a   :  { %1813 = vrot.lane.b32.xlu1 %v7056_v51, %s6438_s14  ;;  %10750 = vst [vmem:[#allocation7_spill] sm:$0xff] %v7156_v5 }
 0x18b   :  { %v7172_v12 = vpop.f32.mrf.mxu0 }
 0x18c   :  { %856 = vrot.lane.b32.xlu0 %v7076_v53, %s6436_s29  ;;  %10751 = vst [vmem:[#allocation8_spill] sm:$0xff] %v7172_v12 }
 0x18e   :  { %858 = vrot.lane.b32.xlu1 %v7070_v52, %s6436_s29 }
 0x190   :  { %1241 = vrot.lane.b32.xlu0 %v7076_v53, %s6437_s13 }
 0x191   :  { %v7197_v23 = vpop.f32.mrf.mxu0 }
 0x192   :  { %1243 = vrot.lane.b32.xlu1 %v7070_v52, %s6437_s13  ;;  %10752 = vst [vmem:[#allocation9_spill] sm:$0xff] %v7197_v23 }
 0x193   :  { %v7214_v31 = vpop.f32.mrf.mxu0 }
 0x194   :  { %1823 = vrot.lane.b32.xlu0 %v7086_v54, %s6438_s14  ;;  %10755 = vst [vmem:[#allocation12_spill] sm:$0xff] %v7214_v31 }
 0x196   :  { %1979 = vrot.lane.b32.xlu1 %v7070_v52, %s6439_s15 }
 0x198   :  { %860 = vrot.lane.b32.xlu0 %v7092_v55, %s6436_s29 }
 0x19a   :  { %1817 = vrot.lane.b32.xlu1 %v7076_v53, %s6438_s14 }
 0x19c   :  { %1245 = vrot.lane.b32.xlu0 %v7092_v55, %s6437_s13 }
 0x19e   :  { %1977 = vrot.lane.b32.xlu1 %v7076_v53, %s6439_s15 }
 0x1a0   :  { %1821 = vrot.lane.b32.xlu0 %v7092_v55, %s6438_s14 }
 0x1a2   :  { %862 = vrot.lane.b32.xlu1 %v7086_v54, %s6436_s29 }
 0x1a4   :  { %1827 = vrot.lane.b32.xlu0 %v7106_v56, %s6438_s14 }
 0x1a6   :  { %1247 = vrot.lane.b32.xlu1 %v7086_v54, %s6437_s13 }
 0x1a8   :  { %864 = vrot.lane.b32.xlu0 %v7112_v57, %s6436_s29 }
 0x1aa   :  { %1983 = vrot.lane.b32.xlu1 %v7086_v54, %s6439_s15 }
 0x1ac   :  { %1249 = vrot.lane.b32.xlu0 %v7112_v57, %s6437_s13 }
 0x1ae   :  { %1981 = vrot.lane.b32.xlu1 %v7092_v55, %s6439_s15 }
 0x1b0   :  { %1825 = vrot.lane.b32.xlu0 %v7112_v57, %s6438_s14 }
 0x1b2   :  { %866 = vrot.lane.b32.xlu1 %v7106_v56, %s6436_s29 }
 0x1b4   :  { %1831 = vrot.lane.b32.xlu0 %v7126_v58, %s6438_s14 }
 0x1b6   :  { %1251 = vrot.lane.b32.xlu1 %v7106_v56, %s6437_s13 }
 0x1b8   :  { %868 = vrot.lane.b32.xlu0 %v7132_v59, %s6436_s29 }
 0x1ba   :  { %1987 = vrot.lane.b32.xlu1 %v7106_v56, %s6439_s15 }
 0x1bc   :  { %v843_v60 = vpop.permute.xlu1 %842  ;;  %1253 = vrot.lane.b32.xlu0 %v7132_v59, %s6437_s13 }
 0x1bd   :  { %v937_v62 = vadd.f32 %v6994_v44, %v843_v60 }
 0x1be   :  { %v841_v63 = vpop.permute.xlu0 %840  ;;  %1985 = vrot.lane.b32.xlu1 %v7112_v57, %s6439_s15 }
 0x1bf   :  { %v970_v0 = vadd.f32 %v7140_v61, %v937_v62  ;;  %v936_v1 = vadd.f32 %v841_v63, %v6998_v45  ;;  %v7241_v62 = vpop.f32.mrf.mxu0 }
 0x1c0   :  { %v7149_v2 = vpop.permute.xlu1 %1227  ;;  %1829 = vrot.lane.b32.xlu0 %v7132_v59, %s6438_s14  ;;  %10757 = vst [vmem:[#allocation14_spill] sm:$0xff] %v7241_v62 }
 0x1c1   :  { %v7153_v3 = vmax.f32 %v970_v0, 0.0  ;;  %v969_v4 = vadd.f32 %v7140_v61, %v936_v1 }
 0x1c2   :  { %v7158_v6 = vpop.permute.xlu0 %1225  ;;  %870 = vrot.lane.b32.xlu1 %v7126_v58, %s6436_s29 }
 0x1c3   :  { %v1034_v7 = vsub.f32 %v7153_v3, %v7153_v3  ;;  %v7164_v8 = vmax.f32 %v969_v4, 0.0 }
 0x1c4   :  { %v7166_v9 = vpop.permute.xlu1 %1803  ;;  %1835 = vrot.lane.b32.xlu0 %v7156_v5, %s6438_s14 }
 0x1c5   :  { %v1067_v10 = vmul.f32 1.442695, %v1034_v7  ;;  %v1033_v11 = vsub.f32 %v7164_v8, %v7164_v8 }
 0x1c6   :  { %v7174_v13 = vpop.permute.xlu0 %1961  ;;  %1255 = vrot.lane.b32.xlu1 %v7126_v58, %s6437_s13 }
 0x1c7   :  { %5747 = vpow2.f32 %v1067_v10  ;;  %v1065_v14 = vmul.f32 1.442695, %v1033_v11 }
 0x1c8   :  { %v7178_v15 = vpop.permute.xlu1 %1963  ;;  %872 = vrot.lane.b32.xlu0 %v7172_v12, %s6436_s29 }
 0x1c9   :  { %5749 = vpow2.f32 %v1065_v14 }
 0x1ca   :  { %v7182_v16 = vpop.permute.xlu0 %1807  ;;  %1991 = vrot.lane.b32.xlu1 %v7126_v58, %s6439_s15 }
 0x1cc   :  { %v7186_v17 = vpop.permute.xlu1 %1801  ;;  %1257 = vrot.lane.b32.xlu0 %v7172_v12, %s6437_s13 }
 0x1ce   :  { %v845_v18 = vpop.permute.xlu0 %844  ;;  %1989 = vrot.lane.b32.xlu1 %v7132_v59, %s6439_s15 }
 0x1cf   :  { %v938_v19 = vadd.f32 %v845_v18, %v7016_v47 }
 0x1d0   :  { %v847_v20 = vpop.permute.xlu1 %846  ;;  %1833 = vrot.lane.b32.xlu0 %v7172_v12, %s6438_s14 }
 0x1d1   :  { %v971_v21 = vadd.f32 %v7140_v61, %v938_v19  ;;  %v939_v22 = vadd.f32 %v7010_v46, %v847_v20 }
 0x1d2   :  { %v7199_v24 = vpop.permute.xlu0 %1229  ;;  %874 = vrot.lane.b32.xlu1 %v7156_v5, %s6436_s29 }
 0x1d3   :  { %v7203_v25 = vmax.f32 %v971_v21, 0.0  ;;  %v972_v26 = vadd.f32 %v7140_v61, %v939_v22  ;;  %v7259_v21 = vpop.f32.mrf.mxu0 }
 0x1d4   :  { %v5748_v27 = vpop.eup %5747  ;;  %v7206_v28 = vpop.permute.xlu1 %1231  ;;  %1839 = vrot.lane.b32.xlu0 %v7197_v23, %s6438_s14  ;;  %10760 = vst [vmem:[#allocation17_spill] sm:$0xff] %v7259_v21 }
 0x1d5   :  { %10753 = vst [vmem:[#allocation10_spill] sm:$0xff] %v7203_v25  ;;  %5751 = vrcp.f32 %v5748_v27  ;;  %v1035_v29 = vsub.f32 %v7203_v25, %v7203_v25  ;;  %v7212_v30 = vmax.f32 %v972_v26, 0.0 }
 0x1d6   :  { %v5750_v32 = vpop.eup %5749  ;;  %v7216_v33 = vpop.permute.xlu0 %1965  ;;  %1259 = vrot.lane.b32.xlu1 %v7156_v5, %s6437_s13 }
 0x1d7   :  { %10754 = vst [vmem:[#allocation11_spill] sm:$0xff] %v7212_v30  ;;  %5753 = vrcp.f32 %v5750_v32  ;;  %v1069_v34 = vmul.f32 1.442695, %v1035_v29  ;;  %v1036_v35 = vsub.f32 %v7212_v30, %v7212_v30 }
 0x1d8   :  { %v7222_v36 = vpop.permute.xlu1 %1967  ;;  %876 = vrot.lane.b32.xlu0 %v7214_v31, %s6436_s29 }
 0x1d9   :  { %5755 = vpow2.f32 %v1069_v34  ;;  %v1071_v37 = vmul.f32 1.442695, %v1036_v35 }
 0x1da   :  { %v7226_v38 = vpop.permute.xlu0 %1811  ;;  %1995 = vrot.lane.b32.xlu1 %v7156_v5, %s6439_s15 }
 0x1db   :  { %10756 = vst [vmem:[#allocation13_spill] sm:$0xff] %v7226_v38  ;;  %5757 = vpow2.f32 %v1071_v37 }
 0x1dc   :  { %v7230_v39 = vpop.permute.xlu1 %1805  ;;  %1261 = vrot.lane.b32.xlu0 %v7214_v31, %s6437_s13 }
 0x1de   :  { %v849_v40 = vpop.permute.xlu0 %848  ;;  %1993 = vrot.lane.b32.xlu1 %v7172_v12, %s6439_s15 }
 0x1df   :  { %v940_v41 = vadd.f32 %v849_v40, %v7036_v49 }
 0x1e0   :  { %v851_v42 = vpop.permute.xlu1 %850  ;;  %1837 = vrot.lane.b32.xlu0 %v7214_v31, %s6438_s14 }
 0x1e1   :  { %v973_v43 = vadd.f32 %v7140_v61, %v940_v41  ;;  %v941_v60 = vadd.f32 %v7030_v48, %v851_v42 }
 0x1e2   :  { %v5752_v63 = vpop.eup %5751  ;;  %v7243_v0 = vpop.permute.xlu0 %1233  ;;  %878 = vrot.lane.b32.xlu1 %v7197_v23, %s6436_s29 }
 0x1e3   :  { %v1162_v1 = vmul.f32 %v5752_v63, %v5748_v27  ;;  %v7247_v4 = vmax.f32 %v973_v43, 0.0  ;;  %v974_v7 = vadd.f32 %v7140_v61, %v941_v60 }
 0x1e4   :  { %v5754_v10 = vpop.eup %5753  ;;  %v7250_v11 = vpop.permute.xlu1 %1235  ;;  %1843 = vrot.lane.b32.xlu0 %v7241_v62, %s6438_s14 }
 0x1e5   :  { %10758 = vst [vmem:[#allocation15_spill] sm:$0xff] %v7247_v4  ;;  %v1194_v14 = vmul.f32 %v6994_v44, %v1162_v1  ;;  %v1161_v18 = vmul.f32 %v5754_v10, %v5750_v32  ;;  %v1037_v19 = vsub.f32 %v7247_v4, %v7247_v4  ;;  %v7257_v20 = vmax.f32 %v974_v7, 0.0 }
 0x1e6   :  { %v5756_v22 = vpop.eup %5755  ;;  %v7261_v26 = vpop.permute.xlu0 %1969  ;;  %1263 = vrot.lane.b32.xlu1 %v7197_v23, %s6437_s13 }
 0x1e7   :  { %10759 = vst [vmem:[#allocation16_spill] sm:$0xff] %v7257_v20  ;;  %10761 = vst [vmem:[#allocation18_spill] sm:$0xff] %v7261_v26  ;;  %v1322_v27 = vadd.f32 %v7149_v2, %v1194_v14  ;;  %v1193_v29 = vmul.f32 %v1161_v18, %v6998_v45  ;;  %5759 = vrcp.f32 %v5756_v22  ;;  %v1073_v34 = vmul.f32 1.442695, %v1037_v19 }
 0x1e8   :  { %v5758_v32 = vpop.eup %5757  ;;  %v1038_v35 = vsub.f32 %v7257_v20, %v7257_v20  ;;  %v7269_v37 = vpop.permute.xlu1 %1971  ;;  %880 = vrot.lane.b32.xlu0 %v7259_v21, %s6436_s29 }
 0x1e9   :  { %10762 = vst [vmem:[#allocation19_spill] sm:$0xff] %v7269_v37  ;;  %v1354_v40 = vadd.f32 %v1322_v27, %v7140_v61  ;;  %v1321_v41 = vadd.f32 %v7158_v6, %v1193_v29  ;;  %5761 = vrcp.f32 %v5758_v32 }
 0x1ea   :  { %5763 = vpow2.f32 %v1073_v34  ;;  %v1075_v2 = vmul.f32 1.442695, %v1038_v35  ;;  %v7275_v42 = vpop.permute.xlu0 %1815  ;;  %1999 = vrot.lane.b32.xlu1 %v7197_v23, %s6439_s15 }
 0x1eb   :  { %10763 = vst [vmem:[#allocation20_spill] sm:$0xff] %v7275_v42  ;;  %v7279_v43 = vmax.f32 %v1354_v40, 0.0  ;;  %v1353_v60 = vadd.f32 %v1321_v41, %v7140_v61  ;;  %v7309_v41 = vpop.f32.mrf.mxu0 }
 0x1ec   :  { %5765 = vpow2.f32 %v1075_v2  ;;  %v7282_v63 = vpop.permute.xlu1 %1809  ;;  %1265 = vrot.lane.b32.xlu0 %v7259_v21, %s6437_s13  ;;  %10765 = vst [vmem:[#allocation22_spill] sm:$0xff] %v7309_v41 }
 0x1ed   :  { %10764 = vst [vmem:[#allocation21_spill] sm:$0xff] %v7282_v63  ;;  %v7288_v6 = vmax.f32 %v7153_v3, %v7279_v43  ;;  %v7290_v1 = vmax.f32 %v1353_v60, 0.0 }
 0x1ee   :  { %v853_v7 = vpop.permute.xlu0 %852  ;;  %1997 = vrot.lane.b32.xlu1 %v7214_v31, %s6439_s15 }
 0x1ef   :  { %v1450_v10 = vsub.f32 %v7153_v3, %v7288_v6  ;;  %v1546_v14 = vsub.f32 %v7279_v43, %v7288_v6  ;;  %v7300_v18 = vmax.f32 %v7164_v8, %v7290_v1  ;;  %v942_v19 = vadd.f32 %v853_v7, %v7056_v51 }
 0x1f0   :  { %v855_v27 = vpop.permute.xlu1 %854  ;;  %1841 = vrot.lane.b32.xlu0 %v7259_v21, %s6438_s14 }
 0x1f1   :  { %v1483_v29 = vmul.f32 1.442695, %v1450_v10  ;;  %v1579_v34 = vmul.f32 1.442695, %v1546_v14  ;;  %v1449_v35 = vsub.f32 %v7164_v8, %v7300_v18  ;;  %v1545_v40 = vsub.f32 %v7290_v1, %v7300_v18 }
 0x1f2   :  { %v975_v2 = vadd.f32 %v7140_v61, %v942_v19  ;;  %v943_v60 = vadd.f32 %v7050_v50, %v855_v27  ;;  %v7313_v23 = vpop.permute.xlu0 %1237  ;;  %882 = vrot.lane.b32.xlu1 %v7241_v62, %s6436_s29 }
 0x1f3   :  { %5767 = vpow2.f32 %v1483_v29  ;;  %v1481_v7 = vmul.f32 1.442695, %v1449_v35  ;;  %v1577_v10 = vmul.f32 1.442695, %v1545_v40 }
 0x1f4   :  { %v5760_v14 = vpop.eup %5759  ;;  %5769 = vpow2.f32 %v1579_v34  ;;  %v7317_v31 = vmax.f32 %v975_v2, 0.0  ;;  %v976_v5 = vadd.f32 %v7140_v61, %v943_v60  ;;  %v7320_v12 = vpop.permute.xlu1 %1239  ;;  %1271 = vrot.lane.b32.xlu0 %v7309_v41, %s6437_s13 }
 0x1f5   :  { %5771 = vpow2.f32 %v1481_v7  ;;  %v1163_v19 = vmul.f32 %v5760_v14, %v5756_v22 }
 0x1f6   :  { %v5762_v27 = vpop.eup %5761  ;;  %5773 = vpow2.f32 %v1577_v10  ;;  %v1039_v29 = vsub.f32 %v7317_v31, %v7317_v31  ;;  %v7326_v35 = vmax.f32 %v976_v5, 0.0  ;;  %v7328_v40 = vpop.permute.xlu0 %1973  ;;  %1267 = vrot.lane.b32.xlu1 %v7241_v62, %s6437_s13 }
 0x1f7   :  { %10766 = vst [vmem:[#allocation23_spill] sm:$0xff] %v7328_v40  ;;  %v5764_v34 = vpop.eup %5763  ;;  %v1195_v2 = vmul.f32 %v1163_v19, %v7016_v47  ;;  %v1164_v60 = vmul.f32 %v5762_v27, %v5758_v32  ;;  %v7343_v40 = vpop.f32.mrf.mxu0 }
 0x1f8   :  { %5775 = vrcp.f32 %v5764_v34  ;;  %v1077_v42 = vmul.f32 1.442695, %v1039_v29  ;;  %v1040_v22 = vsub.f32 %v7326_v35, %v7326_v35  ;;  %v7335_v7 = vpop.permute.xlu1 %1975  ;;  %1847 = vrot.lane.b32.xlu0 %v7309_v41, %s6438_s14  ;;  %10768 = vst [vmem:[#allocation25_spill] sm:$0xff] %v7343_v40 }
 0x1f9   :  { %10767 = vst [vmem:[#allocation24_spill] sm:$0xff] %v7335_v7  ;;  %v7339_v5 = vpop.eup %5765  ;;  %v1323_v10 = vadd.f32 %v7199_v24, %v1195_v2  ;;  %v1196_v14 = vmul.f32 %v7010_v46, %v1164_v60 }
 0x1fa   :  { %5777 = vrcp.f32 %v7339_v5  ;;  %v1079_v32 = vmul.f32 1.442695, %v1040_v22  ;;  %v7346_v19 = vpop.permute.xlu0 %1819  ;;  %2003 = vrot.lane.b32.xlu1 %v7241_v62, %s6439_s15 }
 0x1fb   :  { %10769 = vst [vmem:[#allocation26_spill] sm:$0xff] %v7346_v19  ;;  %v1355_v27 = vadd.f32 %v1323_v10, %v7140_v61  ;;  %v1324_v29 = vadd.f32 %v7206_v28, %v1196_v14  ;;  %5779 = vpow2.f32 %v1077_v42 }
 0x1fc   :  { %5781 = vpow2.f32 %v1079_v32  ;;  %v7352_v7 = vpop.permute.xlu1 %1813  ;;  %884 = vrot.lane.b32.xlu0 %v7343_v40, %s6436_s29  ;;  %v6440_v32 = vmov 0  }
 0x1fd   :  { %10770 = vst [vmem:[#allocation27_spill] sm:$0xff] %v7352_v7  ;;  %v7356_v24 = vmax.f32 %v1355_v27, 0.0  ;;  %v1356_v2 = vadd.f32 %v1324_v29, %v7140_v61  ;;  %5745 = vset.pattern.permute.xlu1 %v6440_v32  ;;  %5746 = vset.pattern.permute.xlu0 %v6440_v32 }
 0x1fe   :  { %v857_v60 = vpop.permute.xlu0 %856  ;;  %2001 = vrot.lane.b32.xlu1 %v7259_v21, %s6439_s15 }
 0x1ff   :  { %10771 = vst [vmem:[#allocation28_spill] sm:$0xff] %v7356_v24  ;;  %v7363_v22 = vmax.f32 %v7203_v25, %v7356_v24  ;;  %v7365_v28 = vmax.f32 %v1356_v2, 0.0  ;;  %v944_v42 = vadd.f32 %v857_v60, %v7076_v53 }
 0x200   :  { %v7368_v10 = vpop.eup %5767  ;;  %v859_v14 = vpop.permute.xlu1 %858  ;;  %1269 = vrot.lane.b32.xlu0 %v7343_v40, %s6437_s13 }
 0x201   :  { %10772 = vst [vmem:[#allocation29_spill] sm:$0xff] %v7363_v22  ;;  %10773 = vst [vmem:[#allocation30_spill] sm:$0xff] %v7365_v28  ;;  %v7372_v27 = vpop.eup %5769  ;;  %v1451_v29 = vsub.f32 %v7203_v25, %v7363_v22  ;;  %v1547_v62 = vsub.f32 %v7356_v24, %v7363_v22  ;;  %v7380_v2 = vmax.f32 %v7212_v30, %v7365_v28  ;;  %v7407_v22 = vpop.f32.mrf.mxu0 }
 0x202   :  { %v977_v60 = vadd.f32 %v7140_v61, %v944_v42  ;;  %v7383_v21 = vpop.eup %5771  ;;  %v1642_v19 = vadd.f32 %v7372_v27, %v7368_v10  ;;  %v945_v7 = vadd.f32 %v7070_v52, %v859_v14  ;;  %v7388_v58 = vpop.permute.xlu0 %1241  ;;  %886 = vrot.lane.b32.xlu1 %v7309_v41, %s6436_s29  ;;  %10775 = vst [vmem:[#allocation32_spill] sm:$0xff] %v7407_v22 }
 0x203   :  { %10774 = vst [vmem:[#allocation31_spill] sm:$0xff] %v7380_v2  ;;  %v7392_v37 = vpop.eup %5773  ;;  %v1485_v26 = vmul.f32 1.442695, %v1451_v29  ;;  %v1581_v38 = vmul.f32 1.442695, %v1547_v62  ;;  %v1452_v42 = vsub.f32 %v7212_v30, %v7380_v2  ;;  %v1548_v32 = vsub.f32 %v7365_v28, %v7380_v2 }
 0x204   :  { %5783 = vrcp.f32 %v1642_v19  ;;  %v1641_v63 = vadd.f32 %v7392_v37, %v7383_v21  ;;  %v7400_v14 = vmax.f32 %v977_v60, 0.0  ;;  %v978_v24 = vadd.f32 %v7140_v61, %v945_v7  ;;  %v7403_v25 = vpop.permute.xlu1 %1243  ;;  %1845 = vrot.lane.b32.xlu0 %v7343_v40, %s6438_s14 }
 0x205   :  { %v5776_v62 = vpop.eup %5775  ;;  %5785 = vpow2.f32 %v1485_v26  ;;  %v1487_v29 = vmul.f32 1.442695, %v1452_v42  ;;  %v1583_v30 = vmul.f32 1.442695, %v1548_v32 }
 0x206   :  { %5787 = vrcp.f32 %v1641_v63  ;;  %v1165_v19 = vmul.f32 %v5776_v62, %v5764_v34  ;;  %v1041_v28 = vsub.f32 %v7400_v14, %v7400_v14  ;;  %v7411_v60 = vmax.f32 %v978_v24, 0.0  ;;  %v7413_v2 = vpop.permute.xlu0 %1823  ;;  %2007 = vrot.lane.b32.xlu1 %v7309_v41, %s6439_s15 }
 0x207   :  { %10777 = vst [vmem:[#allocation34_spill] sm:$0xff] %v7413_v2  ;;  %v5778_v7 = vpop.eup %5777  ;;  %5789 = vpow2.f32 %v1581_v38  ;;  %v7429_v38 = vpop.f32.mrf.mxu0 }
 0x208   :  { %10776 = vst [vmem:[#allocation33_spill] sm:$0xff] %v7411_v60  ;;  %v7417_v59 = vpop.eup %5779  ;;  %5791 = vpow2.f32 %v1487_v29  ;;  %v1197_v26 = vmul.f32 %v1165_v19, %v7036_v49  ;;  %v1166_v63 = vmul.f32 %v5778_v7, %v7339_v5  ;;  %v7421_v34 = vpop.permute.xlu1 %1979  ;;  %1851 = vrot.lane.b32.xlu0 %v7407_v22, %s6438_s14  ;;  %v1081_v42 = vmul.f32 1.442695, %v1041_v28  ;;  %10779 = vst [vmem:[#allocation36_spill] sm:$0xff] %v7429_v38 }
 0x209   :  { %10778 = vst [vmem:[#allocation35_spill] sm:$0xff] %v7421_v34  ;;  %v7425_v24 = vpop.eup %5781  ;;  %5793 = vpow2.f32 %v1583_v30  ;;  %v1042_v32 = vsub.f32 %v7411_v60, %v7411_v60 }
 0x20a   :  { %v1325_v62 = vadd.f32 %v7243_v0, %v1197_v26  ;;  %v1198_v29 = vmul.f32 %v7030_v48, %v1166_v63  ;;  %5795 = vrcp.f32 %v7417_v59  ;;  %v861_v5 = vpop.permute.xlu0 %860  ;;  %2005 = vrot.lane.b32.xlu1 %v7343_v40, %s6439_s15 }
 0x20b   :  { %5797 = vrcp.f32 %v7425_v24  ;;  %v1083_v19 = vmul.f32 1.442695, %v1042_v32  ;;  %v946_v30 = vadd.f32 %v861_v5, %v7092_v55 }
 0x20c   :  { %v1357_v28 = vadd.f32 %v1325_v62, %v7140_v61  ;;  %v1326_v7 = vadd.f32 %v7250_v11, %v1198_v29  ;;  %v7440_v41 = vpop.permute.xlu1 %1817  ;;  %888 = vrot.lane.b32.xlu0 %v7429_v38, %s6436_s29  ;;  %5799 = vpow2.f32 %v1081_v42 }
 0x20d   :  { %10780 = vst [vmem:[#allocation37_spill] sm:$0xff] %v7440_v41  ;;  %v979_v0 = vadd.f32 %v7140_v61, %v946_v30  ;;  %5801 = vpow2.f32 %v1083_v19 }
 0x20e   :  { %v7445_v26 = vmax.f32 %v1357_v28, 0.0  ;;  %v1358_v63 = vadd.f32 %v1326_v7, %v7140_v61  ;;  %v7448_v32 = vpop.permute.xlu0 %1245  ;;  %890 = vrot.lane.b32.xlu1 %v7407_v22, %s6436_s29 }
 0x20f   :  { %10782 = vst [vmem:[#allocation39_spill] sm:$0xff] %v7448_v32  ;;  %v7452_v62 = vmax.f32 %v979_v0, 0.0 }
 0x210   :  { %10781 = vst [vmem:[#allocation38_spill] sm:$0xff] %v7445_v26  ;;  %v7456_v11 = vmax.f32 %v7247_v4, %v7445_v26  ;;  %v7458_v29 = vmax.f32 %v1358_v63, 0.0  ;;  %v7460_v42 = vpop.permute.xlu1 %1977  ;;  %1273 = vrot.lane.b32.xlu0 %v7429_v38, %s6437_s13 }
 0x211   :  { %10783 = vst [vmem:[#allocation40_spill] sm:$0xff] %v7452_v62  ;;  %10785 = vst [vmem:[#allocation42_spill] sm:$0xff] %v7460_v42  ;;  %v5784_v5 = vpop.eup %5783 }
 0x212   :  { %10784 = vst [vmem:[#allocation41_spill] sm:$0xff] %v7456_v11  ;;  %v7464_v19 = vpop.eup %5785  ;;  %v1738_v30 = vmul.f32 %v5784_v5, %v7372_v27  ;;  %v1706_v28 = vmul.f32 %v5784_v5, %v7368_v10  ;;  %v1453_v7 = vsub.f32 %v7247_v4, %v7456_v11  ;;  %v1549_v0 = vsub.f32 %v7445_v26, %v7456_v11  ;;  %v7472_v63 = vpop.permute.xlu0 %1821 }
 0x213   :  { %10786 = vst [vmem:[#allocation43_spill] sm:$0xff] %v7472_v63  ;;  %1275 = vrot.lane.b32.xlu1 %v7407_v22, %s6437_s13  ;;  %v5788_v40 = vpop.eup %5787  ;;  %v7478_v2 = vmax.f32 %v7257_v20, %v7458_v29  ;;  %v1043_v27 = vsub.f32 %v7452_v62, %v7452_v62 }
 0x214   :  { %v7482_v10 = vpop.eup %5789  ;;  %v1898_v5 = vmul.f32 %v7166_v9, %v1738_v30  ;;  %v1770_v34 = vmul.f32 %v6994_v44, %v1706_v28  ;;  %v1705_v42 = vmul.f32 %v5788_v40, %v7383_v21  ;;  %v1737_v63 = vmul.f32 %v5788_v40, %v7392_v37  ;;  %v863_v41 = vpop.permute.xlu1 %862  ;;  %1849 = vrot.lane.b32.xlu0 %v7429_v38, %s6438_s14 }
 0x215   :  { %v7490_v26 = vpop.eup %5791  ;;  %v1643_v4 = vadd.f32 %v7482_v10, %v7464_v19  ;;  %v1489_v62 = vmul.f32 1.442695, %v1453_v7  ;;  %v1585_v11 = vmul.f32 1.442695, %v1549_v0  ;;  %v1454_v9 = vsub.f32 %v7257_v20, %v7478_v2  ;;  %v7496_v30 = vpop.f32.mrf.mxu0 }
 0x216   :  { %10787 = vst [vmem:[#allocation44_spill] sm:$0xff] %v7496_v30  ;;  %v7498_v44 = vpop.eup %5793  ;;  %v1930_v21 = vadd.f32 %v1898_v5, %v1770_v34  ;;  %v1769_v37 = vmul.f32 %v1705_v42, %v6998_v45  ;;  %v1897_v40 = vmul.f32 %v7186_v17, %v1737_v63  ;;  %v1550_v28 = vsub.f32 %v7458_v29, %v7478_v2  ;;  %v7504_v32 = vpop.permute.xlu0 %1827 }
 0x217   :  { %10788 = vst [vmem:[#allocation45_spill] sm:$0xff] %v7504_v32  ;;  %2011 = vrot.lane.b32.xlu1 %v7407_v22, %s6439_s15  ;;  %v5796_v7 = vpop.eup %5795  ;;  %v1644_v0 = vadd.f32 %v7498_v44, %v7490_v26  ;;  %5803 = vrcp.f32 %v1643_v4  ;;  %v1491_v20 = vmul.f32 1.442695, %v1454_v9  ;;  %v947_v34 = vadd.f32 %v7086_v54, %v863_v41  ;;  %v7519_v9 = vpop.f32.mrf.mxu0 }
 0x218   :  { %v5798_v5 = vpop.eup %5797  ;;  %v2058_v45 = vadd.f32 %v7178_v15, %v1930_v21  ;;  %v1929_v17 = vadd.f32 %v1897_v40, %v1769_v37  ;;  %5805 = vpow2.f32 %v1489_v62  ;;  %v1587_v42 = vmul.f32 1.442695, %v1550_v28  ;;  %v7512_v63 = vpop.permute.xlu1 %1247  ;;  %1855 = vrot.lane.b32.xlu0 %v7496_v30, %s6438_s14  ;;  %10789 = vst [vmem:[#allocation46_spill] sm:$0xff] %v7519_v9 }
 0x219   :  { %5807 = vrcp.f32 %v1644_v0  ;;  %v1167_v22 = vmul.f32 %v5796_v7, %v7417_v59  ;;  %v1168_v32 = vmul.f32 %v5798_v5, %v7425_v24  ;;  %v980_v4 = vadd.f32 %v7140_v61, %v947_v34  ;;  %v7521_v41 = vpop.eup %5799 }
 0x21a   :  { %v2090_v15 = vadd.f32 %v2058_v45, %v7140_v61  ;;  %v2057_v62 = vadd.f32 %v7174_v13, %v1929_v17  ;;  %5809 = vpow2.f32 %v1585_v11  ;;  %v1085_v21 = vmul.f32 1.442695, %v1043_v27  ;;  %v865_v37 = vpop.permute.xlu0 %864  ;;  %v7527_v40 = vpop.eup %5801 }
 0x21b   :  { %2009 = vrot.lane.b32.xlu1 %v7429_v38, %s6439_s15  ;;  %5811 = vpow2.f32 %v1491_v20  ;;  %v1199_v59 = vmul.f32 %v1167_v22, %v7056_v51  ;;  %v1200_v24 = vmul.f32 %v7050_v50, %v1168_v32  ;;  %v7531_v28 = vmax.f32 %v980_v4, 0.0 }
 0x21c   :  { %v2122_v7 = vmax.f32 %v2090_v15, 0.0  ;;  %v2089_v0 = vadd.f32 %v2057_v62, %v7140_v61  ;;  %5813 = vpow2.f32 %v1587_v42  ;;  %v948_v13 = vadd.f32 %v865_v37, %v7112_v57  ;;  %v7535_v11 = vpop.permute.xlu1 %1983  ;;  %892 = vrot.lane.b32.xlu0 %v7519_v9, %s6436_s29 }
 0x21d   :  { %10790 = vst [vmem:[#allocation47_spill] sm:$0xff] %v7535_v11  ;;  %v1327_v27 = vadd.f32 %v7313_v23, %v1199_v59  ;;  %v1328_v20 = vadd.f32 %v7320_v12, %v1200_v24  ;;  %5815 = vrcp.f32 %v7521_v41  ;;  %v1044_v22 = vsub.f32 %v7531_v28, %v7531_v28 }
 0x21e   :  { %v2154_v32 = vmax.f32 %v7288_v6, %v2122_v7  ;;  %v2121_v34 = vmax.f32 %v2089_v0, 0.0  ;;  %5817 = vrcp.f32 %v7527_v40  ;;  %v981_v5 = vadd.f32 %v7140_v61, %v948_v13  ;;  %v7547_v45 = vpop.permute.xlu0 %1249 }
 0x21f   :  { %894 = vrot.lane.b32.xlu1 %v7496_v30, %s6436_s29  ;;  %v1359_v23 = vadd.f32 %v1327_v27, %v7140_v61  ;;  %v1360_v12 = vadd.f32 %v1328_v20, %v7140_v61  ;;  %5819 = vpow2.f32 %v1085_v21  ;;  %v1087_v17 = vmul.f32 1.442695, %v1044_v22 }
 0x220   :  { %v2186_v42 = vsub.f32 %v7153_v3, %v2154_v32  ;;  %v2282_v6 = vsub.f32 %v7279_v43, %v2154_v32  ;;  %v2378_v4 = vsub.f32 %v2122_v7, %v2154_v32  ;;  %v2153_v15 = vmax.f32 %v7300_v18, %v2121_v34  ;;  %v7556_v62 = vpop.permute.xlu1 %1981  ;;  %1277 = vrot.lane.b32.xlu0 %v7519_v9, %s6437_s13 }
 0x221   :  { %10791 = vst [vmem:[#allocation48_spill] sm:$0xff] %v7556_v62  ;;  %v7560_v37 = vmax.f32 %v1359_v23, 0.0  ;;  %v7562_v59 = vmax.f32 %v1360_v12, 0.0  ;;  %5821 = vpow2.f32 %v1087_v17  ;;  %v7564_v24 = vmax.f32 %v981_v5, 0.0  ;;  %v7589_v17 = vpop.f32.mrf.mxu0 }
 0x222   :  { %v2219_v21 = vmul.f32 1.442695, %v2186_v42  ;;  %v2315_v0 = vmul.f32 1.442695, %v2282_v6  ;;  %v2411_v3 = vmul.f32 1.442695, %v2378_v4  ;;  %v2185_v43 = vsub.f32 %v7164_v8, %v2153_v15  ;;  %v7567_v7 = vpop.permute.xlu0 %1825 }
 0x223   :  { %10792 = vst [vmem:[#allocation49_spill] sm:$0xff] %v7564_v24  ;;  %10793 = vst [vmem:[#allocation50_spill] sm:$0xff] %v7567_v7  ;;  %1279 = vrot.lane.b32.xlu1 %v7496_v30, %s6437_s13  ;;  %v2281_v18 = vsub.f32 %v7290_v1, %v2153_v15  ;;  %v2377_v13 = vsub.f32 %v2121_v34, %v2153_v15  ;;  %v7574_v27 = vmax.f32 %v7317_v31, %v7560_v37  ;;  %v10811_v7 = vld [vmem:[#allocation30_spill] sm:$0xff] }
 0x224   :  { %v5804_v20 = vpop.eup %5803  ;;  %5823 = vpow2.f32 %v2219_v21  ;;  %v2217_v22 = vmul.f32 1.442695, %v2185_v43  ;;  %v7578_v32 = vmax.f32 %v7326_v35, %v7562_v59  ;;  %v1045_v8 = vsub.f32 %v7564_v24, %v7564_v24  ;;  %v7582_v5 = vpop.permute.xlu1 %866  ;;  %1853 = vrot.lane.b32.xlu0 %v7519_v9, %s6438_s14  ;;  %10794 = vst [vmem:[#allocation51_spill] sm:$0xff] %v7589_v17 }
 0x225   :  { %v7586_v1 = vpop.eup %5805  ;;  %5825 = vpow2.f32 %v2315_v0  ;;  %v2313_v34 = vmul.f32 1.442695, %v2281_v18  ;;  %v2409_v23 = vmul.f32 1.442695, %v2377_v13  ;;  %v1707_v12 = vmul.f32 %v5804_v20, %v7464_v19 }
 0x226   :  { %v5808_v42 = vpop.eup %5807  ;;  %5827 = vpow2.f32 %v2411_v3  ;;  %v1739_v6 = vmul.f32 %v5804_v20, %v7482_v10  ;;  %v1455_v4 = vsub.f32 %v7317_v31, %v7574_v27  ;;  %v1551_v15 = vsub.f32 %v7560_v37, %v7574_v27  ;;  %v7596_v21 = vpop.permute.xlu0 %1831 }
 0x227   :  { %10795 = vst [vmem:[#allocation52_spill] sm:$0xff] %v7596_v21  ;;  %2015 = vrot.lane.b32.xlu1 %v7496_v30, %s6439_s15  ;;  %v7600_v0 = vpop.eup %5809  ;;  %5829 = vpow2.f32 %v2217_v22  ;;  %v1708_v19 = vmul.f32 %v5808_v42, %v7490_v26  ;;  %v1740_v3 = vmul.f32 %v5808_v42, %v7498_v44  ;;  %v1771_v10 = vmul.f32 %v1707_v12, %v7016_v47  ;;  %v10809_v30 = vld [vmem:[#allocation28_spill] sm:$0xff] }
 0x228   :  { %v7605_v43 = vpop.eup %5811  ;;  %5831 = vpow2.f32 %v2313_v34  ;;  %v1899_v18 = vmul.f32 %v7230_v39, %v1739_v6  ;;  %v1645_v13 = vadd.f32 %v7600_v0, %v7586_v1  ;;  %v1493_v20 = vmul.f32 1.442695, %v1455_v4  ;;  %v7610_v21 = vpop.permute.xlu1 %1251  ;;  %1859 = vrot.lane.b32.xlu0 %v7589_v17, %s6438_s14 }
 0x229   :  { %10796 = vst [vmem:[#allocation53_spill] sm:$0xff] %v7610_v21  ;;  %v7614_v22 = vpop.eup %5813  ;;  %5833 = vpow2.f32 %v2409_v23  ;;  %v1772_v26 = vmul.f32 %v7010_v46, %v1708_v19  ;;  %v1900_v47 = vmul.f32 %v7182_v16, %v1740_v3  ;;  %v1589_v44 = vmul.f32 1.442695, %v1551_v15  ;;  %v7618_v34 = vpop.f32.mrf.mxu0 }
 0x22a   :  { %10797 = vst [vmem:[#allocation54_spill] sm:$0xff] %v7618_v34  ;;  %v5816_v39 = vpop.eup %5815  ;;  %v1931_v12 = vadd.f32 %v1899_v18, %v1771_v10  ;;  %v1646_v42 = vadd.f32 %v7614_v22, %v7605_v43  ;;  %5835 = vrcp.f32 %v1645_v13  ;;  %v1456_v6 = vsub.f32 %v7326_v35, %v7578_v32  ;;  %v869_v4 = vpop.permute.xlu0 %868 }
 0x22b   :  { %2013 = vrot.lane.b32.xlu1 %v7519_v9, %s6439_s15  ;;  %v5818_v23 = vpop.eup %5817  ;;  %v1932_v46 = vadd.f32 %v1900_v47, %v1772_v26  ;;  %5837 = vpow2.f32 %v1493_v20  ;;  %v1552_v16 = vsub.f32 %v7562_v59, %v7578_v32  ;;  %v1169_v15 = vmul.f32 %v5816_v39, %v7521_v41 }
 0x22c   :  { %v7629_v19 = vpop.eup %5819  ;;  %v2059_v3 = vadd.f32 %v7216_v33, %v1931_v12  ;;  %5839 = vrcp.f32 %v1646_v42  ;;  %v1495_v10 = vmul.f32 1.442695, %v1456_v6  ;;  %v1170_v18 = vmul.f32 %v5818_v23, %v7527_v40  ;;  %v7633_v13 = vpop.permute.xlu1 %1987  ;;  %896 = vrot.lane.b32.xlu0 %v7618_v34, %s6436_s29 }
 0x22d   :  { %10798 = vst [vmem:[#allocation55_spill] sm:$0xff] %v7633_v13  ;;  %v2060_v20 = vadd.f32 %v7222_v36, %v1932_v46  ;;  %5841 = vpow2.f32 %v1589_v44  ;;  %v1591_v26 = vmul.f32 1.442695, %v1552_v16  ;;  %v1201_v47 = vmul.f32 %v1169_v15, %v7076_v53  ;;  %v10800_v46 = vld [vmem:[#allocation6_spill] sm:$0xff] }
 0x22e   :  { %v7639_v41 = vpop.eup %5821  ;;  %v2091_v39 = vadd.f32 %v2059_v3, %v7140_v61  ;;  %5843 = vpow2.f32 %v1495_v10  ;;  %v1202_v33 = vmul.f32 %v7070_v52, %v1170_v18  ;;  %v1089_v12 = vmul.f32 1.442695, %v1045_v8  ;;  %v7643_v40 = vpop.permute.xlu0 %1253  ;;  %v10803_v18 = vld [vmem:[#allocation29_spill] sm:$0xff] }
 0x22f   :  { %10799 = vst [vmem:[#allocation56_spill] sm:$0xff] %v7643_v40  ;;  %898 = vrot.lane.b32.xlu1 %v7589_v17, %s6436_s29  ;;  %v2092_v42 = vadd.f32 %v2060_v20, %v7140_v61  ;;  %5845 = vpow2.f32 %v1591_v26  ;;  %v1329_v36 = vadd.f32 %v7388_v58, %v1201_v47  ;;  %v949_v44 = vadd.f32 %v7106_v56, %v7582_v5  ;;  %v7663_v10 = vpop.f32.mrf.mxu0 }
 0x230   :  { %v2123_v6 = vmax.f32 %v2091_v39, 0.0  ;;  %v1330_v23 = vadd.f32 %v7403_v25, %v1202_v33  ;;  %5847 = vrcp.f32 %v7629_v19  ;;  %v950_v8 = vadd.f32 %v869_v4, %v10800_v46  ;;  %v7654_v16 = vpop.permute.xlu1 %1985  ;;  %1281 = vrot.lane.b32.xlu0 %v7618_v34, %s6437_s13  ;;  %10802 = vst [vmem:[#allocation58_spill] sm:$0xff] %v7663_v10 }
 0x231   :  { %10801 = vst [vmem:[#allocation57_spill] sm:$0xff] %v7654_v16  ;;  %v7658_v15 = vpop.eup %5823  ;;  %v2124_v3 = vmax.f32 %v2092_v42, 0.0  ;;  %v1361_v58 = vadd.f32 %v1329_v36, %v7140_v61  ;;  %5849 = vrcp.f32 %v7639_v41  ;;  %v982_v5 = vadd.f32 %v7140_v61, %v949_v44  ;;  %v10805_v42 = vld [vmem:[#allocation31_spill] sm:$0xff] }
 0x232   :  { %v7665_v25 = vpop.eup %5825  ;;  %v2155_v4 = vmax.f32 %v10803_v18, %v2123_v6  ;;  %v1362_v20 = vadd.f32 %v1330_v23, %v7140_v61  ;;  %5851 = vpow2.f32 %v1089_v12  ;;  %v7670_v26 = vadd.f32 %v7140_v61, %v950_v8  ;;  %v7672_v47 = vpop.permute.xlu0 %1829  ;;  %v10808_v23 = vld [vmem:[#allocation10_spill] sm:$0xff] }
 0x233   :  { %10804 = vst [vmem:[#allocation29_spill] sm:$0xff] %v7672_v47  ;;  %1283 = vrot.lane.b32.xlu1 %v7589_v17, %s6437_s13  ;;  %v7676_v39 = vpop.eup %5827  ;;  %v2474_v33 = vadd.f32 %v7665_v25, %v7658_v15  ;;  %v2156_v36 = vmax.f32 %v10805_v42, %v2124_v3  ;;  %v7681_v44 = vmax.f32 %v1361_v58, 0.0  ;;  %v7683_v18 = vmax.f32 %v982_v5, 0.0  ;;  %v10810_v5 = vld [vmem:[#allocation11_spill] sm:$0xff] }
 0x234   :  { %v7685_v12 = vpop.eup %5829  ;;  %v2187_v8 = vsub.f32 %v10808_v23, %v2155_v4  ;;  %v2283_v9 = vsub.f32 %v10809_v30, %v2155_v4  ;;  %v2379_v47 = vsub.f32 %v2123_v6, %v2155_v4  ;;  %v7689_v13 = vmax.f32 %v1362_v20, 0.0  ;;  %v7691_v38 = vpop.permute.xlu1 %870  ;;  %1857 = vrot.lane.b32.xlu0 %v7618_v34, %s6438_s14 }
 0x235   :  { %10806 = vst [vmem:[#allocation31_spill] sm:$0xff] %v7683_v18  ;;  %10807 = vst [vmem:[#allocation59_spill] sm:$0xff] %v7685_v12  ;;  %v7695_v16 = vpop.eup %5831  ;;  %v2506_v58 = vadd.f32 %v7676_v39, %v2474_v33  ;;  %v2188_v42 = vsub.f32 %v10810_v5, %v2156_v36  ;;  %v2284_v40 = vsub.f32 %v10811_v7, %v2156_v36  ;;  %v7700_v23 = vpop.f32.mrf.mxu0 }
 0x236   :  { %v2380_v11 = vsub.f32 %v2124_v3, %v2156_v36  ;;  %10812 = vst [vmem:[#allocation10_spill] sm:$0xff] %v7700_v23  ;;  %v7702_v30 = vpop.eup %5833  ;;  %v2473_v6 = vadd.f32 %v7695_v16, %v7685_v12  ;;  %v2221_v4 = vmul.f32 1.442695, %v2187_v8  ;;  %v2317_v20 = vmul.f32 1.442695, %v2283_v9  ;;  %v7706_v62 = vpop.permute.xlu0 %1835 }
 0x237   :  { %v2413_v46 = vmul.f32 1.442695, %v2379_v47  ;;  %10813 = vst [vmem:[#allocation28_spill] sm:$0xff] %v7706_v62  ;;  %2017 = vrot.lane.b32.xlu1 %v7618_v34, %s6439_s15  ;;  %v5836_v33 = vpop.eup %5835  ;;  %5853 = vrcp.f32 %v2506_v58  ;;  %v2223_v5 = vmul.f32 1.442695, %v2188_v42 }
 0x238   :  { %v2319_v7 = vmul.f32 1.442695, %v2284_v40  ;;  %v2415_v3 = vmul.f32 1.442695, %v2380_v11  ;;  %v7710_v36 = vpop.eup %5837  ;;  %v2505_v21 = vadd.f32 %v7702_v30, %v2473_v6  ;;  %5855 = vpow2.f32 %v2221_v4  ;;  %v7715_v47 = vpop.permute.xlu1 %1255  ;;  %900 = vrot.lane.b32.xlu0 %v7700_v23, %s6436_s29 }
 0x239   :  { %v1709_v12 = vmul.f32 %v5836_v33, %v7586_v1  ;;  %v1741_v9 = vmul.f32 %v5836_v33, %v7600_v0  ;;  %10814 = vst [vmem:[#allocation11_spill] sm:$0xff] %v7715_v47  ;;  %v5840_v8 = vpop.eup %5839  ;;  %5857 = vpow2.f32 %v2223_v5  ;;  %v7721_v40 = vmax.f32 %v7400_v14, %v7681_v44  ;;  %v10815_v5 = vld [vmem:[#allocation21_spill] sm:$0xff] }
 0x23a   :  { %v7725_v11 = vmax.f32 %v7411_v60, %v7689_v13  ;;  %v1046_v1 = vsub.f32 %v7683_v18, %v7683_v18  ;;  %v7729_v58 = vpop.eup %5841  ;;  %5859 = vrcp.f32 %v2505_v21  ;;  %v1710_v0 = vmul.f32 %v5840_v8, %v7605_v43  ;;  %v7734_v4 = vpop.permute.xlu0 %872 }
 0x23b   :  { %v1742_v42 = vmul.f32 %v5840_v8, %v7614_v22  ;;  %v1773_v6 = vmul.f32 %v1709_v12, %v7036_v49  ;;  %902 = vrot.lane.b32.xlu1 %v7663_v10, %s6436_s29  ;;  %v7738_v33 = vpop.eup %5843  ;;  %5861 = vpow2.f32 %v2319_v7  ;;  %v1901_v34 = vmul.f32 %v10815_v5, %v1741_v9  ;;  %v10816_v22 = vld [vmem:[#allocation13_spill] sm:$0xff] }
 0x23c   :  { %v1647_v62 = vadd.f32 %v7729_v58, %v7710_v36  ;;  %v1457_v21 = vsub.f32 %v7400_v14, %v7721_v40  ;;  %v7745_v43 = vpop.eup %5845  ;;  %5863 = vpow2.f32 %v2415_v3  ;;  %v1774_v49 = vmul.f32 %v7030_v48, %v1710_v0  ;;  %v7751_v47 = vpop.permute.xlu1 %1991  ;;  %1285 = vrot.lane.b32.xlu0 %v7700_v23, %s6437_s13 }
 0x23d   :  { %v1902_v12 = vmul.f32 %v10816_v22, %v1742_v42  ;;  %v1553_v8 = vsub.f32 %v7681_v44, %v7721_v40  ;;  %10817 = vst [vmem:[#allocation30_spill] sm:$0xff] %v7751_v47  ;;  %v5848_v7 = vpop.eup %5847  ;;  %5865 = vpow2.f32 %v2317_v20  ;;  %v1933_v9 = vadd.f32 %v1901_v34, %v1773_v6  ;;  %v10819_v20 = vld [vmem:[#allocation18_spill] sm:$0xff] }
 0x23e   :  { %v1648_v5 = vadd.f32 %v7745_v43, %v7738_v33  ;;  %v1497_v18 = vmul.f32 1.442695, %v1457_v21  ;;  %v5850_v3 = vpop.eup %5849  ;;  %5867 = vpow2.f32 %v2413_v46  ;;  %v1458_v42 = vsub.f32 %v7411_v60, %v7725_v11  ;;  %v7759_v22 = vpop.permute.xlu0 %1257  ;;  %v10820_v21 = vld [vmem:[#allocation19_spill] sm:$0xff] }
 0x23f   :  { %v1934_v48 = vadd.f32 %v1902_v12, %v1774_v49  ;;  %v1593_v0 = vmul.f32 1.442695, %v1553_v8  ;;  %10818 = vst [vmem:[#allocation21_spill] sm:$0xff] %v7759_v22  ;;  %1287 = vrot.lane.b32.xlu1 %v7663_v10, %s6437_s13  ;;  %v7763_v47 = vpop.eup %5851  ;;  %v2061_v34 = vadd.f32 %v10819_v20, %v1933_v9  ;;  %v1554_v6 = vsub.f32 %v7689_v13, %v7725_v11 }
 0x240   :  { %5869 = vrcp.f32 %v1648_v5  ;;  %v1171_v46 = vmul.f32 %v5848_v7, %v7629_v19  ;;  %v1499_v12 = vmul.f32 1.442695, %v1458_v42  ;;  %v1172_v8 = vmul.f32 %v5850_v3, %v7639_v41  ;;  %v7771_v22 = vpop.permute.xlu1 %1989  ;;  %1861 = vrot.lane.b32.xlu0 %v7700_v23, %s6438_s14  ;;  %v10822_v7 = vld [vmem:[#allocation39_spill] sm:$0xff] }
 0x241   :  { %v2062_v49 = vadd.f32 %v10820_v21, %v1934_v48  ;;  %5871 = vrcp.f32 %v1647_v62  ;;  %10821 = vst [vmem:[#allocation13_spill] sm:$0xff] %v7771_v22  ;;  %v2093_v60 = vadd.f32 %v2061_v34, %v7140_v61  ;;  %v1595_v9 = vmul.f32 1.442695, %v1554_v6 }
 0x242   :  { %5873 = vpow2.f32 %v1497_v18  ;;  %v1203_v5 = vmul.f32 %v1171_v46, %v7092_v55  ;;  %v1204_v19 = vmul.f32 %v7086_v54, %v1172_v8  ;;  %v1091_v62 = vmul.f32 1.442695, %v1046_v1  ;;  %v7785_v18 = vpop.permute.xlu0 %1833  ;;  %v10825_v1 = vld [vmem:[#allocation5_spill] sm:$0xff] }
 0x243   :  { %v2094_v20 = vadd.f32 %v2062_v49, %v7140_v61  ;;  %5875 = vpow2.f32 %v1593_v0  ;;  %2019 = vrot.lane.b32.xlu1 %v7589_v17, %s6439_s15  ;;  %v2125_v41 = vmax.f32 %v2093_v60, 0.0  ;;  %v7783_v48 = vmax.f32 %v7670_v26, 0.0  ;;  %10824 = vst [vmem:[#allocation19_spill] sm:$0xff] %v7785_v18  ;;  %v10827_v26 = vld [vmem:[#allocation41_spill] sm:$0xff] }
 0x244   :  { %5877 = vpow2.f32 %v1499_v12  ;;  %v1331_v3 = vadd.f32 %v10822_v7, %v1203_v5  ;;  %v7787_v42 = vpop.eup %5853  ;;  %v1332_v0 = vadd.f32 %v7512_v63, %v1204_v19  ;;  %v951_v6 = vadd.f32 %v10825_v1, %v7691_v38  ;;  %v7792_v46 = vpop.permute.xlu1 %874  ;;  %1863 = vrot.lane.b32.xlu0 %v7663_v10, %s6438_s14  ;;  %v10830_v7 = vld [vmem:[#allocation38_spill] sm:$0xff] }
 0x245   :  { %10823 = vst [vmem:[#allocation18_spill] sm:$0xff] %v7783_v48  ;;  %v2126_v34 = vmax.f32 %v2094_v20, 0.0  ;;  %5879 = vpow2.f32 %v1595_v9  ;;  %v7796_v60 = vpop.eup %5855  ;;  %v2157_v21 = vmax.f32 %v10827_v26, %v2125_v41  ;;  %v1047_v12 = vsub.f32 %v7783_v48, %v7783_v48  ;;  %v10829_v20 = vld [vmem:[#allocation15_spill] sm:$0xff] }
 0x246   :  { %10826 = vst [vmem:[#allocation39_spill] sm:$0xff] %v7796_v60  ;;  %v1363_v49 = vadd.f32 %v1331_v3, %v7140_v61  ;;  %5881 = vrcp.f32 %v7763_v47  ;;  %v7803_v63 = vpop.eup %5857  ;;  %v1364_v8 = vadd.f32 %v1332_v0, %v7140_v61  ;;  %v7808_v9 = vadd.f32 %v7140_v61, %v951_v6 }
 0x247   :  { %10828 = vst [vmem:[#allocation41_spill] sm:$0xff] %v7803_v63  ;;  %v2158_v38 = vmax.f32 %v7478_v2, %v2126_v34  ;;  %5883 = vpow2.f32 %v1091_v62  ;;  %2023 = vrot.lane.b32.xlu1 %v7663_v10, %s6439_s15  ;;  %v7812_v5 = vpop.eup %5859  ;;  %v2189_v19 = vsub.f32 %v10829_v20, %v2157_v21  ;;  %v2285_v3 = vsub.f32 %v10830_v7, %v2157_v21  ;;  %v10833_v2 = vld [vmem:[#allocation16_spill] sm:$0xff]  ;;  %v7830_v7 = vpop.permute.xlu0 %1839 }
 0x248   :  { %v2381_v26 = vsub.f32 %v2125_v41, %v2157_v21  ;;  %v7816_v17 = vmax.f32 %v1363_v49, 0.0  ;;  %v7818_v18 = vpop.eup %5861  ;;  %v7822_v22 = vmax.f32 %v1364_v8, 0.0  ;;  %2021 = vrot.lane.b32.xlu0 %v7700_v23, %s6439_s15  ;;  %10835 = vst [vmem:[#allocation60_spill] sm:$0xff] %v7830_v7  ;;  %v7832_v48 = vpop.permute.xlu1 %1259  ;;  %v10837_v8 = vld [vmem:[#allocation40_spill] sm:$0xff] }
 0x249   :  { %10832 = vst [vmem:[#allocation38_spill] sm:$0xff] %v7818_v18  ;;  %v2190_v0 = vsub.f32 %v10833_v2, %v2158_v38  ;;  %v2286_v62 = vsub.f32 %v7458_v29, %v2158_v38  ;;  %v2382_v6 = vsub.f32 %v2126_v34, %v2158_v38  ;;  %v7826_v10 = vpop.eup %5863  ;;  %v2476_v20 = vadd.f32 %v7818_v18, %v7803_v63 }
 0x24a   :  { %10831 = vst [vmem:[#allocation15_spill] sm:$0xff] %v7816_v17  ;;  %10834 = vst [vmem:[#allocation16_spill] sm:$0xff] %v7826_v10  ;;  %v2225_v41 = vmul.f32 1.442695, %v2189_v19  ;;  %v2321_v21 = vmul.f32 1.442695, %v2285_v3  ;;  %v7834_v2 = vpop.eup %5865  ;;  %v7838_v23 = vmax.f32 %v10837_v8, %v7816_v17  ;;  %v7847_v3 = vmax.f32 %v7531_v28, %v7822_v22 }
 0x24b   :  { %v2417_v49 = vmul.f32 1.442695, %v2381_v26  ;;  %10836 = vst [vmem:[#allocation61_spill] sm:$0xff] %v7832_v48  ;;  %v2227_v29 = vmul.f32 1.442695, %v2190_v0  ;;  %v7840_v1 = vpop.eup %5867  ;;  %v2508_v63 = vadd.f32 %v7826_v10, %v2476_v20  ;;  %v2475_v19 = vadd.f32 %v7834_v2, %v7796_v60 }
 0x24c   :  { %v2323_v34 = vmul.f32 1.442695, %v2286_v62  ;;  %v2419_v38 = vmul.f32 1.442695, %v2382_v6  ;;  %10838 = vst [vmem:[#allocation62_spill] sm:$0xff] %v7838_v23  ;;  %5885 = vpow2.f32 %v2225_v41  ;;  %v1459_v0 = vsub.f32 %v10837_v8, %v7838_v23 }
 0x24d   :  { %v5870_v26 = vpop.eup %5869  ;;  %5887 = vpow2.f32 %v2227_v29  ;;  %v1555_v62 = vsub.f32 %v7816_v17, %v7838_v23  ;;  %v7853_v6 = vmul.f32 1.442695, %v1047_v12  ;;  %v2507_v20 = vadd.f32 %v7840_v1, %v2475_v19  ;;  %v877_v23 = vpop.permute.xlu0 %876 }
 0x24e   :  { %v5872_v7 = vpop.eup %5871  ;;  %5889 = vrcp.f32 %v2508_v63  ;;  %v1712_v41 = vmul.f32 %v5870_v26, %v7738_v33  ;;  %v1744_v48 = vmul.f32 %v5870_v26, %v7745_v43  ;;  %v1501_v10 = vmul.f32 1.442695, %v1459_v0  ;;  %v10839_v63 = vld [vmem:[#allocation20_spill] sm:$0xff]  ;;  %v7866_v33 = vpop.permute.xlu1 %1995 }
 0x24f   :  { %v7858_v60 = vpop.eup %5873  ;;  %5891 = vpow2.f32 %v2323_v34  ;;  %v1711_v29 = vmul.f32 %v5872_v7, %v7710_v36  ;;  %v1743_v8 = vmul.f32 %v5872_v7, %v7729_v58  ;;  %v1597_v19 = vmul.f32 1.442695, %v1555_v62  ;;  %10840 = vst [vmem:[#allocation20_spill] sm:$0xff] %v7866_v33  ;;  %v10841_v36 = vld [vmem:[#allocation27_spill] sm:$0xff] }
 0x250   :  { %v7862_v18 = vpop.eup %5875  ;;  %5893 = vrcp.f32 %v2507_v20  ;;  %v1776_v12 = vmul.f32 %v7050_v50, %v1712_v41  ;;  %v1904_v17 = vmul.f32 %v10839_v63, %v1744_v48  ;;  %v1460_v48 = vsub.f32 %v7531_v28, %v7847_v3  ;;  %v10843_v41 = vld [vmem:[#allocation24_spill] sm:$0xff]  ;;  %v10846_v33 = vld [vmem:[#allocation7_spill] sm:$0xff] }
 0x251   :  { %v7868_v43 = vpop.eup %5877  ;;  %5895 = vpow2.f32 %v2419_v38  ;;  %v1775_v34 = vmul.f32 %v1711_v29, %v7056_v51  ;;  %v1903_v26 = vmul.f32 %v10841_v36, %v1743_v8  ;;  %v1649_v58 = vadd.f32 %v7862_v18, %v7858_v60 }
 0x252   :  { %v7874_v7 = vpop.eup %5879  ;;  %5897 = vpow2.f32 %v2321_v21  ;;  %v1936_v50 = vadd.f32 %v1904_v17, %v1776_v12  ;;  %v1556_v0 = vsub.f32 %v7822_v22, %v7847_v3  ;;  %v7883_v8 = vmax.f32 %v7808_v9, 0.0  ;;  %v10844_v12 = vld [vmem:[#allocation23_spill] sm:$0xff]  ;;  %v10845_v9 = vld [vmem:[#allocation8_spill] sm:$0xff] }
 0x253   :  { %v5882_v62 = vpop.eup %5881  ;;  %5899 = vpow2.f32 %v2417_v49  ;;  %v1935_v38 = vadd.f32 %v1903_v26, %v1775_v34  ;;  %v1650_v51 = vadd.f32 %v7874_v7, %v7868_v43  ;;  %v1503_v17 = vmul.f32 1.442695, %v1460_v48  ;;  %v7899_v48 = vpop.permute.xlu1 %1993 }
 0x254   :  { %10842 = vst [vmem:[#allocation27_spill] sm:$0xff] %v7883_v8  ;;  %v7885_v20 = vpop.eup %5883  ;;  %v2064_v21 = vadd.f32 %v10843_v41, %v1936_v50  ;;  %5901 = vrcp.f32 %v1649_v58  ;;  %v1599_v29 = vmul.f32 1.442695, %v1556_v0  ;;  %v1173_v36 = vmul.f32 %v5882_v62, %v7763_v47  ;;  %v7897_v58 = vpop.permute.xlu0 %1261  ;;  %10848 = vst [vmem:[#allocation23_spill] sm:$0xff] %v7899_v48 }
 0x255   :  { %v2063_v63 = vadd.f32 %v10844_v12, %v1935_v38  ;;  %5903 = vrcp.f32 %v1650_v51  ;;  %v1048_v49 = vsub.f32 %v7883_v8, %v7883_v8  ;;  %v952_v26 = vadd.f32 %v7734_v4, %v10845_v9  ;;  %10847 = vst [vmem:[#allocation24_spill] sm:$0xff] %v7897_v58 }
 0x256   :  { %v2096_v34 = vadd.f32 %v2064_v21, %v7140_v61  ;;  %5905 = vpow2.f32 %v1501_v10  ;;  %v953_v50 = vadd.f32 %v10846_v33, %v7792_v46  ;;  %v1205_v47 = vmul.f32 %v1173_v36, %v7112_v57 }
 0x257   :  { %v2095_v0 = vadd.f32 %v2063_v63, %v7140_v61  ;;  %5907 = vpow2.f32 %v1597_v19  ;;  %v1095_v62 = vmul.f32 1.442695, %v1048_v49  ;;  %v985_v10 = vadd.f32 %v7140_v61, %v952_v26  ;;  %v10849_v63 = vld [vmem:[#allocation12_spill] sm:$0xff] }
 0x258   :  { %v2128_v38 = vmax.f32 %v2096_v34, 0.0  ;;  %5909 = vpow2.f32 %v1503_v17  ;;  %v986_v51 = vadd.f32 %v7140_v61, %v953_v50  ;;  %v1333_v46 = vadd.f32 %v7547_v45, %v1205_v47 }
 0x259   :  { %v7905_v4 = vpop.eup %5885  ;;  %v2127_v41 = vmax.f32 %v2095_v0, 0.0  ;;  %5911 = vpow2.f32 %v1599_v29  ;;  %v7912_v19 = vmax.f32 %v985_v10, 0.0  ;;  %v954_v17 = vadd.f32 %v877_v23, %v10849_v63  ;;  %v7926_v0 = vpop.permute.xlu0 %1837 }
 0x25a   :  { %v7908_v21 = vpop.eup %5887  ;;  %v2160_v12 = vmax.f32 %v7578_v32, %v2128_v38  ;;  %5913 = vrcp.f32 %v7885_v20  ;;  %v1365_v34 = vadd.f32 %v1333_v46, %v7140_v61  ;;  %v7920_v29 = vmax.f32 %v986_v51, 0.0  ;;  %10851 = vst [vmem:[#allocation7_spill] sm:$0xff] %v7926_v0  ;;  %v7928_v23 = vpop.permute.xlu1 %878 }
 0x25b   :  { %v7915_v36 = vpop.eup %5889  ;;  %v2159_v49 = vmax.f32 %v7574_v27, %v2127_v41  ;;  %5915 = vpow2.f32 %v7853_v6 }
 0x25c   :  { %10850 = vst [vmem:[#allocation8_spill] sm:$0xff] %v7920_v29  ;;  %v7922_v45 = vpop.eup %5891  ;;  %v2192_v32 = vsub.f32 %v7326_v35, %v2160_v12  ;;  %v2288_v26 = vsub.f32 %v7562_v59, %v2160_v12  ;;  %v2384_v50 = vsub.f32 %v2128_v38, %v2160_v12  ;;  %5917 = vpow2.f32 %v1095_v62 }
 0x25d   :  { %v7930_v47 = vpop.eup %5893  ;;  %v2478_v27 = vadd.f32 %v7922_v45, %v7908_v21  ;;  %v2191_v6 = vsub.f32 %v7317_v31, %v2159_v49  ;;  %v2287_v10 = vsub.f32 %v7560_v37, %v2159_v49  ;;  %v2383_v51 = vsub.f32 %v2127_v41, %v2159_v49 }
 0x25e   :  { %v7936_v46 = vpop.eup %5895  ;;  %v2231_v35 = vmul.f32 1.442695, %v2192_v32  ;;  %v2327_v59 = vmul.f32 1.442695, %v2288_v26  ;;  %v1049_v62 = vsub.f32 %v7912_v19, %v7912_v19  ;;  %v987_v38 = vadd.f32 %v7140_v61, %v954_v17 }
 0x25f   :  { %v7941_v12 = vpop.eup %5897  ;;  %v2510_v0 = vadd.f32 %v7936_v46, %v2478_v27  ;;  %v2423_v48 = vmul.f32 1.442695, %v2384_v50  ;;  %v2229_v58 = vmul.f32 1.442695, %v2191_v6  ;;  %v2325_v63 = vmul.f32 1.442695, %v2287_v10 }
 0x260   :  { %v7944_v31 = vpop.eup %5899  ;;  %v2477_v37 = vadd.f32 %v7941_v12, %v7905_v4  ;;  %5919 = vpow2.f32 %v2231_v35  ;;  %v2421_v41 = vmul.f32 1.442695, %v2383_v51  ;;  %v7948_v49 = vmax.f32 %v1365_v34, 0.0  ;;  %v7959_v34 = vpop.permute.xlu0 %1843 }
 0x261   :  { %v5902_v32 = vpop.eup %5901  ;;  %5921 = vrcp.f32 %v2510_v0  ;;  %v7950_v26 = vmul.f32 1.442695, %v1049_v62  ;;  %v1050_v17 = vsub.f32 %v7920_v29, %v7920_v29  ;;  %v2602_v50 = vmul.f32 %v7787_v42, %v7665_v25  ;;  %10853 = vst [vmem:[#allocation64_spill] sm:$0xff] %v7959_v34  ;;  %v7961_v35 = vpop.permute.xlu1 %1263 }
 0x262   :  { %10852 = vst [vmem:[#allocation63_spill] sm:$0xff] %v7948_v49  ;;  %v5904_v27 = vpop.eup %5903  ;;  %v2509_v6 = vadd.f32 %v7944_v31, %v2477_v37  ;;  %5923 = vpow2.f32 %v2327_v59  ;;  %v1745_v10 = vmul.f32 %v5902_v32, %v7862_v18  ;;  %v1713_v51 = vmul.f32 %v5902_v32, %v7858_v60  ;;  %10854 = vst [vmem:[#allocation65_spill] sm:$0xff] %v7961_v35  ;;  %v10855_v18 = vld [vmem:[#allocation37_spill] sm:$0xff] }
 0x263   :  { %v7963_v0 = vpop.eup %5905  ;;  %5925 = vpow2.f32 %v2423_v48  ;;  %v1714_v62 = vmul.f32 %v5904_v27, %v7868_v43  ;;  %v1746_v29 = vmul.f32 %v5904_v27, %v7874_v7  ;;  %v7969_v25 = vmax.f32 %v7564_v24, %v7948_v49  ;;  %2864 = vperm.xlu1 %5745, %v2602_v50   ;;  %v10856_v7 = vld [vmem:[#allocation26_spill] sm:$0xff] }
 0x264   :  { %v7971_v59 = vpop.eup %5907  ;;  %5927 = vrcp.f32 %v2509_v6  ;;  %v1905_v60 = vmul.f32 %v10855_v18, %v1745_v10  ;;  %v1777_v37 = vmul.f32 %v1713_v51, %v7076_v53  ;;  %v7975_v32 = vmax.f32 %v987_v38, 0.0 }
 0x265   :  { %v7977_v34 = vpop.eup %5909  ;;  %5929 = vpow2.f32 %v2229_v58  ;;  %v1778_v43 = vmul.f32 %v7070_v52, %v1714_v62  ;;  %v1906_v48 = vmul.f32 %v10856_v7, %v1746_v29  ;;  %v1651_v27 = vadd.f32 %v7971_v59, %v7963_v0  ;;  %v10857_v62 = vld [vmem:[#allocation42_spill] sm:$0xff]  ;;  %v7994_v7 = vpop.permute.xlu1 %1999 }
 0x266   :  { %v7983_v50 = vpop.eup %5911  ;;  %5931 = vpow2.f32 %v2325_v63  ;;  %v1937_v6 = vadd.f32 %v1905_v60, %v1777_v37  ;;  %v1461_v10 = vsub.f32 %v7564_v24, %v7969_v25  ;;  %v1557_v53 = vsub.f32 %v7948_v49, %v7969_v25  ;;  %v881_v37 = vpop.permute.xlu0 %880  ;;  %10858 = vst [vmem:[#allocation37_spill] sm:$0xff] %v7994_v7  ;;  %v10859_v49 = vld [vmem:[#allocation35_spill] sm:$0xff] }
 0x267   :  { %v5914_v38 = vpop.eup %5913  ;;  %5933 = vpow2.f32 %v2421_v41  ;;  %v1938_v58 = vadd.f32 %v1906_v48, %v1778_v43  ;;  %v1652_v52 = vadd.f32 %v7983_v50, %v7977_v34  ;;  %v1099_v29 = vmul.f32 1.442695, %v1050_v17 }
 0x268   :  { %v7991_v51 = vpop.eup %5915  ;;  %v2065_v18 = vadd.f32 %v10857_v62, %v1937_v6  ;;  %5935 = vrcp.f32 %v1651_v27  ;;  %v1505_v63 = vmul.f32 1.442695, %v1461_v10  ;;  %v1601_v60 = vmul.f32 1.442695, %v1557_v53  ;;  %v10860_v53 = vld [vmem:[#allocation9_spill] sm:$0xff] }
 0x269   :  { %v7996_v35 = vpop.eup %5917  ;;  %v2066_v24 = vadd.f32 %v10859_v49, %v1938_v58  ;;  %5937 = vrcp.f32 %v1652_v52  ;;  %v1174_v41 = vmul.f32 %v5914_v38, %v7885_v20  ;;  %v2634_v48 = vmul.f32 %v7787_v42, %v7676_v39  ;;  %v10861_v58 = vld [vmem:[#allocation53_spill] sm:$0xff] }
 0x26a   :  { %v2097_v43 = vadd.f32 %v2065_v18, %v7140_v61  ;;  %5939 = vpow2.f32 %v1505_v63  ;;  %v2633_v27 = vmul.f32 %v7812_v5, %v7702_v30  ;;  %v2570_v20 = vmul.f32 %v7787_v42, %v7658_v15  ;;  %v10862_v18 = vld [vmem:[#allocation59_spill] sm:$0xff]  ;;  %v8029_v63 = vpop.permute.xlu0 %1265 }
 0x26b   :  { %v2098_v6 = vadd.f32 %v2066_v24, %v7140_v61  ;;  %5941 = vpow2.f32 %v1601_v60  ;;  %v1206_v49 = vmul.f32 %v7106_v56, %v1174_v41  ;;  %3056 = vperm.xlu0 %5746, %v2634_v48   ;;  %v955_v38 = vadd.f32 %v10860_v53, %v7928_v23  ;;  %10863 = vst [vmem:[#allocation26_spill] sm:$0xff] %v8029_v63  ;;  %v8031_v60 = vpop.permute.xlu1 %1997  ;;  %v10865_v48 = vld [vmem:[#allocation17_spill] sm:$0xff] }
 0x26c   :  { %v2129_v10 = vmax.f32 %v2097_v43, 0.0  ;;  %5943 = vrcp.f32 %v7991_v51  ;;  %3051 = vperm.xlu1 %5745, %v2633_v27   ;;  %v2601_v39 = vmul.f32 %v7812_v5, %v7695_v16  ;;  %v2603_v15 = vmul.f32 %v7930_v47, %v7834_v2  ;;  %10864 = vst [vmem:[#allocation42_spill] sm:$0xff] %v8031_v60 }
 0x26d   :  { %v8016_v30 = vpop.eup %5919  ;;  %v2130_v24 = vmax.f32 %v2098_v6, 0.0  ;;  %v1334_v52 = vadd.f32 %v10861_v58, %v1206_v49  ;;  %5945 = vrcp.f32 %v7996_v35  ;;  %v988_v23 = vadd.f32 %v7140_v61, %v955_v38  ;;  %v10866_v58 = vld [vmem:[#allocation33_spill] sm:$0xff] }
 0x26e   :  { %v8022_v42 = vpop.eup %5921  ;;  %v2161_v62 = vmax.f32 %v7721_v40, %v2129_v10  ;;  %5947 = vpow2.f32 %v7950_v26  ;;  %v2569_v16 = vmul.f32 %v7812_v5, %v10862_v18  ;;  %v956_v40 = vadd.f32 %v881_v37, %v10865_v48 }
 0x26f   :  { %v8033_v41 = vpop.eup %5923  ;;  %v2162_v43 = vmax.f32 %v7725_v11, %v2130_v24  ;;  %v1366_v2 = vadd.f32 %v1334_v52, %v7140_v61  ;;  %5949 = vpow2.f32 %v1099_v29  ;;  %2672 = vperm.xlu0 %5746, %v2570_v20  }
 0x270   :  { %v8038_v27 = vpop.eup %5925  ;;  %v2480_v26 = vadd.f32 %v8033_v41, %v8016_v30  ;;  %v2193_v5 = vsub.f32 %v7400_v14, %v2161_v62  ;;  %v2289_v6 = vsub.f32 %v7681_v44, %v2161_v62  ;;  %v2385_v49 = vsub.f32 %v2129_v10, %v2161_v62  ;;  %2869 = vperm.xlu1 %5745, %v2603_v15  }
 0x271   :  { %v8044_v38 = vpop.eup %5927  ;;  %v2194_v11 = vsub.f32 %v10866_v58, %v2162_v43  ;;  %v2290_v52 = vsub.f32 %v7689_v13, %v2162_v43  ;;  %v2386_v29 = vsub.f32 %v2130_v24, %v2162_v43  ;;  %v8048_v18 = vmax.f32 %v1366_v2, 0.0  ;;  %v10868_v58 = vld [vmem:[#allocation31_spill] sm:$0xff]  ;;  %v8066_v2 = vpop.permute.xlu0 %1841 }
 0x272   :  { %v8050_v37 = vpop.eup %5929  ;;  %v2512_v17 = vadd.f32 %v8038_v27, %v2480_v26  ;;  %v2233_v7 = vmul.f32 1.442695, %v2193_v5  ;;  %v2329_v14 = vmul.f32 1.442695, %v2289_v6  ;;  %v2425_v60 = vmul.f32 1.442695, %v2385_v49  ;;  %v8068_v26 = vpop.permute.xlu1 %882 }
 0x273   :  { %10867 = vst [vmem:[#allocation35_spill] sm:$0xff] %v8048_v18  ;;  %v8053_v44 = vpop.eup %5931  ;;  %v2235_v20 = vmul.f32 1.442695, %v2194_v11  ;;  %v2331_v10 = vmul.f32 1.442695, %v2290_v52  ;;  %v8057_v63 = vmax.f32 %v10868_v58, %v8048_v18  ;;  %v8063_v15 = vmax.f32 %v988_v23, 0.0  ;;  %2859 = vperm.xlu0 %5746, %v2601_v39  }
 0x274   :  { %v2427_v62 = vmul.f32 1.442695, %v2386_v29  ;;  %v8059_v13 = vpop.eup %5933  ;;  %5951 = vrcp.f32 %v2512_v17  ;;  %v2479_v24 = vadd.f32 %v8053_v44, %v8050_v37  ;;  %v989_v43 = vadd.f32 %v7140_v61, %v956_v40  ;;  %10869 = vst [vmem:[#allocation9_spill] sm:$0xff] %v8066_v2 }
 0x275   :  { %v5936_v5 = vpop.eup %5935  ;;  %5953 = vpow2.f32 %v2235_v20  ;;  %v1462_v6 = vsub.f32 %v10868_v58, %v8057_v63  ;;  %v1558_v17 = vsub.f32 %v8048_v18, %v8057_v63  ;;  %v2635_v49 = vmul.f32 %v7930_v47, %v7840_v1  ;;  %v10870_v1 = vld [vmem:[#allocation43_spill] sm:$0xff] }
 0x276   :  { %v5938_v23 = vpop.eup %5937  ;;  %v2511_v39 = vadd.f32 %v8059_v13, %v2479_v24  ;;  %5955 = vpow2.f32 %v2331_v10  ;;  %v1747_v40 = vmul.f32 %v5936_v5, %v7971_v59  ;;  %v1715_v11 = vmul.f32 %v5936_v5, %v7963_v0 }
 0x277   :  { %v8079_v52 = vpop.eup %5939  ;;  %5957 = vpow2.f32 %v2427_v62  ;;  %v1716_v29 = vmul.f32 %v5938_v23, %v7977_v34  ;;  %v1748_v20 = vmul.f32 %v5938_v23, %v7983_v50  ;;  %v1507_v2 = vmul.f32 1.442695, %v1462_v6  ;;  %3061 = vperm.xlu1 %5745, %v2635_v49   ;;  %2667 = vperm.xlu0 %5746, %v2569_v16   ;;  %v10871_v62 = vld [vmem:[#allocation34_spill] sm:$0xff]  ;;  %v8096_v16 = vpop.permute.xlu1 %1267 }
 0x278   :  { %v8083_v18 = vpop.eup %5941  ;;  %5959 = vrcp.f32 %v2511_v39  ;;  %v1907_v58 = vmul.f32 %v10870_v1, %v1747_v40  ;;  %v1779_v10 = vmul.f32 %v1715_v11, %v7092_v55  ;;  %v1603_v24 = vmul.f32 1.442695, %v1558_v17  ;;  %v8094_v55 = vpop.permute.xlu0 %1271  ;;  %10873 = vst [vmem:[#allocation59_spill] sm:$0xff] %v8096_v16  ;;  %v10878_v1 = vld [vmem:[#allocation47_spill] sm:$0xff] }
 0x279   :  { %v5944_v59 = vpop.eup %5943  ;;  %5961 = vpow2.f32 %v2233_v7  ;;  %v1780_v0 = vmul.f32 %v7086_v54, %v1716_v29  ;;  %v1908_v5 = vmul.f32 %v10871_v62, %v1748_v20  ;;  %v1653_v34 = vadd.f32 %v8083_v18, %v8079_v52  ;;  %10872 = vst [vmem:[#allocation53_spill] sm:$0xff] %v8094_v55 }
 0x27a   :  { %v5946_v50 = vpop.eup %5945  ;;  %5963 = vpow2.f32 %v2329_v14  ;;  %v1939_v6 = vadd.f32 %v1907_v58, %v1779_v10  ;;  %v1175_v49 = vmul.f32 %v5944_v59, %v7991_v51  ;;  %v1052_v23 = vsub.f32 %v8063_v15, %v8063_v15  ;;  %v10875_v14 = vld [vmem:[#allocation48_spill] sm:$0xff]  ;;  %v10876_v51 = vld [vmem:[#allocation6_spill] sm:$0xff] }
 0x27b   :  { %v8098_v7 = vpop.eup %5947  ;;  %5965 = vpow2.f32 %v2425_v60  ;;  %v1940_v54 = vadd.f32 %v1908_v5, %v1780_v0  ;;  %v1176_v17 = vmul.f32 %v5946_v50, %v7996_v35  ;;  %v8101_v39 = vmax.f32 %v989_v43, 0.0  ;;  %v10879_v60 = vld [vmem:[#allocation5_spill] sm:$0xff]  ;;  %v10880_v0 = vld [vmem:[#allocation56_spill] sm:$0xff]  ;;  %v10881_v5 = vld [vmem:[#allocation38_spill] sm:$0xff] }
 0x27c   :  { %v8103_v40 = vpop.eup %5949  ;;  %v2067_v58 = vadd.f32 %v10875_v14, %v1939_v6  ;;  %5967 = vrcp.f32 %v1653_v34  ;;  %v1207_v11 = vmul.f32 %v1175_v49, %v10876_v51  ;;  %v10877_v29 = vsub.f32 %v7975_v32, %v7975_v32  ;;  %v10882_v6 = vld [vmem:[#allocation11_spill] sm:$0xff]  ;;  %v8123_v14 = vpop.permute.xlu0 %1847 }
 0x27d   :  { %10874 = vst [vmem:[#allocation17_spill] sm:$0xff] %v8101_v39  ;;  %v2068_v10 = vadd.f32 %v10878_v1, %v1940_v54  ;;  %5969 = vpow2.f32 %v1507_v2  ;;  %v1208_v59 = vmul.f32 %v10879_v60, %v1176_v17  ;;  %v1053_v35 = vsub.f32 %v8101_v39, %v8101_v39  ;;  %10883 = vst [vmem:[#allocation33_spill] sm:$0xff] %v8123_v14 }
 0x27e   :  { %v1101_v20 = vmul.f32 1.442695, %v10877_v29  ;;  %v2099_v43 = vadd.f32 %v2067_v58, %v7140_v61  ;;  %5971 = vpow2.f32 %v1603_v24  ;;  %v1335_v62 = vadd.f32 %v10880_v0, %v1207_v11  ;;  %v8125_v24 = vpop.permute.xlu1 %2003 }
 0x27f   :  { %v2604_v34 = vmul.f32 %v7915_v36, %v10881_v5  ;;  %v2100_v50 = vadd.f32 %v2068_v10, %v7140_v61  ;;  %v1336_v49 = vadd.f32 %v10882_v6, %v1208_v59  ;;  %5973 = vrcp.f32 %v8098_v7  ;;  %10884 = vst [vmem:[#allocation43_spill] sm:$0xff] %v8125_v24  ;;  %v10885_v10 = vld [vmem:[#allocation14_spill] sm:$0xff]  ;;  %v10888_v5 = vld [vmem:[#allocation16_spill] sm:$0xff] }
 0x280   :  { %v1103_v2 = vmul.f32 1.442695, %v1052_v23  ;;  %v2131_v54 = vmax.f32 %v2099_v43, 0.0  ;;  %v1367_v17 = vadd.f32 %v1335_v62, %v7140_v61  ;;  %5975 = vrcp.f32 %v8103_v40  ;;  %v10886_v43 = vld [vmem:[#allocation62_spill] sm:$0xff] }
 0x281   :  { %2874 = vperm.xlu0 %5746, %v2604_v34   ;;  %v8127_v58 = vpop.eup %5951  ;;  %v2132_v11 = vmax.f32 %v2100_v50, 0.0  ;;  %v1368_v29 = vadd.f32 %v1336_v49, %v7140_v61  ;;  %v1105_v1 = vmul.f32 1.442695, %v1053_v35  ;;  %v957_v59 = vadd.f32 %v10885_v10, %v8068_v26 }
 0x282   :  { %v8132_v23 = vpop.eup %5953  ;;  %v2163_v0 = vmax.f32 %v10886_v43, %v2131_v54  ;;  %v8135_v62 = vmax.f32 %v1367_v17, 0.0  ;;  %5977 = vpow2.f32 %v1101_v20  ;;  %v2636_v34 = vmul.f32 %v7915_v36, %v10888_v5  ;;  %v10891_v17 = vld [vmem:[#allocation40_spill] sm:$0xff]  ;;  %v10892_v20 = vld [vmem:[#allocation15_spill] sm:$0xff] }
 0x283   :  { %v8139_v6 = vpop.eup %5955  ;;  %v2164_v50 = vmax.f32 %v7847_v3, %v2132_v11  ;;  %v8142_v14 = vmax.f32 %v1368_v29, 0.0  ;;  %5979 = vpow2.f32 %v1103_v2  ;;  %v990_v35 = vadd.f32 %v7140_v61, %v957_v59  ;;  %v10893_v59 = vld [vmem:[#allocation18_spill] sm:$0xff] }
 0x284   :  { %10887 = vst [vmem:[#allocation34_spill] sm:$0xff] %v8135_v62  ;;  %v8145_v26 = vpop.eup %5957  ;;  %v2482_v49 = vadd.f32 %v8139_v6, %v8132_v23  ;;  %v2195_v43 = vsub.f32 %v10891_v17, %v2163_v0  ;;  %v2291_v24 = vsub.f32 %v10892_v20, %v2163_v0  ;;  %v2387_v55 = vsub.f32 %v2131_v54, %v2163_v0  ;;  %v10895_v17 = vld [vmem:[#allocation41_spill] sm:$0xff]  ;;  %v885_v0 = vpop.permute.xlu0 %884 }
 0x285   :  { %10889 = vst [vmem:[#allocation48_spill] sm:$0xff] %v8142_v14  ;;  %10890 = vst [vmem:[#allocation47_spill] sm:$0xff] %v8145_v26  ;;  %3066 = vperm.xlu0 %5746, %v2636_v34   ;;  %v8151_v5 = vpop.eup %5959  ;;  %v2196_v3 = vsub.f32 %v7531_v28, %v2164_v50  ;;  %v2292_v29 = vsub.f32 %v7822_v22, %v2164_v50  ;;  %v2388_v2 = vsub.f32 %v2132_v11, %v2164_v50  ;;  %v8166_v34 = vpop.permute.xlu1 %2001 }
 0x286   :  { %v8157_v16 = vmax.f32 %v10893_v59, %v8135_v62  ;;  %v8159_v10 = vpop.eup %5961  ;;  %v8162_v60 = vadd.f32 %v8145_v26, %v2482_v49  ;;  %5981 = vpow2.f32 %v1105_v1  ;;  %v2572_v54 = vmul.f32 %v7915_v36, %v10895_v17  ;;  %10896 = vst [vmem:[#allocation38_spill] sm:$0xff] %v8166_v34 }
 0x287   :  { %10894 = vst [vmem:[#allocation56_spill] sm:$0xff] %v8159_v10  ;;  %v8168_v28 = vpop.eup %5963  ;;  %v2239_v22 = vmul.f32 1.442695, %v2196_v3  ;;  %v2335_v11 = vmul.f32 1.442695, %v2292_v29  ;;  %v8178_v36 = vmax.f32 %v7883_v8, %v8142_v14  ;;  %v8182_v29 = vmax.f32 %v990_v35, 0.0 }
 0x288   :  { %v2237_v50 = vmul.f32 1.442695, %v2195_v43  ;;  %v1463_v20 = vsub.f32 %v10893_v59, %v8157_v16  ;;  %v8172_v51 = vpop.eup %5965  ;;  %v2481_v49 = vadd.f32 %v8168_v28, %v8159_v10  ;;  %v2431_v1 = vmul.f32 1.442695, %v2388_v2 }
 0x289   :  { %v2333_v26 = vmul.f32 1.442695, %v2291_v24  ;;  %10897 = vst [vmem:[#allocation11_spill] sm:$0xff] %v8178_v36  ;;  %2682 = vperm.xlu0 %5746, %v2572_v54   ;;  %v5968_v17 = vpop.eup %5967  ;;  %5983 = vpow2.f32 %v2239_v22  ;;  %v2429_v3 = vmul.f32 1.442695, %v2387_v55  ;;  %v1559_v43 = vsub.f32 %v8135_v62, %v8157_v16  ;;  %10898 = vst [vmem:[#allocation62_spill] sm:$0xff] %v8182_v29 }
 0x28a   :  { %v8184_v34 = vpop.eup %5969  ;;  %5985 = vpow2.f32 %v2335_v11  ;;  %v1749_v59 = vmul.f32 %v5968_v17, %v8083_v18  ;;  %v1509_v2 = vmul.f32 1.442695, %v1463_v20  ;;  %v10899_v24 = vld [vmem:[#allocation39_spill] sm:$0xff]  ;;  %v8192_v54 = vadd.f32 %v8172_v51, %v2481_v49  ;;  %v10900_v18 = vld [vmem:[#allocation50_spill] sm:$0xff]  ;;  %v8204_v49 = vpop.permute.xlu0 %1269 }
 0x28b   :  { %v2571_v10 = vmul.f32 %v7930_v47, %v10899_v24  ;;  %v8189_v39 = vpop.eup %5971  ;;  %v1717_v55 = vmul.f32 %v5968_v17, %v8079_v52  ;;  %v1464_v35 = vsub.f32 %v7883_v8, %v8178_v36  ;;  %v1560_v22 = vsub.f32 %v8142_v14, %v8178_v36  ;;  %v887_v52 = vpop.permute.xlu1 %886 }
 0x28c   :  { %v5974_v11 = vpop.eup %5973  ;;  %5987 = vpow2.f32 %v2431_v1  ;;  %v1909_v20 = vmul.f32 %v10900_v18, %v1749_v59  ;;  %v1654_v47 = vadd.f32 %v8189_v39, %v8184_v34  ;;  %v1054_v24 = vsub.f32 %v8182_v29, %v8182_v29 }
 0x28d   :  { %2677 = vperm.xlu0 %5746, %v2571_v10   ;;  %v5976_v17 = vpop.eup %5975  ;;  %5989 = vpow2.f32 %v2237_v50  ;;  %v1605_v8 = vmul.f32 1.442695, %v1559_v43  ;;  %v1781_v62 = vmul.f32 %v1717_v55, %v7112_v57  ;;  %v1511_v14 = vmul.f32 1.442695, %v1464_v35 }
 0x28e   :  { %5991 = vpow2.f32 %v2333_v26  ;;  %v1607_v1 = vmul.f32 1.442695, %v1560_v22  ;;  %v1177_v59 = vmul.f32 %v5974_v11, %v8098_v7  ;;  %v1178_v18 = vmul.f32 %v5976_v17, %v8103_v40  ;;  %v10901_v40 = vld [vmem:[#allocation57_spill] sm:$0xff] }
 0x28f   :  { %v8209_v36 = vpop.eup %5977  ;;  %5993 = vpow2.f32 %v2429_v3  ;;  %v1941_v29 = vadd.f32 %v1909_v20, %v1781_v62  ;;  %v2574_v10 = vmul.f32 %v8022_v42, %v7908_v21  ;;  %v2606_v50 = vmul.f32 %v8022_v42, %v7922_v45  ;;  %v10902_v21 = vld [vmem:[#allocation25_spill] sm:$0xff] }
 0x290   :  { %v8215_v43 = vpop.eup %5979  ;;  %5995 = vrcp.f32 %v1654_v47  ;;  %v1209_v57 = vmul.f32 %v1177_v59, %v10845_v9  ;;  %v1210_v26 = vmul.f32 %v10846_v33, %v1178_v18  ;;  %v1107_v7 = vmul.f32 1.442695, %v1054_v24  ;;  %v10903_v45 = vld [vmem:[#allocation21_spill] sm:$0xff]  ;;  %v8227_v47 = vpop.permute.xlu0 %1845 }
 0x291   :  { %5997 = vpow2.f32 %v1509_v2  ;;  %v2069_v55 = vadd.f32 %v10901_v40, %v1941_v29  ;;  %2692 = vperm.xlu1 %5745, %v2574_v10   ;;  %2884 = vperm.xlu0 %5746, %v2606_v50   ;;  %v2605_v62 = vmul.f32 %v8044_v38, %v7941_v12  ;;  %v958_v3 = vadd.f32 %v885_v0, %v10902_v21  ;;  %v10904_v22 = vld [vmem:[#allocation61_spill] sm:$0xff]  ;;  %v8229_v2 = vpop.permute.xlu1 %2007  ;;  %v10907_v0 = vld [vmem:[#allocation22_spill] sm:$0xff] }
 0x292   :  { %5999 = vpow2.f32 %v1605_v8  ;;  %v1337_v35 = vadd.f32 %v10903_v45, %v1209_v57  ;;  %v1338_v11 = vadd.f32 %v10904_v22, %v1210_v26  ;;  %v2638_v20 = vmul.f32 %v8022_v42, %v7936_v46  ;;  %10905 = vst [vmem:[#allocation16_spill] sm:$0xff] %v8227_v47  ;;  %10906 = vst [vmem:[#allocation40_spill] sm:$0xff] %v8229_v2  ;;  %v10914_v22 = vld [vmem:[#allocation63_spill] sm:$0xff] }
 0x293   :  { %v8231_v29 = vpop.eup %5981  ;;  %v2101_v24 = vadd.f32 %v2069_v55, %v7140_v61  ;;  %6001 = vpow2.f32 %v1511_v14  ;;  %v991_v12 = vadd.f32 %v7140_v61, %v958_v3  ;;  %v959_v8 = vadd.f32 %v10907_v0, %v887_v52  ;;  %v10909_v55 = vld [vmem:[#allocation8_spill] sm:$0xff] }
 0x294   :  { %6003 = vpow2.f32 %v1607_v1  ;;  %v1369_v17 = vadd.f32 %v1337_v35, %v7140_v61  ;;  %v1370_v59 = vadd.f32 %v1338_v11, %v7140_v61  ;;  %v2637_v46 = vmul.f32 %v8044_v38, %v7944_v31  ;;  %v10913_v35 = vld [vmem:[#allocation49_spill] sm:$0xff] }
 0x295   :  { %v2133_v42 = vmax.f32 %v2101_v24, 0.0  ;;  %6005 = vrcp.f32 %v8209_v36  ;;  %2879 = vperm.xlu1 %5745, %v2605_v62   ;;  %v8241_v18 = vmax.f32 %v991_v12, 0.0  ;;  %3076 = vperm.xlu0 %5746, %v2638_v20   ;;  %v2573_v14 = vmul.f32 %v8044_v38, %v7905_v4  ;;  %v8273_v3 = vpop.permute.xlu1 %2005 }
 0x296   :  { %v8245_v10 = vpop.eup %5983  ;;  %v8247_v52 = vmax.f32 %v1369_v17, 0.0  ;;  %v8249_v1 = vmax.f32 %v1370_v59, 0.0  ;;  %6007 = vrcp.f32 %v8215_v43  ;;  %v992_v31 = vadd.f32 %v7140_v61, %v959_v8  ;;  %10911 = vst [vmem:[#allocation39_spill] sm:$0xff] %v8273_v3 }
 0x297   :  { %10908 = vst [vmem:[#allocation15_spill] sm:$0xff] %v8241_v18  ;;  %v8253_v50 = vpop.eup %5985  ;;  %v2165_v57 = vmax.f32 %v7969_v25, %v2133_v42  ;;  %6009 = vrcp.f32 %v8231_v29  ;;  %v1055_v26 = vsub.f32 %v8241_v18, %v8241_v18  ;;  %v2576_v4 = vmul.f32 %v8127_v58, %v8016_v30  ;;  %v8271_v25 = vpop.permute.xlu0 %1851 }
 0x298   :  { %v2484_v38 = vadd.f32 %v8253_v50, %v8245_v10  ;;  %v8265_v40 = vmax.f32 %v7912_v19, %v8247_v52  ;;  %v8269_v62 = vmax.f32 %v10909_v55, %v8249_v1  ;;  %6011 = vpow2.f32 %v1107_v7  ;;  %10910 = vst [vmem:[#allocation41_spill] sm:$0xff] %v8271_v25 }
 0x299   :  { %v8275_v45 = vpop.eup %5987  ;;  %v2197_v30 = vsub.f32 %v10913_v35, %v2165_v57  ;;  %v2293_v11 = vsub.f32 %v10914_v22, %v2165_v57  ;;  %v2389_v20 = vsub.f32 %v2133_v42, %v2165_v57  ;;  %3071 = vperm.xlu1 %5745, %v2637_v46   ;;  %2687 = vperm.xlu0 %5746, %v2573_v14   ;;  %6013 = vrcp.f32 %v8162_v60  ;;  %v891_v18 = vpop.permute.xlu1 %890 }
 0x29a   :  { %10912 = vst [vmem:[#allocation50_spill] sm:$0xff] %v8275_v45  ;;  %v8279_v24 = vpop.eup %5989  ;;  %v1465_v7 = vsub.f32 %v7912_v19, %v8265_v40  ;;  %v1561_v12 = vsub.f32 %v8247_v52, %v8265_v40  ;;  %v1466_v8 = vsub.f32 %v10909_v55, %v8269_v62  ;;  %v1562_v46 = vsub.f32 %v8249_v1, %v8269_v62 }
 0x29b   :  { %10915 = vst [vmem:[#allocation57_spill] sm:$0xff] %v8279_v24  ;;  %v8288_v17 = vpop.eup %5991  ;;  %v2241_v59 = vmul.f32 1.442695, %v2197_v30  ;;  %v2337_v35 = vmul.f32 1.442695, %v2293_v11  ;;  %v8292_v42 = vmax.f32 %v992_v31, 0.0  ;;  %6015 = vrcp.f32 %v8192_v54 }
 0x29c   :  { %10916 = vst [vmem:[#allocation25_spill] sm:$0xff] %v8288_v17  ;;  %v8294_v14 = vpop.eup %5993  ;;  %v8298_v60 = vadd.f32 %v8275_v45, %v2484_v38  ;;  %v2483_v57 = vadd.f32 %v8288_v17, %v8279_v24  ;;  %v8302_v22 = vmul.f32 1.442695, %v1055_v26  ;;  %v8304_v30 = vmul.f32 1.442695, %v2389_v20  ;;  %v889_v45 = vpop.permute.xlu0 %888 }
 0x29d   :  { %10917 = vst [vmem:[#allocation21_spill] sm:$0xff] %v8294_v14  ;;  %v5996_v25 = vpop.eup %5995  ;;  %6017 = vpow2.f32 %v2241_v59  ;;  %v1513_v11 = vmul.f32 1.442695, %v1465_v7  ;;  %v1609_v2 = vmul.f32 1.442695, %v1561_v12  ;;  %2702 = vperm.xlu1 %5745, %v2576_v4   ;;  %v1056_v26 = vsub.f32 %v8292_v42, %v8292_v42 }
 0x29e   :  { %v8306_v31 = vpop.eup %5997  ;;  %v1718_v3 = vmul.f32 %v5996_v25, %v8184_v34  ;;  %v1750_v54 = vmul.f32 %v5996_v25, %v8189_v39  ;;  %v1515_v38 = vmul.f32 1.442695, %v1466_v8  ;;  %v1611_v47 = vmul.f32 1.442695, %v1562_v46  ;;  %v10918_v25 = vld [vmem:[#allocation45_spill] sm:$0xff]  ;;  %v10920_v46 = vld [vmem:[#allocation32_spill] sm:$0xff] }
 0x29f   :  { %v8310_v24 = vpop.eup %5999  ;;  %6019 = vpow2.f32 %v2337_v35  ;;  %v2608_v20 = vmul.f32 %v8127_v58, %v8033_v41  ;;  %v2607_v4 = vmul.f32 %v8151_v5, %v8053_v44  ;;  %v2515_v39 = vadd.f32 %v8294_v14, %v2483_v57  ;;  %v10919_v44 = vld [vmem:[#allocation36_spill] sm:$0xff] }
 0x2a0   :  { %v8318_v7 = vpop.eup %6001  ;;  %v1782_v34 = vmul.f32 %v7106_v56, %v1718_v3  ;;  %v1910_v12 = vmul.f32 %v10918_v25, %v1750_v54  ;;  %v1655_v8 = vadd.f32 %v8310_v24, %v8306_v31  ;;  %6021 = vpow2.f32 %v1513_v11 }
 0x2a1   :  { %v8325_v59 = vpop.eup %6003  ;;  %2894 = vperm.xlu0 %5746, %v2608_v20   ;;  %2889 = vperm.xlu1 %5745, %v2607_v4   ;;  %v2640_v41 = vmul.f32 %v8127_v58, %v8038_v27  ;;  %v960_v35 = vadd.f32 %v889_v45, %v10919_v44  ;;  %v961_v17 = vadd.f32 %v10920_v46, %v891_v18  ;;  %v10921_v45 = vld [vmem:[#allocation55_spill] sm:$0xff] }
 0x2a2   :  { %v6006_v57 = vpop.eup %6005  ;;  %v1942_v14 = vadd.f32 %v1910_v12, %v1782_v34  ;;  %6023 = vrcp.f32 %v1655_v8  ;;  %v1656_v56 = vadd.f32 %v8325_v59, %v8318_v7  ;;  %v2639_v3 = vmul.f32 %v8151_v5, %v8059_v13  ;;  %v10922_v13 = vld [vmem:[#allocation12_spill] sm:$0xff] }
 0x2a3   :  { %v6008_v54 = vpop.eup %6007  ;;  %6025 = vpow2.f32 %v1609_v2  ;;  %v1179_v11 = vmul.f32 %v6006_v57, %v8209_v36  ;;  %v993_v20 = vadd.f32 %v7140_v61, %v960_v35  ;;  %v994_v27 = vadd.f32 %v7140_v61, %v961_v17  ;;  %v10925_v35 = vld [vmem:[#allocation65_spill] sm:$0xff] }
 0x2a4   :  { %v6010_v58 = vpop.eup %6009  ;;  %v2070_v18 = vadd.f32 %v10921_v45, %v1942_v14  ;;  %6027 = vrcp.f32 %v1656_v56  ;;  %v1180_v4 = vmul.f32 %v6008_v54, %v8215_v43  ;;  %v2575_v34 = vmul.f32 %v8151_v5, %v8050_v37  ;;  %v10924_v37 = vld [vmem:[#allocation24_spill] sm:$0xff] }
 0x2a5   :  { %v8342_v25 = vpop.eup %6011  ;;  %6029 = vpow2.f32 %v1515_v38  ;;  %v1211_v2 = vmul.f32 %v1179_v11, %v10922_v13  ;;  %v1181_v36 = vmul.f32 %v6010_v58, %v8231_v29  ;;  %3086 = vperm.xlu0 %5746, %v2640_v41   ;;  %v8346_v12 = vmax.f32 %v993_v20, 0.0  ;;  %3081 = vperm.xlu1 %5745, %v2639_v3   ;;  %v8359_v41 = vpop.permute.xlu0 %1273  ;;  %v10926_v20 = vld [vmem:[#allocation26_spill] sm:$0xff] }
 0x2a6   :  { %v2102_v17 = vadd.f32 %v2070_v18, %v7140_v61  ;;  %6031 = vpow2.f32 %v1611_v47  ;;  %v1212_v14 = vmul.f32 %v10860_v53, %v1180_v4  ;;  %v8350_v43 = vmax.f32 %v994_v27, 0.0  ;;  %v8352_v8 = vpop.eup %6013  ;;  %v8365_v3 = vpop.permute.xlu1 %1275 }
 0x2a7   :  { %v1339_v5 = vadd.f32 %v10924_v37, %v1211_v2  ;;  %v1213_v38 = vmul.f32 %v1181_v36, %v10865_v48  ;;  %6033 = vrcp.f32 %v8342_v25  ;;  %v1057_v29 = vsub.f32 %v8346_v12, %v8346_v12  ;;  %v10930_v37 = vld [vmem:[#allocation35_spill] sm:$0xff] }
 0x2a8   :  { %10923 = vst [vmem:[#allocation61_spill] sm:$0xff] %v8350_v43  ;;  %6035 = vrcp.f32 %v8298_v60  ;;  %v2134_v47 = vmax.f32 %v2102_v17, 0.0  ;;  %v1340_v57 = vadd.f32 %v10925_v35, %v1212_v14  ;;  %v1058_v56 = vsub.f32 %v8350_v43, %v8350_v43  ;;  %v8367_v54 = vpop.eup %6015 }
 0x2a9   :  { %6037 = vpow2.f32 %v8304_v30  ;;  %v1371_v11 = vadd.f32 %v1339_v5, %v7140_v61  ;;  %v1341_v27 = vadd.f32 %v10926_v20, %v1213_v38  ;;  %v1111_v58 = vmul.f32 1.442695, %v1056_v26  ;;  %2697 = vperm.xlu0 %5746, %v2575_v34   ;;  %v10929_v34 = vld [vmem:[#allocation31_spill] sm:$0xff] }
 0x2aa   :  { %v8372_v45 = vpop.eup %6017  ;;  %v2166_v60 = vmax.f32 %v8057_v63, %v2134_v47  ;;  %v1372_v18 = vadd.f32 %v1340_v57, %v7140_v61  ;;  %v1113_v4 = vmul.f32 1.442695, %v1057_v29  ;;  %v2578_v2 = vmul.f32 %v8352_v8, %v8132_v23 }
 0x2ab   :  { %10927 = vst [vmem:[#allocation22_spill] sm:$0xff] %v8372_v45  ;;  %6039 = vrcp.f32 %v2515_v39  ;;  %v8378_v36 = vmax.f32 %v1371_v11, 0.0  ;;  %v1373_v30 = vadd.f32 %v1341_v27, %v7140_v61  ;;  %v2610_v17 = vmul.f32 %v8352_v8, %v8139_v6  ;;  %v8396_v6 = vpop.permute.xlu0 %1849 }
 0x2ac   :  { %v8383_v26 = vpop.eup %6019  ;;  %v2198_v14 = vsub.f32 %v10929_v34, %v2166_v60  ;;  %v2294_v63 = vsub.f32 %v10930_v37, %v2166_v60  ;;  %6041 = vpow2.f32 %v8302_v22  ;;  %v1115_v5 = vmul.f32 1.442695, %v1058_v56  ;;  %2712 = vperm.xlu1 %5745, %v2578_v2   ;;  %10933 = vst [vmem:[#allocation45_spill] sm:$0xff] %v8396_v6  ;;  %v8400_v22 = vpop.permute.xlu1 %2011 }
 0x2ad   :  { %10928 = vst [vmem:[#allocation8_spill] sm:$0xff] %v8383_v26  ;;  %v8390_v23 = vmax.f32 %v7975_v32, %v8378_v36  ;;  %v8392_v39 = vmax.f32 %v1372_v18, 0.0  ;;  %v8394_v38 = vmax.f32 %v1373_v30, 0.0  ;;  %6043 = vpow2.f32 %v1111_v58  ;;  %2904 = vperm.xlu0 %5746, %v2610_v17   ;;  %v8398_v29 = vpop.eup %6021  ;;  %10934 = vst [vmem:[#allocation32_spill] sm:$0xff] %v8400_v22 }
 0x2ae   :  { %v2243_v35 = vmul.f32 1.442695, %v2198_v14  ;;  %v2339_v57 = vmul.f32 1.442695, %v2294_v63  ;;  %v2390_v11 = vsub.f32 %v2134_v47, %v2166_v60  ;;  %6045 = vpow2.f32 %v1113_v4  ;;  %v10935_v14 = vld [vmem:[#allocation17_spill] sm:$0xff] }
 0x2af   :  { %10931 = vst [vmem:[#allocation49_spill] sm:$0xff] %v8392_v39  ;;  %10932 = vst [vmem:[#allocation63_spill] sm:$0xff] %v8394_v38  ;;  %v6024_v56 = vpop.eup %6023  ;;  %v8404_v20 = vadd.f32 %v8383_v26, %v8372_v45  ;;  %v1467_v27 = vsub.f32 %v7975_v32, %v8390_v23  ;;  %v1563_v58 = vsub.f32 %v8378_v36, %v8390_v23  ;;  %6047 = vpow2.f32 %v1115_v5  ;;  %v8438_v26 = vpop.permute.xlu0 %1855 }
 0x2b0   :  { %v8412_v18 = vmax.f32 %v8063_v15, %v8392_v39  ;;  %v8414_v2 = vpop.eup %6025  ;;  %v1751_v47 = vmul.f32 %v6024_v56, %v8310_v24  ;;  %v1719_v60 = vmul.f32 %v6024_v56, %v8306_v31  ;;  %v2609_v4 = vmul.f32 %v8367_v54, %v8168_v28  ;;  %v10936_v24 = vld [vmem:[#allocation29_spill] sm:$0xff]  ;;  %10938 = vst [vmem:[#allocation55_spill] sm:$0xff] %v8438_v26 }
 0x2b1   :  { %v6028_v30 = vpop.eup %6027  ;;  %6049 = vpow2.f32 %v2243_v35  ;;  %v1657_v17 = vadd.f32 %v8414_v2, %v8398_v29  ;;  %v1517_v34 = vmul.f32 1.442695, %v1467_v27  ;;  %v8424_v37 = vmax.f32 %v10935_v14, %v8394_v38  ;;  %v10937_v35 = vld [vmem:[#allocation6_spill] sm:$0xff] }
 0x2b2   :  { %v8426_v63 = vpop.eup %6029  ;;  %6051 = vpow2.f32 %v2339_v57  ;;  %v1911_v22 = vmul.f32 %v10936_v24, %v1751_v47  ;;  %v1720_v31 = vmul.f32 %v6028_v30, %v8318_v7  ;;  %v1752_v5 = vmul.f32 %v6028_v30, %v8325_v59  ;;  %2899 = vperm.xlu1 %5745, %v2609_v4   ;;  %v10939_v47 = vld [vmem:[#allocation5_spill] sm:$0xff]  ;;  %v10940_v7 = vld [vmem:[#allocation52_spill] sm:$0xff]  ;;  %v8444_v4 = vpop.permute.xlu1 %2009 }
 0x2b3   :  { %v8431_v28 = vpop.eup %6031  ;;  %v1783_v56 = vmul.f32 %v1719_v60, %v10937_v35  ;;  %v1613_v6 = vmul.f32 1.442695, %v1563_v58  ;;  %v1468_v27 = vsub.f32 %v8063_v15, %v8412_v18  ;;  %v1564_v45 = vsub.f32 %v8392_v39, %v8412_v18  ;;  %10941 = vst [vmem:[#allocation12_spill] sm:$0xff] %v8444_v4  ;;  %v10944_v4 = vld [vmem:[#allocation47_spill] sm:$0xff] }
 0x2b4   :  { %v6034_v57 = vpop.eup %6033  ;;  %v1784_v24 = vmul.f32 %v10939_v47, %v1720_v31  ;;  %v1912_v43 = vmul.f32 %v10940_v7, %v1752_v5  ;;  %6053 = vrcp.f32 %v1657_v17  ;;  %v1658_v59 = vadd.f32 %v8431_v28, %v8426_v63  ;;  %v10943_v5 = vld [vmem:[#allocation13_spill] sm:$0xff] }
 0x2b5   :  { %v8446_v58 = vpop.eup %6035  ;;  %v1943_v60 = vadd.f32 %v1911_v22, %v1783_v56  ;;  %6055 = vpow2.f32 %v1517_v34  ;;  %v1519_v30 = vmul.f32 1.442695, %v1468_v27  ;;  %v1615_v35 = vmul.f32 1.442695, %v1564_v45  ;;  %v10946_v45 = vld [vmem:[#allocation30_spill] sm:$0xff] }
 0x2b6   :  { %v8448_v39 = vpop.eup %6037  ;;  %v1944_v26 = vadd.f32 %v1912_v43, %v1784_v24  ;;  %6057 = vrcp.f32 %v1658_v59  ;;  %v1469_v31 = vsub.f32 %v10935_v14, %v8424_v37  ;;  %v1565_v17 = vsub.f32 %v8394_v38, %v8424_v37  ;;  %v10947_v38 = vld [vmem:[#allocation14_spill] sm:$0xff] }
 0x2b7   :  { %10942 = vst [vmem:[#allocation24_spill] sm:$0xff] %v8448_v39  ;;  %v2071_v47 = vadd.f32 %v10943_v5, %v1943_v60  ;;  %6059 = vpow2.f32 %v1613_v6  ;;  %v1182_v7 = vmul.f32 %v6034_v57, %v8342_v25  ;;  %v2642_v22 = vmul.f32 %v8352_v8, %v10944_v4  ;;  %v893_v6 = vpop.permute.xlu0 %892  ;;  %v895_v4 = vpop.permute.xlu1 %894 }
 0x2b8   :  { %v8458_v34 = vpop.eup %6039  ;;  %v2072_v56 = vadd.f32 %v10946_v45, %v1944_v26  ;;  %6061 = vpow2.f32 %v1519_v30  ;;  %v1521_v43 = vmul.f32 1.442695, %v1469_v31  ;;  %v1617_v27 = vmul.f32 1.442695, %v1565_v17  ;;  %v10948_v17 = vld [vmem:[#allocation59_spill] sm:$0xff] }
 0x2b9   :  { %10945 = vst [vmem:[#allocation65_spill] sm:$0xff] %v8458_v34  ;;  %v8461_v24 = vpop.eup %6041  ;;  %v2103_v59 = vadd.f32 %v2071_v47, %v7140_v61  ;;  %6063 = vpow2.f32 %v1615_v35  ;;  %v1214_v60 = vmul.f32 %v10947_v38, %v1182_v7  ;;  %3096 = vperm.xlu0 %5746, %v2642_v22   ;;  %v2435_v57 = vmul.f32 1.442695, %v2390_v11  ;;  %v10949_v11 = vld [vmem:[#allocation46_spill] sm:$0xff]  ;;  %v10950_v22 = vld [vmem:[#allocation56_spill] sm:$0xff] }
 0x2ba   :  { %v8465_v25 = vpop.eup %6043  ;;  %v2104_v8 = vadd.f32 %v2072_v56, %v7140_v61  ;;  %6065 = vpow2.f32 %v1521_v43  ;;  %v2641_v26 = vmul.f32 %v8367_v54, %v8172_v51  ;;  %v2517_v31 = vadd.f32 %v8448_v39, %v8404_v20  ;;  %v10951_v20 = vld [vmem:[#allocation44_spill] sm:$0xff] }
 0x2bb   :  { %v8470_v30 = vpop.eup %6045  ;;  %v2135_v35 = vmax.f32 %v2103_v59, 0.0  ;;  %6067 = vpow2.f32 %v1617_v27  ;;  %v1342_v5 = vadd.f32 %v10948_v17, %v1214_v60  ;;  %v962_v7 = vadd.f32 %v893_v6, %v10949_v11  ;;  %v10952_v60 = vld [vmem:[#allocation11_spill] sm:$0xff]  ;;  %v10954_v17 = vld [vmem:[#allocation34_spill] sm:$0xff] }
 0x2bc   :  { %v2136_v47 = vmax.f32 %v2104_v8, 0.0  ;;  %6069 = vrcp.f32 %v8461_v24  ;;  %3091 = vperm.xlu1 %5745, %v2641_v26   ;;  %v2577_v45 = vmul.f32 %v8367_v54, %v10950_v22  ;;  %v8479_v56 = vpop.eup %6047  ;;  %v963_v27 = vadd.f32 %v10951_v20, %v895_v4  ;;  %v10955_v11 = vld [vmem:[#allocation27_spill] sm:$0xff]  ;;  %v10956_v20 = vld [vmem:[#allocation48_spill] sm:$0xff] }
 0x2bd   :  { %v2167_v51 = vmax.f32 %v8157_v16, %v2135_v35  ;;  %v1374_v43 = vadd.f32 %v1342_v5, %v7140_v61  ;;  %6071 = vrcp.f32 %v8465_v25  ;;  %v2580_v54 = vmul.f32 %v8446_v58, %v8245_v10  ;;  %v10953_v16 = vld [vmem:[#allocation18_spill] sm:$0xff] }
 0x2be   :  { %v8485_v59 = vpop.eup %6049  ;;  %v2168_v8 = vmax.f32 %v10952_v60, %v2136_v47  ;;  %6073 = vrcp.f32 %v8470_v30  ;;  %2707 = vperm.xlu0 %5746, %v2577_v45   ;;  %v995_v10 = vadd.f32 %v7140_v61, %v962_v7  ;;  %v10959_v7 = vld [vmem:[#allocation19_spill] sm:$0xff] }
 0x2bf   :  { %v8491_v6 = vpop.eup %6051  ;;  %6075 = vpow2.f32 %v2435_v57  ;;  %v2199_v26 = vsub.f32 %v10953_v16, %v2167_v51  ;;  %v2295_v5 = vsub.f32 %v10954_v17, %v2167_v51  ;;  %v2391_v22 = vsub.f32 %v2135_v35, %v2167_v51 }
 0x2c0   :  { %v2200_v4 = vsub.f32 %v10955_v11, %v2168_v8  ;;  %v2296_v39 = vsub.f32 %v10956_v20, %v2168_v8  ;;  %v2392_v34 = vsub.f32 %v2136_v47, %v2168_v8  ;;  %v8497_v60 = vmax.f32 %v1374_v43, 0.0  ;;  %2722 = vperm.xlu1 %5745, %v2580_v54   ;;  %v10958_v8 = vld [vmem:[#allocation62_spill] sm:$0xff] }
 0x2c1   :  { %v6054_v45 = vpop.eup %6053  ;;  %6077 = vrcp.f32 %v2517_v31  ;;  %v2245_v38 = vmul.f32 1.442695, %v2199_v26  ;;  %v996_v57 = vadd.f32 %v7140_v61, %v963_v27  ;;  %v2341_v20 = vmul.f32 1.442695, %v2295_v5 }
 0x2c2   :  { %10957 = vst [vmem:[#allocation26_spill] sm:$0xff] %v8497_v60  ;;  %v8501_v14 = vpop.eup %6055  ;;  %v2247_v16 = vmul.f32 1.442695, %v2200_v4  ;;  %v2343_v17 = vmul.f32 1.442695, %v2296_v39  ;;  %v1753_v11 = vmul.f32 %v6054_v45, %v8414_v2  ;;  %v1721_v43 = vmul.f32 %v6054_v45, %v8398_v29  ;;  %v10960_v45 = vld [vmem:[#allocation28_spill] sm:$0xff] }
 0x2c3   :  { %v2439_v35 = vmul.f32 1.442695, %v2392_v34  ;;  %v6058_v51 = vpop.eup %6057  ;;  %v2437_v47 = vmul.f32 1.442695, %v2391_v22  ;;  %v8507_v31 = vmax.f32 %v10958_v8, %v8497_v60 }
 0x2c4   :  { %v8509_v54 = vpop.eup %6059  ;;  %6079 = vpow2.f32 %v2247_v16  ;;  %v1913_v27 = vmul.f32 %v10959_v7, %v1753_v11  ;;  %v1722_v26 = vmul.f32 %v6058_v51, %v8426_v63  ;;  %v1754_v39 = vmul.f32 %v6058_v51, %v8431_v28 }
 0x2c5   :  { %v8514_v34 = vpop.eup %6061  ;;  %6081 = vpow2.f32 %v2343_v17  ;;  %v1785_v2 = vmul.f32 %v1721_v43, %v10845_v9  ;;  %v1659_v29 = vadd.f32 %v8509_v54, %v8501_v14  ;;  %v1470_v5 = vsub.f32 %v10958_v8, %v8507_v31 }
 0x2c6   :  { %v8521_v22 = vpop.eup %6063  ;;  %6083 = vpow2.f32 %v2439_v35  ;;  %v1786_v4 = vmul.f32 %v10846_v33, %v1722_v26  ;;  %v1914_v63 = vmul.f32 %v10960_v45, %v1754_v39  ;;  %v1566_v28 = vsub.f32 %v8497_v60, %v8507_v31  ;;  %v10962_v26 = vld [vmem:[#allocation23_spill] sm:$0xff]  ;;  %v10963_v45 = vld [vmem:[#allocation20_spill] sm:$0xff] }
 0x2c7   :  { %v8527_v16 = vpop.eup %6065  ;;  %6085 = vpow2.f32 %v2245_v38  ;;  %v1945_v9 = vadd.f32 %v1913_v27, %v1785_v2  ;;  %v1660_v17 = vadd.f32 %v8521_v22, %v8514_v34  ;;  %v8531_v11 = vmax.f32 %v995_v10, 0.0 }
 0x2c8   :  { %v8533_v51 = vpop.eup %6067  ;;  %v2486_v35 = vadd.f32 %v8491_v6, %v8485_v59  ;;  %6087 = vpow2.f32 %v2341_v20  ;;  %v1946_v33 = vadd.f32 %v1914_v63, %v1786_v4  ;;  %v1523_v43 = vmul.f32 1.442695, %v1470_v5 }
 0x2c9   :  { %10961 = vst [vmem:[#allocation31_spill] sm:$0xff] %v8531_v11  ;;  %v6070_v7 = vpop.eup %6069  ;;  %6089 = vpow2.f32 %v2437_v47  ;;  %v2073_v39 = vadd.f32 %v10962_v26, %v1945_v9  ;;  %v1661_v38 = vadd.f32 %v8533_v51, %v8527_v16  ;;  %v1619_v27 = vmul.f32 1.442695, %v1566_v28 }
 0x2ca   :  { %v6072_v2 = vpop.eup %6071  ;;  %v2074_v10 = vadd.f32 %v10963_v45, %v1946_v33  ;;  %6091 = vrcp.f32 %v1659_v29  ;;  %v1183_v60 = vmul.f32 %v6070_v7, %v8461_v24  ;;  %v2612_v8 = vmul.f32 %v8446_v58, %v8253_v50 }
 0x2cb   :  { %v6074_v20 = vpop.eup %6073  ;;  %v2105_v5 = vadd.f32 %v2073_v39, %v7140_v61  ;;  %6093 = vrcp.f32 %v1660_v17  ;;  %v1184_v47 = vmul.f32 %v6072_v2, %v8465_v25  ;;  %v1059_v4 = vsub.f32 %v8531_v11, %v8531_v11  ;;  %v8560_v39 = vpop.permute.xlu0 %1277 }
 0x2cc   :  { %v8548_v63 = vpop.eup %6075  ;;  %v2106_v28 = vadd.f32 %v2074_v10, %v7140_v61  ;;  %6095 = vrcp.f32 %v1661_v38  ;;  %v1215_v29 = vmul.f32 %v1183_v60, %v10902_v21  ;;  %v1185_v24 = vmul.f32 %v6074_v20, %v8470_v30  ;;  %2914 = vperm.xlu0 %5746, %v2612_v8   ;;  %v10964_v8 = vld [vmem:[#allocation53_spill] sm:$0xff]  ;;  %v8574_v20 = vpop.permute.xlu1 %1279 }
 0x2cd   :  { %v2137_v50 = vmax.f32 %v2105_v5, 0.0  ;;  %6097 = vpow2.f32 %v1523_v43  ;;  %v1216_v9 = vmul.f32 %v10907_v0, %v1184_v47  ;;  %v8554_v17 = vmax.f32 %v996_v57, 0.0 }
 0x2ce   :  { %v8556_v25 = vpop.eup %6077  ;;  %v2138_v33 = vmax.f32 %v2106_v28, 0.0  ;;  %6099 = vpow2.f32 %v1619_v27  ;;  %v1343_v7 = vadd.f32 %v8204_v49, %v1215_v29  ;;  %v1217_v26 = vmul.f32 %v1185_v24, %v10919_v44 }
 0x2cf   :  { %v2518_v60 = vadd.f32 %v8548_v63, %v2486_v35  ;;  %v2169_v30 = vmax.f32 %v8265_v40, %v2137_v50  ;;  %v1344_v43 = vadd.f32 %v10964_v8, %v1216_v9  ;;  %v1117_v38 = vmul.f32 1.442695, %v1059_v4  ;;  %v10966_v9 = vld [vmem:[#allocation15_spill] sm:$0xff] }
 0x2d0   :  { %v2170_v57 = vmax.f32 %v8269_v62, %v2138_v33  ;;  %v1375_v2 = vadd.f32 %v1343_v7, %v7140_v61  ;;  %v1345_v45 = vadd.f32 %v8359_v41, %v1217_v26  ;;  %6101 = vrcp.f32 %v8479_v56 }
 0x2d1   :  { %v8569_v49 = vpop.eup %6079  ;;  %v2201_v27 = vsub.f32 %v7912_v19, %v2169_v30  ;;  %v2297_v10 = vsub.f32 %v8247_v52, %v2169_v30  ;;  %v2393_v35 = vsub.f32 %v2137_v50, %v2169_v30  ;;  %v1376_v40 = vadd.f32 %v1344_v43, %v7140_v61 }
 0x2d2   :  { %v8576_v5 = vpop.eup %6081  ;;  %v2202_v62 = vsub.f32 %v10909_v55, %v2170_v57  ;;  %v2298_v47 = vsub.f32 %v8249_v1, %v2170_v57  ;;  %v2394_v41 = vsub.f32 %v2138_v33, %v2170_v57  ;;  %v8580_v4 = vmax.f32 %v1375_v2, 0.0  ;;  %v8594_v55 = vpop.permute.xlu0 %1853 }
 0x2d3   :  { %v8582_v28 = vpop.eup %6083  ;;  %6103 = vrcp.f32 %v2518_v60  ;;  %v2488_v19 = vadd.f32 %v8576_v5, %v8569_v49  ;;  %v2249_v52 = vmul.f32 1.442695, %v2201_v27  ;;  %10967 = vst [vmem:[#allocation29_spill] sm:$0xff] %v8594_v55  ;;  %v8598_v60 = vmax.f32 %v1376_v40, 0.0 }
 0x2d4   :  { %10965 = vst [vmem:[#allocation35_spill] sm:$0xff] %v8580_v4  ;;  %v8586_v29 = vpop.eup %6085  ;;  %v2251_v24 = vmul.f32 1.442695, %v2202_v62  ;;  %v2347_v50 = vmul.f32 1.442695, %v2298_v47  ;;  %v8590_v7 = vmax.f32 %v10966_v9, %v8580_v4  ;;  %v1377_v30 = vadd.f32 %v1345_v45, %v7140_v61 }
 0x2d5   :  { %v8596_v33 = vpop.eup %6087  ;;  %v2443_v26 = vmul.f32 1.442695, %v2394_v41  ;;  %6105 = vpow2.f32 %v1117_v38  ;;  %v2345_v43 = vmul.f32 1.442695, %v2297_v10  ;;  %v2441_v57 = vmul.f32 1.442695, %v2393_v35  ;;  %v8612_v38 = vpop.permute.xlu1 %2015 }
 0x2d6   :  { %v8601_v8 = vpop.eup %6089  ;;  %6107 = vpow2.f32 %v2251_v24  ;;  %v1471_v2 = vsub.f32 %v10966_v9, %v8590_v7  ;;  %v8606_v62 = vadd.f32 %v8582_v28, %v2488_v19  ;;  %v2487_v47 = vadd.f32 %v8596_v33, %v8586_v29  ;;  %10968 = vst [vmem:[#allocation6_spill] sm:$0xff] %v8612_v38  ;;  %v10970_v38 = vld [vmem:[#allocation7_spill] sm:$0xff]  ;;  %v8629_v44 = vpop.permute.xlu0 %1859 }
 0x2d7   :  { %v6092_v27 = vpop.eup %6091  ;;  %6109 = vpow2.f32 %v2249_v52  ;;  %v1567_v45 = vsub.f32 %v8580_v4, %v8590_v7  ;;  %v8618_v41 = vmax.f32 %v8292_v42, %v8598_v60  ;;  %v8622_v1 = vmax.f32 %v1377_v30, 0.0  ;;  %10971 = vst [vmem:[#allocation52_spill] sm:$0xff] %v8629_v44 }
 0x2d8   :  { %v6094_v40 = vpop.eup %6093  ;;  %6111 = vpow2.f32 %v2347_v50  ;;  %v1755_v10 = vmul.f32 %v6092_v27, %v8509_v54  ;;  %v1723_v35 = vmul.f32 %v6092_v27, %v8501_v14  ;;  %v1525_v27 = vmul.f32 1.442695, %v1471_v2 }
 0x2d9   :  { %v6096_v19 = vpop.eup %6095  ;;  %6113 = vpow2.f32 %v2443_v26  ;;  %v1724_v24 = vmul.f32 %v6094_v40, %v8514_v34  ;;  %v1756_v52 = vmul.f32 %v6094_v40, %v8521_v22  ;;  %10969 = vst [vmem:[#allocation5_spill] sm:$0xff] %v8622_v1  ;;  %v10972_v26 = vld [vmem:[#allocation60_spill] sm:$0xff]  ;;  %v2519_v40 = vadd.f32 %v8601_v8, %v2487_v47  ;;  %v8641_v44 = vpop.permute.xlu1 %2013 }
 0x2da   :  { %v8624_v55 = vpop.eup %6097  ;;  %v1915_v50 = vmul.f32 %v10970_v38, %v1755_v10  ;;  %v1787_v54 = vmul.f32 %v1723_v35, %v10922_v13  ;;  %v1757_v14 = vmul.f32 %v6096_v19, %v8533_v51  ;;  %6115 = vpow2.f32 %v2345_v43  ;;  %v10973_v38 = vld [vmem:[#allocation9_spill] sm:$0xff]  ;;  %10974 = vst [vmem:[#allocation13_spill] sm:$0xff] %v8641_v44 }
 0x2db   :  { %v8631_v11 = vpop.eup %6099  ;;  %v1788_v34 = vmul.f32 %v10860_v53, %v1724_v24  ;;  %v1916_v22 = vmul.f32 %v10972_v26, %v1756_v52  ;;  %v1725_v30 = vmul.f32 %v6096_v19, %v8527_v16  ;;  %6117 = vpow2.f32 %v2441_v57  ;;  %v10975_v53 = vld [vmem:[#allocation42_spill] sm:$0xff]  ;;  %v10976_v19 = vld [vmem:[#allocation37_spill] sm:$0xff] }
 0x2dc   :  { %v1947_v4 = vadd.f32 %v1915_v50, %v1787_v54  ;;  %v1917_v10 = vmul.f32 %v10973_v38, %v1757_v14  ;;  %v1662_v13 = vadd.f32 %v8631_v11, %v8624_v55  ;;  %v1621_v43 = vmul.f32 1.442695, %v1567_v45 }
 0x2dd   :  { %v6102_v51 = vpop.eup %6101  ;;  %v1948_v2 = vadd.f32 %v1916_v22, %v1788_v34  ;;  %v1789_v35 = vmul.f32 %v1725_v30, %v10865_v48  ;;  %v1472_v16 = vsub.f32 %v8292_v42, %v8618_v41  ;;  %v1568_v47 = vsub.f32 %v8598_v60, %v8618_v41  ;;  %v897_v34 = vpop.permute.xlu0 %896  ;;  %v10977_v22 = vld [vmem:[#allocation38_spill] sm:$0xff] }
 0x2de   :  { %v2075_v24 = vadd.f32 %v10975_v53, %v1947_v4  ;;  %6119 = vrcp.f32 %v1662_v13  ;;  %v8651_v57 = vmax.f32 %v8346_v12, %v8622_v1  ;;  %v1186_v14 = vmul.f32 %v6102_v51, %v8479_v56 }
 0x2df   :  { %v2076_v52 = vadd.f32 %v10976_v19, %v1948_v2  ;;  %v1949_v50 = vadd.f32 %v1917_v10, %v1789_v35  ;;  %6121 = vpow2.f32 %v1525_v27  ;;  %v1527_v4 = vmul.f32 1.442695, %v1472_v16 }
 0x2e0   :  { %v8653_v48 = vpop.eup %6103  ;;  %v2107_v45 = vadd.f32 %v2075_v24, %v7140_v61  ;;  %v1623_v54 = vmul.f32 1.442695, %v1568_v47  ;;  %6123 = vpow2.f32 %v1621_v43  ;;  %v1473_v27 = vsub.f32 %v8346_v12, %v8651_v57  ;;  %v8670_v43 = vpop.permute.xlu1 %898 }
 0x2e1   :  { %v2108_v26 = vadd.f32 %v2076_v52, %v7140_v61  ;;  %v2077_v30 = vadd.f32 %v10977_v22, %v1949_v50  ;;  %6125 = vpow2.f32 %v1527_v4  ;;  %v1218_v13 = vmul.f32 %v10920_v46, %v1186_v14 }
 0x2e2   :  { %v8661_v38 = vpop.eup %6105  ;;  %v2139_v10 = vmax.f32 %v2107_v45, 0.0  ;;  %v10978_v2 = vsub.f32 %v8554_v17, %v8554_v17  ;;  %6127 = vpow2.f32 %v1623_v54  ;;  %v1529_v47 = vmul.f32 1.442695, %v1473_v27 }
 0x2e3   :  { %v8667_v56 = vpop.eup %6107  ;;  %v2140_v51 = vmax.f32 %v2108_v26, 0.0  ;;  %v2109_v53 = vadd.f32 %v2077_v30, %v7140_v61  ;;  %6129 = vrcp.f32 %v8606_v62  ;;  %v1346_v45 = vadd.f32 %v8365_v3, %v1218_v13 }
 0x2e4   :  { %v1119_v35 = vmul.f32 1.442695, %v10978_v2  ;;  %v8672_v24 = vpop.eup %6109  ;;  %v2171_v16 = vmax.f32 %v8390_v23, %v2139_v10  ;;  %6131 = vrcp.f32 %v2519_v40  ;;  %v8686_v23 = vpop.permute.xlu0 %1281  ;;  %v10980_v40 = vld [vmem:[#allocation49_spill] sm:$0xff]  ;;  %v10981_v2 = vld [vmem:[#allocation54_spill] sm:$0xff] }
 0x2e5   :  { %v8676_v19 = vpop.eup %6111  ;;  %v2172_v52 = vmax.f32 %v8412_v18, %v2140_v51  ;;  %v2141_v50 = vmax.f32 %v2109_v53, 0.0  ;;  %10979 = vst [vmem:[#allocation47_spill] sm:$0xff] %v8686_v23  ;;  %v8699_v44 = vpop.permute.xlu1 %1283  ;;  %v1378_v23 = vadd.f32 %v1346_v45, %v7140_v61  ;;  %v10986_v45 = vld [vmem:[#allocation14_spill] sm:$0xff] }
 0x2e6   :  { %v8680_v4 = vpop.eup %6113  ;;  %v2490_v54 = vadd.f32 %v8676_v19, %v8667_v56  ;;  %v2203_v14 = vsub.f32 %v7975_v32, %v2171_v16  ;;  %v2299_v62 = vsub.f32 %v8378_v36, %v2171_v16  ;;  %6133 = vpow2.f32 %v1119_v35  ;;  %10982 = vst [vmem:[#allocation30_spill] sm:$0xff] %v8699_v44  ;;  %v10987_v44 = vld [vmem:[#allocation64_spill] sm:$0xff] }
 0x2e7   :  { %v2204_v26 = vsub.f32 %v8063_v15, %v2172_v52  ;;  %v2300_v22 = vsub.f32 %v10980_v40, %v2172_v52  ;;  %v2396_v18 = vsub.f32 %v2140_v51, %v2172_v52  ;;  %v2173_v30 = vmax.f32 %v8424_v37, %v2141_v50  ;;  %v8691_v3 = vpop.eup %6115  ;;  %v10983_v40 = vld [vmem:[#allocation17_spill] sm:$0xff] }
 0x2e8   :  { %v2522_v27 = vadd.f32 %v8680_v4, %v2490_v54  ;;  %v2395_v13 = vsub.f32 %v2139_v10, %v2171_v16  ;;  %6135 = vpow2.f32 %v1529_v47  ;;  %v8695_v32 = vadd.f32 %v897_v34, %v10981_v2  ;;  %v8701_v51 = vpop.eup %6117  ;;  %v10984_v34 = vld [vmem:[#allocation63_spill] sm:$0xff] }
 0x2e9   :  { %v2489_v36 = vadd.f32 %v8691_v3, %v8672_v24  ;;  %v2255_v35 = vmul.f32 1.442695, %v2204_v26  ;;  %v2351_v53 = vmul.f32 1.442695, %v2300_v22  ;;  %v2253_v15 = vmul.f32 1.442695, %v2203_v14 }
 0x2ea   :  { %6137 = vrcp.f32 %v2522_v27  ;;  %v2447_v37 = vmul.f32 1.442695, %v2396_v18  ;;  %v2349_v52 = vmul.f32 1.442695, %v2299_v62  ;;  %v2205_v54 = vsub.f32 %v10983_v40, %v2173_v30  ;;  %v8711_v18 = vpop.permute.xlu0 %1857 }
 0x2eb   :  { %v6120_v10 = vpop.eup %6119  ;;  %v2521_v16 = vadd.f32 %v8701_v51, %v2489_v36  ;;  %6139 = vpow2.f32 %v2255_v35  ;;  %v2301_v47 = vsub.f32 %v10984_v34, %v2173_v30  ;;  %v2397_v27 = vsub.f32 %v2141_v50, %v2173_v30  ;;  %10985 = vst [vmem:[#allocation59_spill] sm:$0xff] %v8711_v18  ;;  %v10989_v50 = vld [vmem:[#allocation25_spill] sm:$0xff] }
 0x2ec   :  { %v8707_v26 = vpop.eup %6121  ;;  %6141 = vpow2.f32 %v2351_v53  ;;  %v1726_v14 = vmul.f32 %v6120_v10, %v8624_v55  ;;  %v1758_v22 = vmul.f32 %v6120_v10, %v8631_v11  ;;  %v2445_v62 = vmul.f32 1.442695, %v2395_v13  ;;  %v10990_v30 = vld [vmem:[#allocation65_spill] sm:$0xff] }
 0x2ed   :  { %6143 = vrcp.f32 %v2521_v16  ;;  %v2257_v40 = vmul.f32 1.442695, %v2205_v54  ;;  %v1569_v36 = vsub.f32 %v8622_v1, %v8651_v57  ;;  %v8715_v35 = vpop.eup %6123  ;;  %v8719_v2 = vmax.f32 %v1378_v23, 0.0  ;;  %v10991_v54 = vld [vmem:[#allocation50_spill] sm:$0xff]  ;;  %v8727_v16 = vpop.permute.xlu1 %2017 }
 0x2ee   :  { %6145 = vpow2.f32 %v2447_v37  ;;  %v1790_v34 = vmul.f32 %v10986_v45, %v1726_v14  ;;  %v1918_v53 = vmul.f32 %v10987_v44, %v1758_v22  ;;  %v8721_v55 = vpop.eup %6125  ;;  %v2353_v11 = vmul.f32 1.442695, %v2301_v47  ;;  %10992 = vst [vmem:[#allocation11_spill] sm:$0xff] %v8727_v16  ;;  %v10993_v44 = vld [vmem:[#allocation61_spill] sm:$0xff] }
 0x2ef   :  { %10988 = vst [vmem:[#allocation56_spill] sm:$0xff] %v8719_v2  ;;  %6147 = vpow2.f32 %v2253_v15  ;;  %v2611_v13 = vmul.f32 %v10990_v30, %v10989_v50  ;;  %v2644_v10 = vmul.f32 %v8446_v58, %v10991_v54  ;;  %v8729_v18 = vpop.eup %6127  ;;  %v2449_v14 = vmul.f32 1.442695, %v2397_v27  ;;  %v10995_v54 = vld [vmem:[#allocation51_spill] sm:$0xff]  ;;  %v10997_v16 = vld [vmem:[#allocation57_spill] sm:$0xff] }
 0x2f0   :  { %6149 = vpow2.f32 %v2349_v52  ;;  %v1950_v37 = vadd.f32 %v1918_v53, %v1790_v34  ;;  %v8733_v23 = vmax.f32 %v10993_v44, %v8719_v2  ;;  %v8735_v22 = vpop.eup %6129  ;;  %v1663_v15 = vadd.f32 %v8715_v35, %v8707_v26  ;;  %v10994_v52 = vld [vmem:[#allocation43_spill] sm:$0xff]  ;;  %v901_v53 = vpop.permute.xlu0 %900 }
 0x2f1   :  { %6151 = vpow2.f32 %v2445_v62  ;;  %v1664_v58 = vadd.f32 %v8729_v18, %v8721_v55  ;;  %v1625_v47 = vmul.f32 1.442695, %v1569_v36  ;;  %2909 = vperm.xlu1 %5745, %v2611_v13   ;;  %3106 = vperm.xlu0 %5746, %v2644_v10   ;;  %v8741_v45 = vpop.eup %6131  ;;  %v965_v36 = vadd.f32 %v10995_v54, %v8670_v43  ;;  %v10996_v13 = vld [vmem:[#allocation21_spill] sm:$0xff]  ;;  %v10998_v43 = vld [vmem:[#allocation10_spill] sm:$0xff] }
 0x2f2   :  { %v2078_v27 = vadd.f32 %v10994_v52, %v1950_v37  ;;  %6153 = vpow2.f32 %v2257_v40  ;;  %v1474_v34 = vsub.f32 %v10993_v44, %v8733_v23  ;;  %v1570_v62 = vsub.f32 %v8719_v2, %v8733_v23  ;;  %v903_v44 = vpop.permute.xlu1 %902 }
 0x2f3   :  { %v8748_v50 = vpop.eup %6133  ;;  %6155 = vpow2.f32 %v2353_v11  ;;  %v2643_v10 = vmul.f32 %v10990_v30, %v10996_v13  ;;  %v2579_v37 = vmul.f32 %v10990_v30, %v10997_v16  ;;  %v997_v11 = vadd.f32 %v7140_v61, %v8695_v32 }
 0x2f4   :  { %v2110_v40 = vadd.f32 %v2078_v27, %v7140_v61  ;;  %6157 = vpow2.f32 %v2449_v14  ;;  %v1531_v52 = vmul.f32 1.442695, %v1474_v34  ;;  %v1627_v2 = vmul.f32 1.442695, %v1570_v62  ;;  %v10999_v34 = vld [vmem:[#allocation58_spill] sm:$0xff] }
 0x2f5   :  { %v8757_v1 = vpop.eup %6135  ;;  %6159 = vrcp.f32 %v1663_v15  ;;  %3101 = vperm.xlu1 %5745, %v2643_v10   ;;  %2717 = vperm.xlu0 %5746, %v2579_v37   ;;  %v966_v54 = vadd.f32 %v901_v53, %v10998_v43  ;;  %v2582_v30 = vmul.f32 %v8653_v48, %v8485_v59  ;;  %v2614_v16 = vmul.f32 %v8653_v48, %v8491_v6 }
 0x2f6   :  { %v2142_v13 = vmax.f32 %v2110_v40, 0.0  ;;  %6161 = vrcp.f32 %v1664_v58  ;;  %v998_v15 = vadd.f32 %v7140_v61, %v965_v36  ;;  %v967_v62 = vadd.f32 %v10999_v34, %v903_v44  ;;  %v11001_v36 = vld [vmem:[#allocation62_spill] sm:$0xff] }
 0x2f7   :  { %v8766_v14 = vpop.eup %6137  ;;  %6163 = vpow2.f32 %v1625_v47  ;;  %v8775_v58 = vmax.f32 %v997_v11, 0.0  ;;  %v999_v59 = vadd.f32 %v7140_v61, %v966_v54  ;;  %v2646_v11 = vmul.f32 %v8653_v48, %v8548_v63 }
 0x2f8   :  { %v8769_v27 = vpop.eup %6139  ;;  %v2174_v32 = vmax.f32 %v8507_v31, %v2142_v13  ;;  %6165 = vpow2.f32 %v1531_v52  ;;  %v11002_v31 = vld [vmem:[#allocation26_spill] sm:$0xff]  ;;  %v11004_v52 = vld [vmem:[#allocation8_spill] sm:$0xff] }
 0x2f9   :  { %v8773_v53 = vpop.eup %6141  ;;  %6167 = vpow2.f32 %v1627_v2  ;;  %11000 = vst [vmem:[#allocation18_spill] sm:$0xff] %v8775_v58  ;;  %2732 = vperm.xlu1 %5745, %v2582_v30   ;;  %2924 = vperm.xlu0 %5746, %v2614_v16   ;;  %v8787_v2 = vmax.f32 %v998_v15, 0.0  ;;  %v2613_v54 = vmul.f32 %v8556_v25, %v11004_v52  ;;  %v8800_v15 = vmax.f32 %v999_v59, 0.0  ;;  %v11009_v59 = vld [vmem:[#allocation22_spill] sm:$0xff] }
 0x2fa   :  { %v8778_v6 = vpop.eup %6143  ;;  %v2492_v47 = vadd.f32 %v8773_v53, %v8769_v27  ;;  %v2206_v10 = vsub.f32 %v11001_v36, %v2174_v32  ;;  %v2302_v37 = vsub.f32 %v11002_v31, %v2174_v32  ;;  %v2398_v40 = vsub.f32 %v2142_v13, %v2174_v32 }
 0x2fb   :  { %v8784_v44 = vpop.eup %6145  ;;  %6169 = vrcp.f32 %v8661_v38  ;;  %11003 = vst [vmem:[#allocation34_spill] sm:$0xff] %v8787_v2  ;;  %v1000_v13 = vadd.f32 %v7140_v61, %v967_v62  ;;  %11006 = vst [vmem:[#allocation48_spill] sm:$0xff] %v8800_v15  ;;  %v1061_v48 = vsub.f32 %v8775_v58, %v8775_v58  ;;  %v1062_v62 = vsub.f32 %v8787_v2, %v8787_v2 }
 0x2fc   :  { %v8793_v30 = vpop.eup %6147  ;;  %v2524_v16 = vadd.f32 %v8784_v44, %v2492_v47  ;;  %v2259_v36 = vmul.f32 1.442695, %v2206_v10  ;;  %v2355_v34 = vmul.f32 1.442695, %v2302_v37  ;;  %6171 = vrcp.f32 %v8748_v50  ;;  %v11008_v10 = vld [vmem:[#allocation24_spill] sm:$0xff] }
 0x2fd   :  { %11005 = vst [vmem:[#allocation27_spill] sm:$0xff] %v8793_v30  ;;  %v8797_v32 = vpop.eup %6149  ;;  %2919 = vperm.xlu1 %5745, %v2613_v54   ;;  %3116 = vperm.xlu0 %5746, %v2646_v11   ;;  %v2451_v63 = vmul.f32 1.442695, %v2398_v40  ;;  %v2645_v37 = vmul.f32 %v8556_v25, %v11008_v10  ;;  %v2581_v52 = vmul.f32 %v8556_v25, %v11009_v59  ;;  %v8816_v11 = vmax.f32 %v1000_v13, 0.0 }
 0x2fe   :  { %v8802_v31 = vpop.eup %6151  ;;  %6173 = vrcp.f32 %v2524_v16  ;;  %v1063_v16 = vsub.f32 %v8800_v15, %v8800_v15  ;;  %v2616_v10 = vmul.f32 %v8735_v22, %v8576_v5  ;;  %v2491_v25 = vadd.f32 %v8797_v32, %v8793_v30 }
 0x2ff   :  { %v8806_v47 = vpop.eup %6153  ;;  %6175 = vpow2.f32 %v2259_v36  ;;  %11010 = vst [vmem:[#allocation28_spill] sm:$0xff] %v8816_v11  ;;  %v2584_v36 = vmul.f32 %v8735_v22, %v8569_v49  ;;  %v1121_v58 = vmul.f32 1.442695, %v1061_v48  ;;  %v1123_v15 = vmul.f32 1.442695, %v1062_v62 }
 0x300   :  { %11007 = vst [vmem:[#allocation19_spill] sm:$0xff] %v8806_v47  ;;  %v8814_v54 = vpop.eup %6155  ;;  %6177 = vpow2.f32 %v2355_v34  ;;  %v1125_v62 = vmul.f32 1.442695, %v1063_v16  ;;  %v2648_v16 = vmul.f32 %v8735_v22, %v8582_v28  ;;  %v11015_v22 = vld [vmem:[#allocation40_spill] sm:$0xff] }
 0x301   :  { %v8818_v40 = vpop.eup %6157  ;;  %3111 = vperm.xlu1 %5745, %v2645_v37   ;;  %2727 = vperm.xlu0 %5746, %v2581_v52   ;;  %6179 = vpow2.f32 %v2451_v63  ;;  %v8830_v37 = vpop.permute.xlu0 %1285  ;;  %v2493_v49 = vadd.f32 %v8814_v54, %v8806_v47  ;;  %v1064_v63 = vsub.f32 %v8816_v11, %v8816_v11  ;;  %v2615_v47 = vmul.f32 %v8741_v45, %v8596_v33  ;;  %v11014_v33 = vld [vmem:[#allocation39_spill] sm:$0xff] }
 0x302   :  { %v6160_v2 = vpop.eup %6159  ;;  %11011 = vst [vmem:[#allocation23_spill] sm:$0xff] %v8830_v37 }
 0x303   :  { %v6162_v34 = vpop.eup %6161  ;;  %v1759_v13 = vmul.f32 %v6160_v2, %v8715_v35  ;;  %v1727_v59 = vmul.f32 %v6160_v2, %v8707_v26  ;;  %v11012_v35 = vld [vmem:[#allocation16_spill] sm:$0xff] }
 0x304   :  { %v8832_v52 = vpop.eup %6163  ;;  %v1728_v5 = vmul.f32 %v6162_v34, %v8721_v55  ;;  %v1760_v43 = vmul.f32 %v6162_v34, %v8729_v18  ;;  %v2523_v55 = vadd.f32 %v8802_v31, %v2491_v25  ;;  %v11013_v34 = vld [vmem:[#allocation33_spill] sm:$0xff]  ;;  %v2647_v25 = vmul.f32 %v8741_v45, %v8601_v8 }
 0x305   :  { %v8840_v30 = vpop.eup %6165  ;;  %v1919_v26 = vmul.f32 %v11012_v35, %v1759_v13  ;;  %v1791_v2 = vmul.f32 %v1727_v59, %v10902_v21  ;;  %v1665_v48 = vadd.f32 %v8832_v52, %v8757_v1  ;;  %2742 = vperm.xlu1 %5745, %v2584_v36   ;;  %2934 = vperm.xlu0 %5746, %v2616_v10   ;;  %v1127_v59 = vmul.f32 1.442695, %v1064_v63  ;;  %v11016_v63 = vld [vmem:[#allocation46_spill] sm:$0xff] }
 0x306   :  { %v8846_v37 = vpop.eup %6167  ;;  %v1792_v18 = vmul.f32 %v10907_v0, %v1728_v5  ;;  %v1920_v11 = vmul.f32 %v11013_v34, %v1760_v43  ;;  %v2583_v0 = vmul.f32 %v8741_v45, %v8586_v29  ;;  %v2525_v43 = vadd.f32 %v8818_v40, %v2493_v49 }
 0x307   :  { %v1951_v13 = vadd.f32 %v1919_v26, %v1791_v2  ;;  %6181 = vrcp.f32 %v1665_v48  ;;  %v1666_v21 = vadd.f32 %v8846_v37, %v8840_v30  ;;  %v8864_v26 = vpop.permute.xlu0 %1861  ;;  %v2586_v8 = vmul.f32 %v8766_v14, %v8667_v56 }
 0x308   :  { %v6170_v36 = vpop.eup %6169  ;;  %v1952_v10 = vadd.f32 %v1920_v11, %v1792_v18  ;;  %v2618_v29 = vmul.f32 %v8766_v14, %v8676_v19  ;;  %v2617_v56 = vmul.f32 %v8778_v6, %v8691_v3  ;;  %v2650_v19 = vmul.f32 %v8766_v14, %v8680_v4 }
 0x309   :  { %v2079_v5 = vadd.f32 %v11014_v33, %v1951_v13  ;;  %6183 = vrcp.f32 %v1666_v21  ;;  %v1187_v35 = vmul.f32 %v6170_v36, %v8661_v38  ;;  %2929 = vperm.xlu1 %5745, %v2615_v47   ;;  %3126 = vperm.xlu0 %5746, %v2648_v16   ;;  %v6172_v28 = vpop.eup %6171  ;;  %v11017_v13 = vld [vmem:[#allocation44_spill] sm:$0xff]  ;;  %v2649_v3 = vmul.f32 %v8778_v6, %v8701_v51 }
 0x30a   :  { %6185 = vrcp.f32 %v2523_v55  ;;  %v2080_v11 = vadd.f32 %v11015_v22, %v1952_v10  ;;  %v1188_v2 = vmul.f32 %v6172_v28, %v8748_v50  ;;  %v2585_v16 = vmul.f32 %v8778_v6, %v8672_v24 }
 0x30b   :  { %v8871_v45 = vpop.eup %6173  ;;  %v2111_v49 = vadd.f32 %v2079_v5, %v7140_v61  ;;  %v1219_v38 = vmul.f32 %v1187_v35, %v11016_v63  ;;  %6187 = vpow2.f32 %v1121_v58 }
 0x30c   :  { %v8876_v47 = vpop.eup %6175  ;;  %v2112_v48 = vadd.f32 %v2080_v11, %v7140_v61  ;;  %6189 = vpow2.f32 %v1123_v15  ;;  %v1220_v50 = vmul.f32 %v11017_v13, %v1188_v2  ;;  %v8904_v51 = vmul.f32 %v8871_v45, %v8769_v27 }
 0x30d   :  { %v8883_v55 = vpop.eup %6177  ;;  %6191 = vrcp.f32 %v2525_v43  ;;  %v2143_v18 = vmax.f32 %v2111_v49, 0.0  ;;  %v1347_v34 = vadd.f32 %v8560_v39, %v1219_v38  ;;  %3121 = vperm.xlu1 %5745, %v2647_v25   ;;  %2737 = vperm.xlu0 %5746, %v2583_v0   ;;  %v8895_v39 = vpop.permute.xlu0 %1863  ;;  %v11018_v25 = vld [vmem:[#allocation35_spill] sm:$0xff]  ;;  %v2620_v24 = vmul.f32 %v8871_v45, %v8773_v53 }
 0x30e   :  { %v2494_v58 = vadd.f32 %v8883_v55, %v8876_v47  ;;  %v2144_v15 = vmax.f32 %v2112_v48, 0.0  ;;  %6193 = vpow2.f32 %v1125_v62  ;;  %v8891_v21 = vpop.eup %6179  ;;  %v1348_v62 = vadd.f32 %v8574_v20, %v1220_v50 }
 0x30f   :  { %v2175_v4 = vmax.f32 %v8590_v7, %v2143_v18  ;;  %v1379_v14 = vadd.f32 %v1347_v34, %v7140_v61  ;;  %6195 = vpow2.f32 %v1127_v59 }
 0x310   :  { %v2526_v36 = vadd.f32 %v8891_v21, %v2494_v58  ;;  %v2176_v10 = vmax.f32 %v8618_v41, %v2144_v15 }
 0x311   :  { %v2207_v7 = vsub.f32 %v10966_v9, %v2175_v4  ;;  %v2303_v0 = vsub.f32 %v11018_v25, %v2175_v4  ;;  %v8908_v59 = vmax.f32 %v1379_v14, 0.0  ;;  %2752 = vperm.xlu1 %5745, %v2586_v8   ;;  %2944 = vperm.xlu0 %5746, %v2618_v29   ;;  %v2399_v43 = vsub.f32 %v2143_v18, %v2175_v4  ;;  %v11019_v9 = vld [vmem:[#allocation31_spill] sm:$0xff]  ;;  %v8923_v29 = vpop.permute.xlu0 %2021 }
 0x312   :  { %v2208_v6 = vsub.f32 %v8292_v42, %v2176_v10  ;;  %v2304_v41 = vsub.f32 %v8598_v60, %v2176_v10  ;;  %v2400_v20 = vsub.f32 %v2144_v15, %v2176_v10  ;;  %6197 = vrcp.f32 %v2526_v36  ;;  %v11022_v10 = vld [vmem:[#allocation41_spill] sm:$0xff] }
 0x313   :  { %v2261_v27 = vmul.f32 1.442695, %v2207_v7  ;;  %v2357_v33 = vmul.f32 1.442695, %v2303_v0  ;;  %v8916_v5 = vmax.f32 %v11019_v9, %v8908_v59  ;;  %v1380_v8 = vadd.f32 %v1348_v62, %v7140_v61 }
 0x314   :  { %v6182_v35 = vpop.eup %6181  ;;  %v2263_v28 = vmul.f32 1.442695, %v2208_v6  ;;  %v2359_v22 = vmul.f32 1.442695, %v2304_v41  ;;  %v2455_v11 = vmul.f32 1.442695, %v2400_v20 }
 0x315   :  { %6199 = vpow2.f32 %v2261_v27  ;;  %v1761_v42 = vmul.f32 %v6182_v35, %v8832_v52  ;;  %v1729_v60 = vmul.f32 %v6182_v35, %v8757_v1  ;;  %v1475_v53 = vsub.f32 %v11019_v9, %v8916_v5  ;;  %2939 = vperm.xlu1 %5745, %v2617_v56   ;;  %3136 = vperm.xlu0 %5746, %v2650_v19   ;;  %v11020_v52 = vld [vmem:[#allocation45_spill] sm:$0xff]  ;;  %v11021_v56 = vld [vmem:[#allocation36_spill] sm:$0xff] }
 0x316   :  { %v6184_v49 = vpop.eup %6183  ;;  %6201 = vpow2.f32 %v2263_v28  ;;  %v2453_v38 = vmul.f32 1.442695, %v2399_v43  ;;  %v1571_v2 = vsub.f32 %v8908_v59, %v8916_v5  ;;  %v8927_v48 = vmax.f32 %v1380_v8, 0.0  ;;  %v11024_v43 = vld [vmem:[#allocation12_spill] sm:$0xff] }
 0x317   :  { %v6186_v18 = vpop.eup %6185  ;;  %6203 = vpow2.f32 %v2359_v22  ;;  %v1921_v34 = vmul.f32 %v11020_v52, %v1761_v42  ;;  %v1730_v1 = vmul.f32 %v6184_v49, %v8840_v30  ;;  %v1762_v50 = vmul.f32 %v6184_v49, %v8846_v37  ;;  %v8943_v30 = vpop.permute.xlu0 %3056  ;;  %v11027_v52 = vld [vmem:[#allocation27_spill] sm:$0xff] }
 0x318   :  { %v8932_v58 = vpop.eup %6187  ;;  %6205 = vpow2.f32 %v2455_v11  ;;  %v1793_v19 = vmul.f32 %v1729_v60, %v11021_v56  ;;  %v1533_v15 = vmul.f32 1.442695, %v1475_v53  ;;  %v1629_v4 = vmul.f32 1.442695, %v1571_v2  ;;  %11023 = vst [vmem:[#allocation20_spill] sm:$0xff] %v8943_v30  ;;  %v11028_v56 = vld [vmem:[#allocation61_spill] sm:$0xff] }
 0x319   :  { %v8935_v14 = vpop.eup %6189  ;;  %6207 = vpow2.f32 %v2357_v33  ;;  %v1794_v36 = vmul.f32 %v10920_v46, %v1730_v1  ;;  %v1922_v62 = vmul.f32 %v11022_v10, %v1762_v50  ;;  %v8941_v7 = vmax.f32 %v8554_v17, %v8927_v48  ;;  %3131 = vperm.xlu1 %5745, %v2649_v3   ;;  %2747 = vperm.xlu0 %5746, %v2585_v16   ;;  %v11025_v3 = vld [vmem:[#allocation32_spill] sm:$0xff]  ;;  %v11031_v10 = vld [vmem:[#allocation5_spill] sm:$0xff] }
 0x31a   :  { %v8945_v37 = vpop.eup %6191  ;;  %6209 = vpow2.f32 %v2453_v38  ;;  %v1953_v25 = vadd.f32 %v1921_v34, %v1793_v19  ;;  %v2619_v8 = vmul.f32 %v6186_v18, %v8797_v32  ;;  %v2652_v42 = vmul.f32 %v8871_v45, %v8784_v44 }
 0x31b   :  { %v8947_v0 = vpop.eup %6193  ;;  %v1954_v6 = vadd.f32 %v1922_v62, %v1794_v36  ;;  %6211 = vpow2.f32 %v1533_v15  ;;  %v1476_v46 = vsub.f32 %v8554_v17, %v8941_v7  ;;  %v1572_v41 = vsub.f32 %v8927_v48, %v8941_v7  ;;  %v8962_v11 = vpop.permute.xlu0 %2672  ;;  %v11029_v15 = vld [vmem:[#allocation56_spill] sm:$0xff] }
 0x31c   :  { %v8953_v20 = vpop.eup %6195  ;;  %v2081_v27 = vadd.f32 %v11024_v43, %v1953_v25  ;;  %6213 = vpow2.f32 %v1629_v4  ;;  %11026 = vst [vmem:[#allocation53_spill] sm:$0xff] %v8962_v11  ;;  %v2651_v44 = vmul.f32 %v6186_v18, %v8802_v31  ;;  %v2587_v34 = vmul.f32 %v6186_v18, %v11027_v52  ;;  %v1288_v43 = vpop.permute.xlu1 %1287 }
 0x31d   :  { %v2082_v16 = vadd.f32 %v11025_v3, %v1954_v6  ;;  %v1535_v33 = vmul.f32 1.442695, %v1476_v46  ;;  %v1631_v35 = vmul.f32 1.442695, %v1572_v41  ;;  %6215 = vrcp.f32 %v8932_v58  ;;  %2762 = vperm.xlu1 %5745, %v8904_v51   ;;  %2954 = vperm.xlu0 %5746, %v2620_v24  }
 0x31e   :  { %v2113_v28 = vadd.f32 %v2081_v27, %v7140_v61  ;;  %6217 = vrcp.f32 %v8935_v14 }
 0x31f   :  { %v2114_v22 = vadd.f32 %v2082_v16, %v7140_v61  ;;  %6219 = vpow2.f32 %v1535_v33  ;;  %v6198_v60 = vpop.eup %6197  ;;  %v8987_v36 = vpop.permute.xlu0 %2859 }
 0x320   :  { %v2145_v53 = vmax.f32 %v2113_v28, 0.0  ;;  %6221 = vpow2.f32 %v1631_v35  ;;  %v2590_v1 = vmul.f32 %v6198_v60, %v8876_v47  ;;  %11030 = vst [vmem:[#allocation15_spill] sm:$0xff] %v8987_v36  ;;  %v2622_v47 = vmul.f32 %v6198_v60, %v8883_v55 }
 0x321   :  { %v2146_v49 = vmax.f32 %v2114_v22, 0.0  ;;  %6223 = vrcp.f32 %v8947_v0  ;;  %2949 = vperm.xlu1 %5745, %v2619_v8   ;;  %3146 = vperm.xlu0 %5746, %v2652_v42  }
 0x322   :  { %v8968_v51 = vpop.eup %6199  ;;  %v2177_v24 = vmax.f32 %v8651_v57, %v2145_v53  ;;  %6225 = vrcp.f32 %v8953_v20 }
 0x323   :  { %v8972_v38 = vpop.eup %6201  ;;  %v2178_v32 = vmax.f32 %v8733_v23, %v2146_v49 }
 0x324   :  { %v8976_v45 = vpop.eup %6203  ;;  %v2209_v2 = vsub.f32 %v8346_v12, %v2177_v24  ;;  %v2305_v18 = vsub.f32 %v11031_v10, %v2177_v24  ;;  %v2401_v41 = vsub.f32 %v2145_v53, %v2177_v24  ;;  %v9004_v53 = vpop.permute.xlu0 %2667 }
 0x325   :  { %v8981_v50 = vpop.eup %6205  ;;  %v2496_v57 = vadd.f32 %v8976_v45, %v8972_v38  ;;  %v2210_v19 = vsub.f32 %v11028_v56, %v2178_v32  ;;  %v2306_v4 = vsub.f32 %v11029_v15, %v2178_v32  ;;  %v2402_v23 = vsub.f32 %v2146_v49, %v2178_v32  ;;  %3141 = vperm.xlu1 %5745, %v2651_v44   ;;  %v11034_v56 = vld [vmem:[#allocation51_spill] sm:$0xff] }
 0x326   :  { %v8989_v31 = vpop.eup %6207  ;;  %v2265_v12 = vmul.f32 1.442695, %v2209_v2  ;;  %2757 = vperm.xlu0 %5746, %v2587_v34   ;;  %v2361_v28 = vmul.f32 1.442695, %v2305_v18  ;;  %v2457_v8 = vmul.f32 1.442695, %v2401_v41  ;;  %v2621_v49 = vmul.f32 %v8945_v37, %v8814_v54 }
 0x327   :  { %v8993_v62 = vpop.eup %6209  ;;  %v2528_v25 = vadd.f32 %v8981_v50, %v2496_v57  ;;  %v2495_v6 = vadd.f32 %v8989_v31, %v8968_v51  ;;  %v2267_v46 = vmul.f32 1.442695, %v2210_v19  ;;  %v2363_v3 = vmul.f32 1.442695, %v2306_v4  ;;  %11032 = vst [vmem:[#allocation7_spill] sm:$0xff] %v9004_v53  ;;  %v11033_v34 = vld [vmem:[#allocation54_spill] sm:$0xff] }
 0x328   :  { %v8998_v27 = vpop.eup %6211  ;;  %6227 = vpow2.f32 %v2265_v12  ;;  %v2459_v55 = vmul.f32 1.442695, %v2402_v23  ;;  %v2654_v2 = vmul.f32 %v6198_v60, %v8891_v21  ;;  %v2653_v4 = vmul.f32 %v8945_v37, %v8818_v40  ;;  %v11036_v23 = vld [vmem:[#allocation30_spill] sm:$0xff]  ;;  %v11037_v18 = vld [vmem:[#allocation19_spill] sm:$0xff]  ;;  %v9032_v41 = vpop.permute.xlu0 %2874 }
 0x329   :  { %v9000_v16 = vpop.eup %6213  ;;  %6229 = vrcp.f32 %v2528_v25  ;;  %v2527_v33 = vadd.f32 %v8993_v62, %v2495_v6  ;;  %2772 = vperm.xlu1 %5745, %v2590_v1   ;;  %v9017_v1 = vpop.permute.xlu1 %2019  ;;  %v11038_v6 = vld [vmem:[#allocation10_spill] sm:$0xff]  ;;  %11039 = vst [vmem:[#allocation60_spill] sm:$0xff] %v9032_v41 }
 0x32a   :  { %v6216_v35 = vpop.eup %6215  ;;  %6231 = vpow2.f32 %v2267_v46  ;;  %2964 = vperm.xlu0 %5746, %v2622_v47   ;;  %v1667_v32 = vadd.f32 %v9000_v16, %v8998_v27  ;;  %v2589_v47 = vmul.f32 %v8945_v37, %v11037_v18 }
 0x32b   :  { %v6218_v22 = vpop.eup %6217  ;;  %6233 = vrcp.f32 %v2527_v33  ;;  %v1189_v42 = vmul.f32 %v6216_v35, %v8932_v58 }
 0x32c   :  { %v9008_v24 = vpop.eup %6219  ;;  %6235 = vpow2.f32 %v2363_v3  ;;  %v1190_v44 = vmul.f32 %v6218_v22, %v8935_v14  ;;  %v11035_v14 = vld [vmem:[#allocation47_spill] sm:$0xff]  ;;  %v11040_v3 = vld [vmem:[#allocation58_spill] sm:$0xff] }
 0x32d   :  { %v9014_v52 = vpop.eup %6221  ;;  %6237 = vpow2.f32 %v2459_v55  ;;  %v1221_v58 = vmul.f32 %v1189_v42, %v11033_v34  ;;  %2959 = vperm.xlu1 %5745, %v2621_v49   ;;  %v11041_v55 = vld [vmem:[#allocation23_spill] sm:$0xff]  ;;  %v9039_v35 = vpop.permute.xlu1 %2023 }
 0x32e   :  { %v6224_v57 = vpop.eup %6223  ;;  %6239 = vpow2.f32 %v2361_v28  ;;  %v1668_v54 = vadd.f32 %v9014_v52, %v9008_v24  ;;  %v1222_v19 = vmul.f32 %v11034_v56, %v1190_v44  ;;  %3156 = vperm.xlu0 %5746, %v2654_v2   ;;  %v11043_v44 = vld [vmem:[#allocation34_spill] sm:$0xff] }
 0x32f   :  { %v6226_v15 = vpop.eup %6225  ;;  %6241 = vpow2.f32 %v2457_v8  ;;  %v1349_v21 = vadd.f32 %v11035_v14, %v1221_v58  ;;  %v1191_v60 = vmul.f32 %v6224_v57, %v8947_v0  ;;  %v11042_v8 = vld [vmem:[#allocation18_spill] sm:$0xff]  ;;  %v9065_v14 = vpop.permute.xlu0 %3066 }
 0x330   :  { %6243 = vrcp.f32 %v1667_v32  ;;  %v1350_v12 = vadd.f32 %v11036_v23, %v1222_v19  ;;  %v1192_v10 = vmul.f32 %v6226_v15, %v8953_v20  ;;  %11045 = vst [vmem:[#allocation42_spill] sm:$0xff] %v9065_v14  ;;  %v11050_v14 = vld [vmem:[#allocation29_spill] sm:$0xff] }
 0x331   :  { %6245 = vrcp.f32 %v1668_v54  ;;  %v1381_v25 = vadd.f32 %v1349_v21, %v7140_v61  ;;  %v1223_v46 = vmul.f32 %v1191_v60, %v11038_v6  ;;  %3151 = vperm.xlu1 %5745, %v2653_v4   ;;  %v9063_v15 = vpop.permute.xlu1 %2864 }
 0x332   :  { %v1382_v0 = vadd.f32 %v1350_v12, %v7140_v61  ;;  %v1224_v40 = vmul.f32 %v11040_v3, %v1192_v10  ;;  %2767 = vperm.xlu0 %5746, %v2589_v47   ;;  %11044 = vst [vmem:[#allocation9_spill] sm:$0xff] %v9063_v15 }
 0x333   :  { %v9036_v33 = vmax.f32 %v1381_v25, 0.0  ;;  %v1351_v20 = vadd.f32 %v11041_v55, %v1223_v46  ;;  %v11046_v46 = vld [vmem:[#allocation48_spill] sm:$0xff] }
 0x334   :  { %v9041_v37 = vmax.f32 %v1382_v0, 0.0  ;;  %v1352_v28 = vadd.f32 %v1288_v43, %v1224_v40 }
 0x335   :  { %v9043_v22 = vpop.eup %6227  ;;  %v9047_v42 = vmax.f32 %v11042_v8, %v9036_v33  ;;  %v1383_v49 = vadd.f32 %v1351_v20, %v7140_v61  ;;  %v9106_v36 = vpop.permute.xlu1 %3051 }
 0x336   :  { %v6230_v32 = vpop.eup %6229  ;;  %v9052_v2 = vmax.f32 %v11043_v44, %v9041_v37  ;;  %v1384_v58 = vadd.f32 %v1352_v28, %v7140_v61  ;;  %11048 = vst [vmem:[#allocation37_spill] sm:$0xff] %v9106_v36 }
 0x337   :  { %v9055_v57 = vpop.eup %6231  ;;  %v1477_v43 = vsub.f32 %v11042_v8, %v9047_v42  ;;  %v1573_v54 = vsub.f32 %v9036_v33, %v9047_v42  ;;  %v9061_v19 = vmax.f32 %v1383_v49, 0.0  ;;  %v2592_v21 = vmul.f32 %v6230_v32, %v8972_v38 }
 0x338   :  { %v6234_v60 = vpop.eup %6233  ;;  %v1478_v4 = vsub.f32 %v11043_v44, %v9052_v2  ;;  %v1574_v23 = vsub.f32 %v9041_v37, %v9052_v2  ;;  %v9072_v12 = vmax.f32 %v1384_v58, 0.0  ;;  %v2624_v10 = vmul.f32 %v6230_v32, %v8976_v45  ;;  %v11047_v45 = vld [vmem:[#allocation28_spill] sm:$0xff] }
 0x339   :  { %v9075_v18 = vpop.eup %6235  ;;  %v1537_v47 = vmul.f32 1.442695, %v1477_v43  ;;  %v1633_v25 = vmul.f32 1.442695, %v1573_v54  ;;  %v9079_v0 = vmax.f32 %v11046_v46, %v9061_v19  ;;  %2782 = vperm.xlu1 %5745, %v2592_v21   ;;  %v2623_v38 = vmul.f32 %v6234_v60, %v8989_v31 }
 0x33a   :  { %v9082_v40 = vpop.eup %6237  ;;  %v2498_v55 = vadd.f32 %v9075_v18, %v9055_v57  ;;  %v1539_v20 = vmul.f32 1.442695, %v1478_v4  ;;  %v1635_v28 = vmul.f32 1.442695, %v1574_v23  ;;  %v9088_v49 = vmax.f32 %v11047_v45, %v9072_v12  ;;  %2974 = vperm.xlu0 %5746, %v2624_v10  }
 0x33b   :  { %v9090_v58 = vpop.eup %6239  ;;  %6247 = vpow2.f32 %v1537_v47  ;;  %v1479_v43 = vsub.f32 %v11046_v46, %v9079_v0  ;;  %v1575_v31 = vsub.f32 %v9061_v19, %v9079_v0  ;;  %v2656_v54 = vmul.f32 %v6230_v32, %v8981_v50  ;;  %v9108_v50 = vpop.permute.xlu0 %2682 }
 0x33c   :  { %v9097_v21 = vpop.eup %6241  ;;  %v2530_v4 = vadd.f32 %v9082_v40, %v2498_v55  ;;  %v2497_v23 = vadd.f32 %v9090_v58, %v9043_v22  ;;  %6249 = vpow2.f32 %v1633_v25  ;;  %v1480_v10 = vsub.f32 %v11047_v45, %v9088_v49  ;;  %11049 = vst [vmem:[#allocation38_spill] sm:$0xff] %v9108_v50 }
 0x33d   :  { %v6244_v47 = vpop.eup %6243  ;;  %6251 = vpow2.f32 %v1539_v20  ;;  %v1541_v53 = vmul.f32 1.442695, %v1479_v43  ;;  %v1637_v11 = vmul.f32 1.442695, %v1575_v31  ;;  %v1576_v41 = vsub.f32 %v9072_v12, %v9088_v49  ;;  %2969 = vperm.xlu1 %5745, %v2623_v38  }
 0x33e   :  { %v6246_v32 = vpop.eup %6245  ;;  %6253 = vrcp.f32 %v2530_v4  ;;  %v2529_v55 = vadd.f32 %v9097_v21, %v2497_v23  ;;  %v1763_v25 = vmul.f32 %v6244_v47, %v9000_v16  ;;  %v1731_v15 = vmul.f32 %v6244_v47, %v8998_v27  ;;  %3166 = vperm.xlu0 %5746, %v2656_v54   ;;  %v11051_v23 = vld [vmem:[#allocation55_spill] sm:$0xff]  ;;  %v9119_v16 = vpop.permute.xlu1 %2869 }
 0x33f   :  { %v1732_v20 = vmul.f32 %v6246_v32, %v9008_v24  ;;  %v1764_v43 = vmul.f32 %v6246_v32, %v9014_v52  ;;  %6255 = vpow2.f32 %v1635_v28  ;;  %v1543_v31 = vmul.f32 1.442695, %v1480_v10  ;;  %v9123_v54 = vpop.permute.xlu0 %2677 }
 0x340   :  { %6257 = vrcp.f32 %v2529_v55  ;;  %v1923_v36 = vmul.f32 %v11050_v14, %v1763_v25  ;;  %v1795_v38 = vmul.f32 %v1731_v15, %v11016_v63  ;;  %v1639_v50 = vmul.f32 1.442695, %v1576_v41  ;;  %v11052_v63 = vld [vmem:[#allocation13_spill] sm:$0xff] }
 0x341   :  { %v1796_v4 = vmul.f32 %v11017_v13, %v1732_v20  ;;  %v1924_v30 = vmul.f32 %v11051_v23, %v1764_v43  ;;  %6259 = vpow2.f32 %v1541_v53  ;;  %v2655_v27 = vmul.f32 %v6234_v60, %v8993_v62  ;;  %v11053_v13 = vld [vmem:[#allocation6_spill] sm:$0xff] }
 0x342   :  { %v1955_v24 = vadd.f32 %v1923_v36, %v1795_v38  ;;  %6261 = vpow2.f32 %v1637_v11  ;;  %v2591_v52 = vmul.f32 %v6234_v60, %v8968_v51  ;;  %v9129_v62 = vpop.permute.xlu1 %3061 }
 0x343   :  { %v1956_v28 = vadd.f32 %v1924_v30, %v1796_v4  ;;  %6263 = vpow2.f32 %v1543_v31  ;;  %3161 = vperm.xlu1 %5745, %v2655_v27   ;;  %v9131_v60 = vpop.permute.xlu0 %2884 }
 0x344   :  { %v2083_v41 = vadd.f32 %v11052_v63, %v1955_v24  ;;  %6265 = vpow2.f32 %v1639_v50  ;;  %2777 = vperm.xlu0 %5746, %v2591_v52  }
 0x345   :  { %v2084_v15 = vadd.f32 %v11053_v13, %v1956_v28 }
 0x346   :  { %v2115_v53 = vadd.f32 %v2083_v41, %v7140_v61  ;;  %v9135_v25 = vpop.permute.xlu1 %2692 }
 0x347   :  { %v2116_v14 = vadd.f32 %v2084_v15, %v7140_v61 }
 0x348   :  { %v6248_v11 = vpop.eup %6247  ;;  %v2147_v36 = vmax.f32 %v2115_v53, 0.0 }
 0x349   :  { %v6250_v51 = vpop.eup %6249  ;;  %v2148_v30 = vmax.f32 %v2116_v14, 0.0 }
 0x34a   :  { %v6252_v10 = vpop.eup %6251  ;;  %v2179_v47 = vmax.f32 %v8916_v5, %v2147_v36  ;;  %v1669_v32 = vadd.f32 %v6250_v51, %v6248_v11 }
 0x34b   :  { %v6254_v50 = vpop.eup %6253  ;;  %v2180_v55 = vmax.f32 %v8941_v7, %v2148_v30 }
 0x34c   :  { %v6256_v20 = vpop.eup %6255  ;;  %v2211_v43 = vsub.f32 %v11019_v9, %v2179_v47  ;;  %v2307_v31 = vsub.f32 %v8908_v59, %v2179_v47  ;;  %v2403_v38 = vsub.f32 %v2147_v36, %v2179_v47  ;;  %6267 = vrcp.f32 %v1669_v32  ;;  %v9146_v59 = vpop.permute.xlu0 %3076 }
 0x34d   :  { %v6258_v4 = vpop.eup %6257  ;;  %v2212_v23 = vsub.f32 %v8554_v17, %v2180_v55  ;;  %v2308_v27 = vsub.f32 %v8927_v48, %v2180_v55  ;;  %v2404_v24 = vsub.f32 %v2148_v30, %v2180_v55  ;;  %v1670_v5 = vadd.f32 %v6256_v20, %v6252_v10  ;;  %v9151_v36 = vpop.permute.xlu1 %2879 }
 0x34e   :  { %v9141_v52 = vpop.eup %6259  ;;  %v2269_v28 = vmul.f32 1.442695, %v2211_v43  ;;  %v2594_v7 = vmul.f32 %v6254_v50, %v9055_v57  ;;  %v2365_v17 = vmul.f32 1.442695, %v2307_v31  ;;  %v2626_v48 = vmul.f32 %v6254_v50, %v9075_v18 }
 0x34f   :  { %v9144_v63 = vpop.eup %6261  ;;  %v2271_v41 = vmul.f32 1.442695, %v2212_v23  ;;  %v2367_v9 = vmul.f32 1.442695, %v2308_v27  ;;  %v2463_v13 = vmul.f32 1.442695, %v2404_v24  ;;  %6269 = vrcp.f32 %v1670_v5 }
 0x350   :  { %v9148_v15 = vpop.eup %6263  ;;  %6271 = vpow2.f32 %v2269_v28  ;;  %2792 = vperm.xlu1 %5745, %v2594_v7   ;;  %v2461_v14 = vmul.f32 1.442695, %v2403_v38  ;;  %v1671_v57 = vadd.f32 %v9144_v63, %v9141_v52  ;;  %2984 = vperm.xlu0 %5746, %v2626_v48   ;;  %v2625_v30 = vmul.f32 %v6258_v4, %v9090_v58  ;;  %v9158_v18 = vpop.permute.xlu0 %2687  ;;  %v11054_v24 = vld [vmem:[#allocation59_spill] sm:$0xff] }
 0x351   :  { %v6266_v53 = vpop.eup %6265  ;;  %6273 = vpow2.f32 %v2271_v41  ;;  %v2658_v32 = vmul.f32 %v6254_v50, %v9082_v40  ;;  %v2657_v55 = vmul.f32 %v6258_v4, %v9097_v21  ;;  %v9161_v43 = vpop.permute.xlu1 %3071  ;;  %v2593_v58 = vmul.f32 %v6258_v4, %v9043_v22 }
 0x352   :  { %6275 = vpow2.f32 %v2367_v9  ;;  %v1672_v47 = vadd.f32 %v6266_v53, %v9148_v15 }
 0x353   :  { %6277 = vpow2.f32 %v2463_v13 }
 0x354   :  { %6279 = vpow2.f32 %v2365_v17  ;;  %2979 = vperm.xlu1 %5745, %v2625_v30   ;;  %3176 = vperm.xlu0 %5746, %v2658_v32   ;;  %v9166_v40 = vpop.permute.xlu0 %2894 }
 0x355   :  { %6281 = vpow2.f32 %v2461_v14  ;;  %v9164_v27 = vpop.permute.xlu1 %2702  ;;  %v11056_v14 = vld [vmem:[#allocation11_spill] sm:$0xff] }
 0x356   :  { %6283 = vrcp.f32 %v1671_v57 }
 0x357   :  { %6285 = vrcp.f32 %v1672_v47 }
 0x358   :  { %3171 = vperm.xlu1 %5745, %v2657_v55   ;;  %2787 = vperm.xlu0 %5746, %v2593_v58   ;;  %v9187_v30 = vpop.permute.xlu0 %3086 }
 0x359   :  { %v6268_v31 = vpop.eup %6267 }
 0x35a   :  { %v1765_v38 = vmul.f32 %v6268_v31, %v6250_v51  ;;  %v1733_v23 = vmul.f32 %v6268_v31, %v6248_v11  ;;  %v11055_v51 = vld [vmem:[#allocation52_spill] sm:$0xff] }
 0x35c   :  { %v6270_v50 = vpop.eup %6269  ;;  %v1925_v5 = vmul.f32 %v11054_v24, %v1765_v38  ;;  %v1797_v28 = vmul.f32 %v1733_v23, %v11033_v34 }
 0x35d   :  { %v9170_v21 = vpop.eup %6271  ;;  %v1734_v7 = vmul.f32 %v6270_v50, %v6252_v10  ;;  %v1766_v41 = vmul.f32 %v6270_v50, %v6256_v20  ;;  %v9185_v20 = vpop.permute.xlu1 %2889 }
 0x35e   :  { %v9172_v9 = vpop.eup %6273  ;;  %v1957_v22 = vadd.f32 %v1925_v5, %v1797_v28 }
 0x35f   :  { %v9174_v4 = vpop.eup %6275  ;;  %v1798_v11 = vmul.f32 %v11034_v56, %v1734_v7  ;;  %v1926_v13 = vmul.f32 %v11055_v51, %v1766_v41 }
 0x360   :  { %v9178_v17 = vpop.eup %6277  ;;  %v2500_v48 = vadd.f32 %v9174_v4, %v9172_v9  ;;  %v2085_v34 = vadd.f32 %v11056_v14, %v1957_v22  ;;  %v9208_v14 = vpop.permute.xlu0 %2697 }
 0x361   :  { %v9183_v57 = vpop.eup %6279  ;;  %v1958_v10 = vadd.f32 %v1926_v13, %v1798_v11 }
 0x362   :  { %v9189_v47 = vpop.eup %6281  ;;  %v2532_v56 = vadd.f32 %v9178_v17, %v2500_v48  ;;  %v2499_v32 = vadd.f32 %v9183_v57, %v9170_v21  ;;  %v2117_v55 = vadd.f32 %v2085_v34, %v7140_v61 }
 0x363   :  { %v6284_v58 = vpop.eup %6283  ;;  %v2086_v31 = vadd.f32 %v9017_v1, %v1958_v10 }
 0x364   :  { %v6286_v38 = vpop.eup %6285  ;;  %6287 = vrcp.f32 %v2532_v56  ;;  %v2531_v23 = vadd.f32 %v9189_v47, %v2499_v32  ;;  %v2149_v50 = vmax.f32 %v2117_v55, 0.0  ;;  %v1767_v24 = vmul.f32 %v6284_v58, %v9144_v63  ;;  %v9206_v63 = vpop.permute.xlu1 %3081 }
 0x365   :  { %v2118_v5 = vadd.f32 %v2086_v31, %v7140_v61  ;;  %v1768_v28 = vmul.f32 %v6286_v38, %v6266_v53  ;;  %v1736_v7 = vmul.f32 %v6286_v38, %v9148_v15  ;;  %v1735_v41 = vmul.f32 %v6284_v58, %v9141_v52 }
 0x366   :  { %6289 = vrcp.f32 %v2531_v23  ;;  %v2181_v22 = vmax.f32 %v9047_v42, %v2149_v50  ;;  %v1927_v11 = vmul.f32 %v8864_v26, %v1767_v24 }
 0x367   :  { %v2150_v1 = vmax.f32 %v2118_v5, 0.0  ;;  %v1928_v51 = vmul.f32 %v8895_v39, %v1768_v28  ;;  %v1800_v13 = vmul.f32 %v11040_v3, %v1736_v7  ;;  %v1799_v48 = vmul.f32 %v1735_v41, %v11038_v6 }
 0x368   :  { %v2213_v15 = vsub.f32 %v11042_v8, %v2181_v22  ;;  %v2309_v52 = vsub.f32 %v9036_v33, %v2181_v22  ;;  %v2405_v53 = vsub.f32 %v2149_v50, %v2181_v22  ;;  %v9216_v58 = vpop.permute.xlu1 %2712  ;;  %v9218_v8 = vpop.permute.xlu0 %2904 }
 0x369   :  { %v2182_v42 = vmax.f32 %v9052_v2, %v2150_v1  ;;  %v1960_v34 = vadd.f32 %v1928_v51, %v1800_v13  ;;  %v1959_v26 = vadd.f32 %v1927_v11, %v1799_v48 }
 0x36a   :  { %v2273_v10 = vmul.f32 1.442695, %v2213_v15  ;;  %v2369_v56 = vmul.f32 1.442695, %v2309_v52  ;;  %v2465_v39 = vmul.f32 1.442695, %v2405_v53 }
 0x36b   :  { %v2214_v3 = vsub.f32 %v11043_v44, %v2182_v42  ;;  %v2310_v6 = vsub.f32 %v9041_v37, %v2182_v42  ;;  %v2406_v32 = vsub.f32 %v2150_v1, %v2182_v42  ;;  %v2088_v55 = vadd.f32 %v9039_v35, %v1960_v34 }
 0x36c   :  { %6291 = vpow2.f32 %v2273_v10  ;;  %v2087_v33 = vadd.f32 %v8923_v29, %v1959_v26  ;;  %v9223_v24 = vpop.permute.xlu1 %2899  ;;  %v9225_v5 = vpop.permute.xlu0 %3096 }
 0x36d   :  { %6293 = vpow2.f32 %v2369_v56  ;;  %v2275_v2 = vmul.f32 1.442695, %v2214_v3  ;;  %v2371_v31 = vmul.f32 1.442695, %v2310_v6  ;;  %v2467_v38 = vmul.f32 1.442695, %v2406_v32 }
 0x36e   :  { %6295 = vpow2.f32 %v2465_v39  ;;  %v2120_v23 = vadd.f32 %v2088_v55, %v7140_v61  ;;  %v2119_v44 = vadd.f32 %v2087_v33, %v7140_v61 }
 0x36f   :  { %6297 = vpow2.f32 %v2275_v2 }
 0x370   :  { %6299 = vpow2.f32 %v2371_v31  ;;  %v2152_v37 = vmax.f32 %v2120_v23, 0.0  ;;  %v2151_v35 = vmax.f32 %v2119_v44, 0.0  ;;  %v9238_v53 = vpop.permute.xlu0 %2707 }
 0x371   :  { %v6288_v50 = vpop.eup %6287  ;;  %6301 = vpow2.f32 %v2467_v38 }
 0x372   :  { %v2184_v29 = vmax.f32 %v9088_v49, %v2152_v37  ;;  %v2183_v28 = vmax.f32 %v9079_v0, %v2151_v35  ;;  %v2596_v7 = vmul.f32 %v6288_v50, %v9172_v9  ;;  %v2628_v41 = vmul.f32 %v6288_v50, %v9174_v4  ;;  %v9236_v4 = vpop.permute.xlu1 %3091 }
 0x373   :  { %v6290_v22 = vpop.eup %6289 }
 0x374   :  { %v2216_v61 = vsub.f32 %v11047_v45, %v2184_v29  ;;  %v2312_v11 = vsub.f32 %v9072_v12, %v2184_v29  ;;  %v2408_v1 = vsub.f32 %v2152_v37, %v2184_v29  ;;  %v2215_v51 = vsub.f32 %v11046_v46, %v2183_v28  ;;  %2802 = vperm.xlu1 %5745, %v2596_v7   ;;  %v9244_v10 = vpop.permute.xlu0 %2914 }
 0x375   :  { %v2311_v13 = vsub.f32 %v9061_v19, %v2183_v28  ;;  %v2407_v48 = vsub.f32 %v2151_v35, %v2183_v28  ;;  %2994 = vperm.xlu0 %5746, %v2628_v41   ;;  %v2627_v9 = vmul.f32 %v6290_v22, %v9183_v57  ;;  %v2660_v12 = vmul.f32 %v6288_v50, %v9178_v17 }
 0x376   :  { %v2279_v49 = vmul.f32 1.442695, %v2216_v61  ;;  %v2375_v15 = vmul.f32 1.442695, %v2312_v11  ;;  %v2471_v0 = vmul.f32 1.442695, %v2408_v1  ;;  %v2659_v34 = vmul.f32 %v6290_v22, %v9189_v47  ;;  %v9242_v57 = vpop.permute.xlu1 %2722 }
 0x377   :  { %v2277_v52 = vmul.f32 1.442695, %v2215_v51  ;;  %v2373_v45 = vmul.f32 1.442695, %v2311_v13  ;;  %v2469_v42 = vmul.f32 1.442695, %v2407_v48  ;;  %v2595_v56 = vmul.f32 %v6290_v22, %v9170_v21 }
 0x378   :  { %6303 = vpow2.f32 %v2279_v49  ;;  %2989 = vperm.xlu1 %5745, %v2627_v9   ;;  %v9249_v2 = vpop.permute.xlu0 %3106 }
 0x379   :  { %v6292_v46 = vpop.eup %6291  ;;  %6305 = vpow2.f32 %v2375_v15  ;;  %3186 = vperm.xlu0 %5746, %v2660_v12  }
 0x37a   :  { %v6294_v19 = vpop.eup %6293  ;;  %6307 = vpow2.f32 %v2471_v0  ;;  %v9247_v47 = vpop.permute.xlu1 %2909 }
 0x37b   :  { %v6296_v26 = vpop.eup %6295  ;;  %6309 = vpow2.f32 %v2277_v52  ;;  %v2501_v39 = vadd.f32 %v6294_v19, %v6292_v46 }
 0x37c   :  { %v6298_v17 = vpop.eup %6297  ;;  %6311 = vpow2.f32 %v2373_v45  ;;  %3181 = vperm.xlu1 %5745, %v2659_v34   ;;  %v9253_v37 = vpop.permute.xlu0 %2717  ;;  %v3572_v34 = vld [vmem:[%s10628_s5 + $0x58] sm:$0xff] }
 0x37d   :  { %v6300_v3 = vpop.eup %6299  ;;  %2797 = vperm.xlu0 %5746, %v2595_v56   ;;  %6313 = vpow2.f32 %v2469_v42  ;;  %v2533_v55 = vadd.f32 %v6296_v26, %v2501_v39  ;;  %5552 = vmatprep.subr.mxu1 %v3572_v34 }
 0x37e   :  { %v6302_v6 = vpop.eup %6301  ;;  %v2502_v32 = vadd.f32 %v6300_v3, %v6298_v17  ;;  %v9251_v44 = vpop.permute.xlu1 %3101  ;;  %5553 = vmatpush3.msra.mxu1 %v3572_v34  ;;  %v3564_v34 = vld [vmem:[%s10628_s5 + $0x18] sm:$0xff] }
 0x380   :  { %v2534_v33 = vadd.f32 %v6302_v6, %v2502_v32  ;;  %v9262_v22 = vpop.permute.xlu0 %2924 }
 0x382   :  { %6315 = vrcp.f32 %v2534_v33  ;;  %v9260_v41 = vpop.permute.xlu1 %2732 }
 0x383   :  { %6317 = vrcp.f32 %v2533_v55  ;;  %v6323_v55 = vld [vmem:[%s10625_s2 + $0x8] sm:$0xff] }
 0x384   :  { %v9267_v49 = vpop.permute.xlu0 %3116 }
 0x385   :  { %v6304_v31 = vpop.eup %6303 }
 0x386   :  { %v6306_v38 = vpop.eup %6305  ;;  %v9265_v48 = vpop.permute.xlu1 %2919 }
 0x387   :  { %v6308_v21 = vpop.eup %6307  ;;  %v2504_v23 = vadd.f32 %v6306_v38, %v6304_v31 }
 0x388   :  { %v6310_v35 = vpop.eup %6309  ;;  %v9271_v52 = vpop.permute.xlu0 %2727 }
 0x389   :  { %v9255_v50 = vpop.eup %6311  ;;  %v2536_v29 = vadd.f32 %v6308_v21, %v2504_v23 }
 0x38a   :  { %v2503_v28 = vadd.f32 %v9255_v50, %v6310_v35  ;;  %v9258_v7 = vpop.eup %6313  ;;  %v9269_v9 = vpop.permute.xlu1 %3111 }
 0x38b   :  { %6319 = vrcp.f32 %v2536_v29 }
 0x38c   :  { %v2535_v61 = vadd.f32 %v9258_v7, %v2503_v28  ;;  %v6324_v28 = vld [vmem:[%s10625_s2] sm:$0xff] }
 0x38e   :  { %6321 = vrcp.f32 %v2535_v61  ;;  %v9276_v39 = vpop.permute.xlu1 %2742  ;;  %v11058_v61 = vld [vmem:[#allocation37_spill] sm:$0xff] }
 0x38f   :  { %v6316_v11 = vpop.eup %6315 }
 0x390   :  { %v2662_v1 = vmul.f32 %v6316_v11, %v6302_v6  ;;  %v2630_v51 = vmul.f32 %v6316_v11, %v6300_v3  ;;  %v6318_v13 = vpop.eup %6317  ;;  %v2598_v15 = vmul.f32 %v6316_v11, %v6298_v17  ;;  %v9278_v17 = vpop.permute.xlu0 %2934  ;;  %v3570_v6 = vld [vmem:[%s10628_s5 + $0x48] sm:$0xff]  ;;  %v3209_v11 = vmul.f32 %v6324_v28, %v11058_v61  ;;  %v6329_v28 = vld [vmem:[%s10624_s1] sm:$0xff] }
 0x391   :  { %v2597_v0 = vmul.f32 %v6318_v13, %v6292_v46  ;;  %v2629_v45 = vmul.f32 %v6318_v13, %v6294_v19  ;;  %v2661_v46 = vmul.f32 %v6318_v13, %v6296_v26  ;;  %v3571_v19 = vld [vmem:[%s10628_s5 + $0x50] sm:$0xff]  ;;  %v11057_v26 = vld [vmem:[#allocation20_spill] sm:$0xff] }
 0x392   :  { %3196 = vperm.xlu1 %5745, %v2662_v1   ;;  %3004 = vperm.xlu0 %5746, %v2630_v51   ;;  %v3210_v33 = vmul.f32 %v6323_v55, %v11057_v26  ;;  %v3567_v1 = vld [vmem:[%s10628_s5 + $0x30] sm:$0xff]  ;;  %v3566_v51 = vld [vmem:[%s10628_s5 + $0x28] sm:$0xff] }
 0x393   :  { %5554 = vmatprep.subr.mxu1 %v3571_v19  ;;  %v3562_v55 = vld [vmem:[%s10628_s5 + $0x8] sm:$0xff] }
 0x394   :  { %5555 = vmatpush3.msra.mxu1 %v3571_v19  ;;  %v9292_v23 = vpop.permute.xlu0 %3126  ;;  %v6326_v19 = vld [vmem:[%s10625_s2 + $0x10] sm:$0xff]  ;;  %v6328_v26 = vld [vmem:[%s10625_s2 + $0x28] sm:$0xff] }
 0x395   :  { %5556 = vmatprep.subr.mxu1 %v3570_v6 }
 0x396   :  { %2812 = vperm.xlu1 %5745, %v2598_v15   ;;  %2807 = vperm.xlu0 %5746, %v2597_v0   ;;  %v6325_v0 = vld [vmem:[%s10625_s2 + $0x18] sm:$0xff] }
 0x397   :  { %5557 = vmatpush3.msra.mxu1 %v3570_v6  ;;  %v3211_v6 = vmul.f32 %v6326_v19, %v9129_v62  ;;  %v6333_v19 = vld [vmem:[%s10624_s1 + $0x10] sm:$0xff] }
 0x398   :  { %v6320_v12 = vpop.eup %6319 }
 0x399   :  { %v2632_v42 = vmul.f32 %v6320_v12, %v6306_v38  ;;  %v2664_v32 = vmul.f32 %v6320_v12, %v6308_v21  ;;  %v9290_v38 = vpop.permute.xlu1 %2929  ;;  %v3568_v21 = vld [vmem:[%s10628_s5 + $0x38] sm:$0xff]  ;;  %v2600_v29 = vmul.f32 %v6320_v12, %v6304_v31  ;;  %v9313_v31 = vpop.permute.xlu0 %2737  ;;  %v11059_v12 = vld [vmem:[#allocation42_spill] sm:$0xff] }
 0x39a   :  { %2999 = vperm.xlu1 %5745, %v2629_v45   ;;  %v3212_v45 = vmul.f32 %v6325_v0, %v11059_v12  ;;  %v6331_v0 = vld [vmem:[%s10624_s1 + $0x18] sm:$0xff] }
 0x39b   :  { %v6322_v56 = vpop.eup %6321  ;;  %3014 = vperm.xlu0 %5746, %v2632_v42   ;;  %v3565_v42 = vld [vmem:[%s10628_s5 + $0x20] sm:$0xff]  ;;  %v11062_v12 = vld [vmem:[#allocation60_spill] sm:$0xff] }
 0x39c   :  { %v2599_v3 = vmul.f32 %v6322_v56, %v6310_v35  ;;  %v3569_v35 = vld [vmem:[%s10628_s5 + $0x40] sm:$0xff]  ;;  %v2631_v15 = vmul.f32 %v6322_v56, %v9255_v50 }
 0x39d   :  { %5558 = vmatprep.subr.mxu1 %v3569_v35  ;;  %v9311_v13 = vpop.permute.xlu1 %3121 }
 0x39e   :  { %3191 = vperm.xlu1 %5745, %v2661_v46   ;;  %5559 = vmatpush3.msra.mxu1 %v3569_v35  ;;  %v9330_v46 = vpop.permute.xlu0 %2944 }
 0x39f   :  { %2817 = vperm.xlu0 %5746, %v2599_v3   ;;  %5560 = vmatprep.subr.mxu1 %v3568_v21  ;;  %v2663_v3 = vmul.f32 %v6322_v56, %v9258_v7  ;;  %v6327_v7 = vld [vmem:[%s10624_s1 + $0x8] sm:$0xff]  ;;  %v11060_v56 = vld [vmem:[#allocation9_spill] sm:$0xff] }
 0x3a0   :  { %5561 = vmatpush3.msra.mxu1 %v3568_v21  ;;  %v3018_v62 = vmul.f32 %v6327_v7, %v11060_v56 }
 0x3a1   :  { %5562 = vmatprep.subr.mxu1 %v3567_v1  ;;  %v9328_v50 = vpop.permute.xlu1 %2752 }
 0x3a2   :  { %3206 = vperm.xlu1 %5745, %v2664_v32   ;;  %5563 = vmatpush3.msra.mxu1 %v3567_v1  ;;  %v3563_v32 = vld [vmem:[%s10628_s5 + $0x10] sm:$0xff]  ;;  %v9354_v21 = vpop.permute.xlu0 %3136 }
 0x3a3   :  { %3403 = vrot.lane.b32.xlu0 %v3210_v33, %s6435_s30  ;;  %5564 = vmatprep.subr.mxu1 %v3566_v51  ;;  %v3214_v33 = vmul.f32 %v6328_v26, %v9146_v59  ;;  %v11061_v59 = vld [vmem:[#allocation15_spill] sm:$0xff] }
 0x3a4   :  { %5565 = vmatpush3.msra.mxu1 %v3566_v51  ;;  %v3017_v61 = vmul.f32 %v6329_v28, %v11061_v59  ;;  %v6339_v59 = vld [vmem:[%s10624_s1 + $0x38] sm:$0xff] }
 0x3a5   :  { %5566 = vmatprep.subr.mxu1 %v3565_v42  ;;  %v9352_v35 = vpop.permute.xlu1 %2939 }
 0x3a6   :  { %2822 = vperm.xlu1 %5745, %v2600_v29   ;;  %5567 = vmatpush3.msra.mxu1 %v3565_v42  ;;  %v3561_v29 = vld [vmem:[%s10628_s5] sm:$0xff]  ;;  %v6332_v42 = vld [vmem:[%s10625_s2 + $0x38] sm:$0xff] }
 0x3a7   :  { %3401 = vrot.lane.b32.xlu0 %v3209_v11, %s6435_s30  ;;  %5568 = vmatprep.subr.mxu1 %v3564_v34  ;;  %v6330_v11 = vld [vmem:[%s10625_s2 + $0x20] sm:$0xff] }
 0x3a8   :  { %5569 = vmatpush3.msra.mxu1 %v3564_v34  ;;  %v3213_v1 = vmul.f32 %v6330_v11, %v9161_v43  ;;  %v3216_v43 = vmul.f32 %v6332_v42, %v9187_v30 }
 0x3a9   :  { %5570 = vmatprep.subr.mxu1 %v3563_v32  ;;  %v9370_v51 = vpop.permute.xlu1 %3131 }
 0x3aa   :  { %3009 = vperm.xlu1 %5745, %v2631_v15   ;;  %5571 = vmatpush3.msra.mxu1 %v3563_v32  ;;  %v9372_v15 = vpop.permute.xlu0 %2747  ;;  %v6334_v32 = vld [vmem:[%s10625_s2 + $0x30] sm:$0xff] }
 0x3ab   :  { %3407 = vrot.lane.b32.xlu0 %v3212_v45, %s6435_s30  ;;  %5572 = vmatprep.subr.mxu1 %v3562_v55  ;;  %v3020_v45 = vmul.f32 %v6331_v0, %v11062_v12  ;;  %v3215_v30 = vmul.f32 %v6334_v32, %v9206_v63  ;;  %v6337_v63 = vld [vmem:[%s10624_s1 + $0x20] sm:$0xff]  ;;  %v6341_v0 = vld [vmem:[%s10624_s1 + $0x30] sm:$0xff] }
 0x3ac   :  { %5573 = vmatpush3.msra.mxu1 %v3562_v55  ;;  %v6335_v55 = vld [vmem:[%s10624_s1 + $0x28] sm:$0xff]  ;;  %v6342_v12 = vld [vmem:[%s10625_s2 + $0x50] sm:$0xff] }
 0x3ad   :  { %5574 = vmatprep.subr.mxu1 %v3561_v29  ;;  %v9385_v34 = vpop.permute.xlu1 %2762  ;;  %v3022_v7 = vmul.f32 %v6335_v55, %v9131_v60  ;;  %v3021_v60 = vmul.f32 %v6337_v63, %v9151_v36  ;;  %v3024_v36 = vmul.f32 %v6339_v59, %v9166_v40  ;;  %v3023_v40 = vmul.f32 %v6341_v0, %v9185_v20  ;;  %v6344_v20 = vld [vmem:[%s10625_s2 + $0x68] sm:$0xff] }
 0x3ae   :  { %3201 = vperm.xlu1 %5745, %v2663_v3   ;;  %5575 = vmatpush3.msra.mxu1 %v3561_v29  ;;  %v9387_v3 = vpop.permute.xlu0 %2954 }
 0x3af   :  { %3405 = vrot.lane.b32.xlu0 %v3211_v6, %s6435_s30  ;;  %v3019_v6 = vmul.f32 %v6333_v19, %v9119_v16  ;;  %v6336_v16 = vld [vmem:[%s10625_s2 + $0x48] sm:$0xff] }
 0x3b0   :  { %v3218_v56 = vmul.f32 %v6336_v16, %v9225_v5 }
 0x3b2   :  { %3275 = vrot.lane.b32.xlu1 %v3018_v62, %s6434_s4  ;;  %v9407_v62 = vpop.permute.xlu1 %2949  ;;  %v9409_v26 = vpop.permute.xlu0 %3146 }
 0x3b3   :  { %3411 = vrot.lane.b32.xlu0 %v3214_v33, %s6435_s30  ;;  %v6338_v33 = vld [vmem:[%s10625_s2 + $0x40] sm:$0xff] }
 0x3b4   :  { %v3217_v5 = vmul.f32 %v6338_v33, %v9236_v4  ;;  %v6350_v33 = vld [vmem:[%s10625_s2 + $0x70] sm:$0xff] }
 0x3b6   :  { %3273 = vrot.lane.b32.xlu1 %v3017_v61, %s6434_s4  ;;  %v9422_v29 = vpop.permute.xlu1 %3141  ;;  %v9424_v28 = vpop.permute.xlu0 %2757  ;;  %v6340_v61 = vld [vmem:[%s10625_s2 + $0x58] sm:$0xff] }
 0x3b7   :  { %3409 = vrot.lane.b32.xlu0 %v3213_v1, %s6435_s30  ;;  %v3220_v4 = vmul.f32 %v6340_v61, %v9249_v2  ;;  %v3219_v2 = vmul.f32 %v6342_v12, %v9251_v44  ;;  %v6345_v44 = vld [vmem:[%s10624_s1 + $0x40] sm:$0xff] }
 0x3b8   :  { %v3025_v32 = vmul.f32 %v6345_v44, %v9223_v24  ;;  %v6348_v24 = vld [vmem:[%s10625_s2 + $0x78] sm:$0xff] }
 0x3ba   :  { %3279 = vrot.lane.b32.xlu1 %v3020_v45, %s6434_s4  ;;  %v9437_v11 = vpop.permute.xlu1 %2772  ;;  %v9439_v1 = vpop.permute.xlu0 %2964  ;;  %v6343_v45 = vld [vmem:[%s10624_s1 + $0x48] sm:$0xff] }
 0x3bb   :  { %3415 = vrot.lane.b32.xlu0 %v3216_v43, %s6435_s30  ;;  %v3026_v42 = vmul.f32 %v6343_v45, %v9218_v8  ;;  %v3222_v43 = vmul.f32 %v6344_v20, %v9267_v49  ;;  %v6346_v8 = vld [vmem:[%s10625_s2 + $0x60] sm:$0xff] }
 0x3be   :  { %3277 = vrot.lane.b32.xlu1 %v3019_v6, %s6434_s4  ;;  %v9459_v19 = vpop.permute.xlu1 %2959  ;;  %v3157_v6 = vpop.permute.xlu0 %3156 }
 0x3bf   :  { %3413 = vrot.lane.b32.xlu0 %v3215_v30, %s6435_s30  ;;  %v3221_v30 = vmul.f32 %v6346_v8, %v9269_v9  ;;  %v6360_v8 = vld [vmem:[%s10625_s2 + $0xa8] sm:$0xff] }
 0x3c2   :  { %3283 = vrot.lane.b32.xlu1 %v3022_v7, %s6434_s4  ;;  %v3152_v49 = vpop.permute.xlu1 %3151  ;;  %v9472_v55 = vpop.permute.xlu0 %2767  ;;  %v6347_v7 = vld [vmem:[%s10624_s1 + $0x58] sm:$0xff] }
 0x3c3   :  { %3419 = vrot.lane.b32.xlu0 %v3218_v56, %s6435_s30  ;;  %v3028_v16 = vmul.f32 %v6347_v7, %v9244_v10  ;;  %v3224_v56 = vmul.f32 %v6348_v24, %v9292_v23  ;;  %v3223_v23 = vmul.f32 %v6350_v33, %v9311_v13  ;;  %v6353_v13 = vld [vmem:[%s10624_s1 + $0x60] sm:$0xff] }
 0x3c4   :  { %v3029_v0 = vmul.f32 %v6353_v13, %v9265_v48  ;;  %v6356_v48 = vld [vmem:[%s10625_s2 + $0x98] sm:$0xff] }
 0x3c6   :  { %3281 = vrot.lane.b32.xlu1 %v3021_v60, %s6434_s4  ;;  %v9485_v9 = vpop.permute.xlu1 %2782  ;;  %v9487_v63 = vpop.permute.xlu0 %2974  ;;  %v6349_v60 = vld [vmem:[%s10624_s1 + $0x50] sm:$0xff] }
 0x3c7   :  { %3417 = vrot.lane.b32.xlu0 %v3217_v5, %s6435_s30  ;;  %v3027_v10 = vmul.f32 %v6349_v60, %v9247_v47  ;;  %v6351_v5 = vld [vmem:[%s10624_s1 + $0x68] sm:$0xff] }
 0x3c8   :  { %v3030_v59 = vmul.f32 %v6351_v5, %v9262_v22  ;;  %v6352_v47 = vld [vmem:[%s10625_s2 + $0x88] sm:$0xff]  ;;  %v6354_v22 = vld [vmem:[%s10625_s2 + $0x80] sm:$0xff] }
 0x3ca   :  { %3287 = vrot.lane.b32.xlu1 %v3024_v36, %s6434_s4  ;;  %v3226_v36 = vmul.f32 %v6352_v47, %v9354_v21  ;;  %v9507_v61 = vpop.permute.xlu1 %2969 }
 0x3cb   :  { %3423 = vrot.lane.b32.xlu0 %v3220_v4, %s6435_s30  ;;  %v3167_v4 = vpop.permute.xlu0 %3166 }
 0x3ce   :  { %3285 = vrot.lane.b32.xlu1 %v3023_v40, %s6434_s4  ;;  %v3225_v40 = vmul.f32 %v6354_v22, %v9370_v51  ;;  %v3162_v21 = vpop.permute.xlu1 %3161  ;;  %v6357_v51 = vld [vmem:[%s10624_s1 + $0x70] sm:$0xff] }
 0x3cf   :  { %3421 = vrot.lane.b32.xlu0 %v3219_v2, %s6435_s30  ;;  %v9520_v12 = vpop.permute.xlu0 %2777  ;;  %v6355_v2 = vld [vmem:[%s10624_s1 + $0x78] sm:$0xff]  ;;  %v3031_v20 = vmul.f32 %v6357_v51, %v9290_v38 }
 0x3d0   :  { %v3032_v45 = vmul.f32 %v6355_v2, %v9278_v17  ;;  %v6358_v17 = vld [vmem:[%s10625_s2 + $0x90] sm:$0xff]  ;;  %v6372_v51 = vld [vmem:[%s10625_s2 + $0xd8] sm:$0xff] }
 0x3d2   :  { %3291 = vrot.lane.b32.xlu1 %v3026_v42, %s6434_s4  ;;  %v3228_v42 = vmul.f32 %v6356_v48, %v9409_v26  ;;  %v9541_v44 = vpop.permute.xlu1 %2792  ;;  %v6359_v26 = vld [vmem:[%s10624_s1 + $0x88] sm:$0xff]  ;;  %v6371_v48 = vld [vmem:[%s10624_s1 + $0xb8] sm:$0xff] }
 0x3d3   :  { %3427 = vrot.lane.b32.xlu0 %v3222_v43, %s6435_s30  ;;  %v3227_v43 = vmul.f32 %v6358_v17, %v9422_v29  ;;  %v3034_v38 = vmul.f32 %v6359_v26, %v9330_v46  ;;  %v6362_v46 = vld [vmem:[%s10625_s2 + $0xa0] sm:$0xff] }
 0x3d6   :  { %3289 = vrot.lane.b32.xlu1 %v3025_v32, %s6434_s4  ;;  %v9543_v32 = vpop.permute.xlu0 %2984  ;;  %v9555_v29 = vpop.permute.xlu1 %2979 }
 0x3d7   :  { %3425 = vrot.lane.b32.xlu0 %v3221_v30, %s6435_s30  ;;  %v3230_v30 = vmul.f32 %v6360_v8, %v3157_v6  ;;  %v6363_v6 = vld [vmem:[%s10624_s1 + $0x98] sm:$0xff] }
 0x3d8   :  { %v3036_v60 = vmul.f32 %v6363_v6, %v9387_v3  ;;  %v6366_v3 = vld [vmem:[%s10625_s2 + $0xb0] sm:$0xff]  ;;  %v6377_v6 = vld [vmem:[%s10624_s1 + $0xc0] sm:$0xff] }
 0x3da   :  { %3295 = vrot.lane.b32.xlu1 %v3028_v16, %s6434_s4  ;;  %v3177_v7 = vpop.permute.xlu0 %3176  ;;  %v6361_v16 = vld [vmem:[%s10624_s1 + $0x80] sm:$0xff]  ;;  %v3172_v33 = vpop.permute.xlu1 %3171 }
 0x3db   :  { %3431 = vrot.lane.b32.xlu0 %v3224_v56, %s6435_s30  ;;  %v3033_v24 = vmul.f32 %v6361_v16, %v9352_v35  ;;  %v3229_v56 = vmul.f32 %v6362_v46, %v3152_v49  ;;  %v6365_v49 = vld [vmem:[%s10624_s1 + $0x90] sm:$0xff] }
 0x3dc   :  { %v3035_v5 = vmul.f32 %v6365_v49, %v9407_v62  ;;  %v6368_v62 = vld [vmem:[%s10625_s2 + $0xc8] sm:$0xff]  ;;  %v6379_v49 = vld [vmem:[%s10624_s1 + $0xd8] sm:$0xff] }
 0x3de   :  { %3293 = vrot.lane.b32.xlu1 %v3027_v10, %s6434_s4  ;;  %v6364_v10 = vld [vmem:[%s10625_s2 + $0xb8] sm:$0xff] }
 0x3df   :  { %3429 = vrot.lane.b32.xlu0 %v3223_v23, %s6435_s30  ;;  %v3232_v35 = vmul.f32 %v6364_v10, %v3167_v4  ;;  %v9574_v23 = vpop.permute.xlu0 %2787  ;;  %v6367_v4 = vld [vmem:[%s10624_s1 + $0xa8] sm:$0xff] }
 0x3e0   :  { %v3038_v13 = vmul.f32 %v6367_v4, %v9439_v1  ;;  %v6370_v1 = vld [vmem:[%s10625_s2 + $0xc0] sm:$0xff] }
 0x3e2   :  { %3299 = vrot.lane.b32.xlu1 %v3030_v59, %s6434_s4  ;;  %v3231_v59 = vmul.f32 %v6366_v3, %v3162_v21  ;;  %v6369_v21 = vld [vmem:[%s10624_s1 + $0xa0] sm:$0xff] }
 0x3e3   :  { %3435 = vrot.lane.b32.xlu0 %v3226_v36, %s6435_s30  ;;  %v3037_v2 = vmul.f32 %v6369_v21, %v9459_v19 }
 0x3e6   :  { %3297 = vrot.lane.b32.xlu1 %v3029_v0, %s6434_s4  ;;  %v3234_v0 = vmul.f32 %v6368_v62, %v3177_v7  ;;  %v6375_v7 = vld [vmem:[%s10624_s1 + $0xc8] sm:$0xff] }
 0x3e7   :  { %3433 = vrot.lane.b32.xlu0 %v3225_v40, %s6435_s30  ;;  %v3042_v16 = vmul.f32 %v6375_v7, %v9543_v32  ;;  %v6378_v32 = vld [vmem:[%s10625_s2 + $0xe8] sm:$0xff] }
 0x3ea   :  { %3303 = vrot.lane.b32.xlu1 %v3032_v45, %s6434_s4  ;;  %v3233_v45 = vmul.f32 %v6370_v1, %v3172_v33 }
 0x3eb   :  { %3439 = vrot.lane.b32.xlu0 %v3228_v42, %s6435_s30  ;;  %v3040_v42 = vmul.f32 %v6371_v48, %v9487_v63  ;;  %v6374_v63 = vld [vmem:[%s10625_s2 + $0xd0] sm:$0xff]  ;;  %v6384_v48 = vld [vmem:[%s10625_s2 + $0xe0] sm:$0xff] }
 0x3ee   :  { %3301 = vrot.lane.b32.xlu1 %v3031_v20, %s6434_s4 }
 0x3ef   :  { %3437 = vrot.lane.b32.xlu0 %v3227_v43, %s6435_s30  ;;  %v9585_v47 = vpop.permute.xlu1 %2802  ;;  %v6373_v43 = vld [vmem:[%s10624_s1 + $0xb0] sm:$0xff] }
 0x3f0   :  { %v2995_v36 = vpop.permute.xlu0 %2994  ;;  %v3039_v26 = vmul.f32 %v6373_v43, %v9507_v61  ;;  %v6376_v61 = vld [vmem:[%s10624_s1 + $0xe8] sm:$0xff] }
 0x3f2   :  { %3307 = vrot.lane.b32.xlu1 %v3034_v38, %s6434_s4 }
 0x3f3   :  { %3443 = vrot.lane.b32.xlu0 %v3230_v30, %s6435_s30  ;;  %v2990_v22 = vpop.permute.xlu1 %2989 }
 0x3f4   :  { %v3187_v40 = vpop.permute.xlu0 %3186 }
 0x3f5   :  { %v3236_v19 = vmul.f32 %v6372_v51, %v3187_v40 }
 0x3f6   :  { %3305 = vrot.lane.b32.xlu1 %v3033_v24, %s6434_s4 }
 0x3f7   :  { %3441 = vrot.lane.b32.xlu0 %v3229_v56, %s6435_s30  ;;  %v3182_v20 = vpop.permute.xlu1 %3181 }
 0x3f8   :  { %v9614_v17 = vpop.permute.xlu0 %2797  ;;  %v3235_v38 = vmul.f32 %v6374_v63, %v3182_v20  ;;  %v6385_v20 = vld [vmem:[%s10624_s1 + $0xf0] sm:$0xff] }
 0x3fa   :  { %3311 = vrot.lane.b32.xlu1 %v3036_v60, %s6434_s4  ;;  %v3041_v60 = vmul.f32 %v6377_v6, %v9555_v29  ;;  %v6380_v29 = vld [vmem:[%s10624_s1 + $0xf8] sm:$0xff]  ;;  %v6388_v6 = vld [vmem:[%s10623_s0] sm:$0xff] }
 0x3fb   :  { %3447 = vrot.lane.b32.xlu0 %v3232_v35, %s6435_s30 }
 0x3fe   :  { %3309 = vrot.lane.b32.xlu1 %v3035_v5, %s6434_s4  ;;  %v3044_v5 = vmul.f32 %v6379_v49, %v2995_v36  ;;  %v6382_v36 = vld [vmem:[%s10625_s2 + $0xf8] sm:$0xff] }
 0x3ff   :  { %3445 = vrot.lane.b32.xlu0 %v3231_v59, %s6435_s30 }
 0x402   :  { %3315 = vrot.lane.b32.xlu1 %v3038_v13, %s6434_s4  ;;  %v6381_v13 = vld [vmem:[%s10624_s1 + $0xd0] sm:$0xff] }
 0x403   :  { %3451 = vrot.lane.b32.xlu0 %v3234_v0, %s6435_s30  ;;  %v3043_v62 = vmul.f32 %v6381_v13, %v2990_v22  ;;  %v6389_v13 = vld [vmem:[%s10623_s0 + $0x18] sm:$0xff] }
 0x406   :  { %3313 = vrot.lane.b32.xlu1 %v3037_v2, %s6434_s4  ;;  %v6383_v2 = vld [vmem:[%s10624_s1 + $0xe0] sm:$0xff]  ;;  %s6441_s1 = smov 96  }
 0x407   :  { %3449 = vrot.lane.b32.xlu0 %v3233_v45, %s6435_s30 }
 0x40a   :  { %3319 = vrot.lane.b32.xlu1 %v3040_v42, %s6434_s4 }
 0x40b   :  { %3455 = vrot.lane.b32.xlu0 %v3236_v19, %s6435_s30 }
 0x40d   :  { %v3197_v8 = vpop.permute.xlu1 %3196  ;;  %v3005_v30 = vpop.permute.xlu0 %3004 }
 0x40e   :  { %3317 = vrot.lane.b32.xlu1 %v3039_v26, %s6434_s4  ;;  %v3046_v24 = vmul.f32 %v6376_v61, %v3005_v30  ;;  %v3238_v10 = vmul.f32 %v6378_v32, %v3197_v8  ;;  %v11063_v61 = vld [vmem:[#allocation53_spill] sm:$0xff] }
 0x40f   :  { %3453 = vrot.lane.b32.xlu0 %v3235_v38, %s6435_s30  ;;  %v6386_v38 = vld [vmem:[%s10625_s2 + $0xf0] sm:$0xff]  ;;  %s5187_s2 = sld [smem:[#allocation2 + $0x1]] }
 0x411   :  { %v9634_v46 = vpop.permute.xlu1 %2812  ;;  %v9636_v56 = vpop.permute.xlu0 %2807 }
 0x412   :  { %3323 = vrot.lane.b32.xlu1 %v3042_v16, %s6434_s4  ;;  %v6387_v16 = vld [vmem:[%s10623_s0 + $0x8] sm:$0xff] }
 0x413   :  { %3331 = vrot.lane.b32.xlu0 %v3046_v24, %s6434_s4  ;;  %v2826_v24 = vmul.f32 %v6387_v16, %v11063_v61 }
 0x415   :  { %v3000_v35 = vpop.permute.xlu1 %2999 }
 0x416   :  { %3321 = vrot.lane.b32.xlu1 %v3041_v60, %s6434_s4  ;;  %v3015_v33 = vpop.permute.xlu0 %3014  ;;  %v3045_v1 = vmul.f32 %v6383_v2, %v3000_v35  ;;  %v11064_v60 = vld [vmem:[#allocation7_spill] sm:$0xff] }
 0x417   :  { %3459 = vrot.lane.b32.xlu0 %v3238_v10, %s6435_s30  ;;  %v3048_v59 = vmul.f32 %v6380_v29, %v3015_v33  ;;  %v2825_v32 = vmul.f32 %v6388_v6, %v11064_v60  ;;  %v6394_v60 = vld [vmem:[%s10623_s0 + $0x30] sm:$0xff] }
 0x419   :  { %v3192_v3 = vpop.permute.xlu1 %3191 }
 0x41a   :  { %3327 = vrot.lane.b32.xlu1 %v3044_v5, %s6434_s4  ;;  %v9656_v4 = vpop.permute.xlu0 %2817  ;;  %v3237_v42 = vmul.f32 %v6384_v48, %v3192_v3 }
 0x41b   :  { %3335 = vrot.lane.b32.xlu0 %v3048_v59, %s6434_s4 }
 0x41d   :  { %v3207_v0 = vpop.permute.xlu1 %3206 }
 0x41e   :  { %v3240_v40 = vmul.f32 %v6382_v36, %v3207_v0  ;;  %3325 = vrot.lane.b32.xlu1 %v3043_v62, %s6434_s4  ;;  %v3404_v21 = vpop.permute.xlu0 %3403  ;;  %v11065_v62 = vld [vmem:[#allocation38_spill] sm:$0xff]  ;;  %v6390_v36 = vld [vmem:[%s10623_s0 + $0x10] sm:$0xff] }
 0x41f   :  { %v2828_v0 = vmul.f32 %v6389_v13, %v11065_v62  ;;  %v6396_v13 = vld [vmem:[%s10623_s0 + $0x40] sm:$0xff] }
 0x420   :  { %3463 = vrot.lane.b32.xlu0 %v3240_v40, %s6435_s30  ;;  %v2827_v40 = vmul.f32 %v6390_v36, %v9123_v54  ;;  %v6391_v54 = vld [vmem:[%s10623_s0 + $0x28] sm:$0xff]  ;;  %v2833_v62 = vmul.f32 %v6396_v13, %v9238_v53  ;;  %v6397_v53 = vld [vmem:[%s10623_s0 + $0x58] sm:$0xff]  ;;  %v6404_v13 = vld [vmem:[%s10623_s0 + $0x80] sm:$0xff] }
 0x421   :  { %v9670_v45 = vpop.permute.xlu1 %2822 }
 0x422   :  { %3329 = vrot.lane.b32.xlu1 %v3045_v1, %s6434_s4  ;;  %v3402_v22 = vpop.permute.xlu0 %3401 }
 0x425   :  { %v3010_v51 = vpop.permute.xlu1 %3009 }
 0x426   :  { %3457 = vrot.lane.b32.xlu1 %v3237_v42, %s6435_s30  ;;  %v3408_v19 = vpop.permute.xlu0 %3407  ;;  %v3047_v43 = vmul.f32 %v6385_v20, %v3010_v51 }
 0x429   :  { %v3202_v26 = vpop.permute.xlu1 %3201 }
 0x42a   :  { %3333 = vrot.lane.b32.xlu1 %v3047_v43, %s6434_s4  ;;  %v3406_v63 = vpop.permute.xlu0 %3405  ;;  %v3239_v8 = vmul.f32 %v6386_v38, %v3202_v26  ;;  %v2830_v43 = vmul.f32 %v6391_v54, %v9135_v25  ;;  %v6392_v26 = vld [vmem:[%s10623_s0 + $0x20] sm:$0xff] }
 0x42d   :  { %v3276_v30 = vpop.permute.xlu1 %3275 }
 0x42e   :  { %3461 = vrot.lane.b32.xlu1 %v3239_v8, %s6435_s30  ;;  %v3412_v7 = vpop.permute.xlu0 %3411  ;;  %v3498_v10 = vsel %vm408_vm0, %v2826_v24, %v3276_v30 }
 0x42f   :  { %v3530_v3 = vsel %vm441_vm1, %v3498_v10, %v3404_v21 }
 0x431   :  { %v3274_v35 = vpop.permute.xlu1 %3273 }
 0x432   :  { %v3497_v33 = vsel %vm408_vm0, %v2825_v32, %v3274_v35  ;;  %v3410_v49 = vpop.permute.xlu0 %3409  ;;  %v2831_v32 = vmul.f32 %v6394_v60, %v9208_v14  ;;  %v6395_v14 = vld [vmem:[%s10623_s0 + $0x48] sm:$0xff] }
 0x433   :  { %v3529_v5 = vsel %vm441_vm1, %v3497_v33, %v3402_v22 }
 0x434   :  { %5576 = vmatprep.mubr.msk.f32.mxu1 %vm486_vm2, %v3529_v5 }
 0x435   :  { %v3280_v29 = vpop.permute.xlu1 %3279  ;;  %5577 = vmatmul.mubr.msk.f32.vlgmr.msra.gmra.mxu1 %vm486_vm2, %v3530_v3 }
 0x436   :  { %v3416_v59 = vpop.permute.xlu0 %3415  ;;  %v3500_v2 = vsel %vm408_vm0, %v2828_v0, %v3280_v29  ;;  %v2834_v29 = vmul.f32 %v6395_v14, %v9216_v58 }
 0x437   :  { %v3532_v42 = vsel %vm441_vm1, %v3500_v2, %v3408_v19 }
 0x439   :  { %v3278_v1 = vpop.permute.xlu1 %3277 }
 0x43a   :  { %v3499_v21 = vsel %vm408_vm0, %v2827_v40, %v3278_v1  ;;  %v3414_v22 = vpop.permute.xlu0 %3413 }
 0x43b   :  { %v3531_v48 = vsel %vm441_vm1, %v3499_v21, %v3406_v63  ;;  %v2829_v63 = vmul.f32 %v6392_v26, %v9158_v18  ;;  %v6393_v18 = vld [vmem:[%s10623_s0 + $0x38] sm:$0xff] }
 0x43c   :  { %5579 = vmatprep.mubr.msk.f32.mxu1 %vm486_vm2, %v3531_v48  ;;  %v2832_v6 = vmul.f32 %v6393_v18, %v9164_v27  ;;  %v6398_v48 = vld [vmem:[%s10623_s0 + $0x50] sm:$0xff] }
 0x43d   :  { %v3284_v51 = vpop.permute.xlu1 %3283  ;;  %5580 = vmatmul.mubr.msk.f32.gmra.mxu1 %vm486_vm2, %v3532_v42  ;;  %v2835_v42 = vmul.f32 %v6398_v48, %v9253_v37  ;;  %v6399_v37 = vld [vmem:[%s10623_s0 + $0x68] sm:$0xff] }
 0x43e   :  { %v3420_v20 = vpop.permute.xlu0 %3419  ;;  %v3502_v38 = vsel %vm408_vm0, %v2830_v43, %v3284_v51 }
 0x43f   :  { %v3534_v61 = vsel %vm441_vm1, %v3502_v38, %v3412_v7 }
 0x441   :  { %v3282_v8 = vpop.permute.xlu1 %3281 }
 0x442   :  { %v3501_v19 = vsel %vm408_vm0, %v2829_v63, %v3282_v8  ;;  %v3418_v30 = vpop.permute.xlu0 %3417  ;;  %v2838_v8 = vmul.f32 %v6399_v37, %v9260_v41 }
 0x443   :  { %v3533_v16 = vsel %vm441_vm1, %v3501_v19, %v3410_v49  ;;  %v6400_v19 = vld [vmem:[%s10623_s0 + $0x60] sm:$0xff] }
 0x444   :  { %5582 = vmatprep.mubr.msk.f32.mxu1 %vm486_vm2, %v3533_v16 }
 0x445   :  { %v3288_v24 = vpop.permute.xlu1 %3287  ;;  %5583 = vmatmul.mubr.msk.f32.gmra.mxu1 %vm486_vm2, %v3534_v61 }
 0x446   :  { %v3424_v25 = vpop.permute.xlu0 %3423  ;;  %v3504_v10 = vsel %vm408_vm0, %v2832_v6, %v3288_v24 }
 0x447   :  { %v3536_v5 = vsel %vm441_vm1, %v3504_v10, %v3416_v59  ;;  %v6402_v10 = vld [vmem:[%s10623_s0 + $0x70] sm:$0xff] }
 0x449   :  { %v3286_v35 = vpop.permute.xlu1 %3285 }
 0x44a   :  { %v3503_v7 = vsel %vm408_vm0, %v2831_v32, %v3286_v35  ;;  %v3422_v33 = vpop.permute.xlu0 %3421  ;;  %v2839_v35 = vmul.f32 %v6402_v10, %v9313_v31  ;;  %v6403_v31 = vld [vmem:[%s10623_s0 + $0x88] sm:$0xff] }
 0x44b   :  { %v3535_v49 = vsel %vm441_vm1, %v3503_v7, %v3414_v22  ;;  %v2836_v22 = vmul.f32 %v6397_v53, %v9242_v57  ;;  %v6406_v53 = vld [vmem:[%s10623_s0 + $0x90] sm:$0xff] }
 0x44c   :  { %5585 = vmatprep.mubr.msk.f32.mxu1 %vm486_vm2, %v3535_v49 }
 0x44d   :  { %v3292_v3 = vpop.permute.xlu1 %3291  ;;  %5586 = vmatmul.mubr.msk.f32.gmra.mxu1 %vm486_vm2, %v3536_v5 }
 0x44e   :  { %v3428_v27 = vpop.permute.xlu0 %3427  ;;  %v3506_v0 = vsel %vm408_vm0, %v2834_v29, %v3292_v3  ;;  %v2842_v29 = vmul.f32 %v6403_v31, %v9328_v50 }
 0x44f   :  { %v3538_v1 = vsel %vm441_vm1, %v3506_v0, %v3420_v20 }
 0x451   :  { %v3290_v36 = vpop.permute.xlu1 %3289 }
 0x452   :  { %v3505_v59 = vsel %vm408_vm0, %v2833_v62, %v3290_v36  ;;  %v3426_v40 = vpop.permute.xlu0 %3425  ;;  %v2841_v62 = vmul.f32 %v6404_v13, %v9372_v15  ;;  %v6405_v15 = vld [vmem:[%s10623_s0 + $0x98] sm:$0xff]  ;;  %v6414_v13 = vld [vmem:[%s10623_s0 + $0xd0] sm:$0xff] }
 0x453   :  { %v3537_v2 = vsel %vm441_vm1, %v3505_v59, %v3418_v30  ;;  %v2837_v30 = vmul.f32 %v6400_v19, %v9271_v52  ;;  %v6401_v52 = vld [vmem:[%s10623_s0 + $0x78] sm:$0xff] }
 0x454   :  { %5588 = vmatprep.mubr.msk.f32.mxu1 %vm486_vm2, %v3537_v2  ;;  %v2840_v32 = vmul.f32 %v6401_v52, %v9276_v39 }
 0x455   :  { %v3296_v21 = vpop.permute.xlu1 %3295  ;;  %5589 = vmatmul.mubr.msk.f32.gmra.mxu1 %vm486_vm2, %v3538_v1 }
 0x456   :  { %v3432_v58 = vpop.permute.xlu0 %3431  ;;  %v3508_v51 = vsel %vm408_vm0, %v2836_v22, %v3296_v21  ;;  %v2843_v22 = vmul.f32 %v6406_v53, %v9424_v28  ;;  %v6407_v28 = vld [vmem:[%s10623_s0 + $0xa8] sm:$0xff] }
 0x457   :  { %v3540_v63 = vsel %vm441_vm1, %v3508_v51, %v3424_v25 }
 0x459   :  { %v3294_v54 = vpop.permute.xlu1 %3293 }
 0x45a   :  { %v3507_v20 = vsel %vm408_vm0, %v2835_v42, %v3294_v54  ;;  %v3430_v43 = vpop.permute.xlu0 %3429 }
 0x45b   :  { %v3539_v26 = vsel %vm441_vm1, %v3507_v20, %v3422_v33 }
 0x45c   :  { %5591 = vmatprep.mubr.msk.f32.mxu1 %vm486_vm2, %v3539_v26 }
 0x45d   :  { %v3300_v38 = vpop.permute.xlu1 %3299  ;;  %5592 = vmatmul.mubr.msk.f32.gmra.mxu1 %vm486_vm2, %v3540_v63  ;;  %v2846_v63 = vmul.f32 %v6407_v28, %v9437_v11  ;;  %v6409_v11 = vld [vmem:[%s10623_s0 + $0xb8] sm:$0xff] }
 0x45e   :  { %v3436_v57 = vpop.permute.xlu0 %3435  ;;  %v3510_v16 = vsel %vm408_vm0, %v2838_v8, %v3300_v38  ;;  %v6408_v38 = vld [vmem:[%s10623_s0 + $0xa0] sm:$0xff] }
 0x45f   :  { %v3542_v6 = vsel %vm441_vm1, %v3510_v16, %v3428_v27 }
 0x461   :  { %v3298_v61 = vpop.permute.xlu1 %3297 }
 0x462   :  { %v3509_v24 = vsel %vm408_vm0, %v2837_v30, %v3298_v61  ;;  %v3434_v25 = vpop.permute.xlu0 %3433 }
 0x463   :  { %v3541_v18 = vsel %vm441_vm1, %v3509_v24, %v3426_v40 }
 0x464   :  { %5594 = vmatprep.mubr.msk.f32.mxu1 %vm486_vm2, %v3541_v18 }
 0x465   :  { %v3304_v60 = vpop.permute.xlu1 %3303  ;;  %5595 = vmatmul.mubr.msk.f32.gmra.mxu1 %vm486_vm2, %v3542_v6 }
 0x466   :  { %v3440_v41 = vpop.permute.xlu0 %3439  ;;  %v3512_v7 = vsel %vm408_vm0, %v2840_v32, %v3304_v60 }
 0x467   :  { %v3544_v27 = vsel %vm441_vm1, %v3512_v7, %v3432_v58  ;;  %v2844_v58 = vmul.f32 %v6405_v15, %v9385_v34  ;;  %v6412_v7 = vld [vmem:[%s10623_s0 + $0xc0] sm:$0xff] }
 0x469   :  { %v3302_v33 = vpop.permute.xlu1 %3301 }
 0x46a   :  { %v3511_v49 = vsel %vm408_vm0, %v2839_v35, %v3302_v33  ;;  %v3438_v5 = vpop.permute.xlu0 %3437  ;;  %v2849_v33 = vmul.f32 %v6412_v7, %v9574_v23  ;;  %v6413_v23 = vld [vmem:[%s10623_s0 + $0xd8] sm:$0xff] }
 0x46b   :  { %v3543_v3 = vsel %vm441_vm1, %v3511_v49, %v3430_v43 }
 0x46c   :  { %5597 = vmatprep.mubr.msk.f32.mxu1 %vm486_vm2, %v3543_v3 }
 0x46d   :  { %v3308_v14 = vpop.permute.xlu1 %3307  ;;  %5598 = vmatmul.mubr.msk.f32.gmra.mxu1 %vm486_vm2, %v3544_v27 }
 0x46e   :  { %v3444_v39 = vpop.permute.xlu0 %3443  ;;  %v3514_v0 = vsel %vm408_vm0, %v2842_v29, %v3308_v14  ;;  %v2852_v29 = vmul.f32 %v6413_v23, %v9585_v47  ;;  %v6415_v47 = vld [vmem:[%s10623_s0 + $0xe0] sm:$0xff] }
 0x46f   :  { %v3546_v1 = vsel %vm441_vm1, %v3514_v0, %v3436_v57  ;;  %v2845_v57 = vmul.f32 %v6408_v38, %v9472_v55  ;;  %v2848_v55 = vmul.f32 %v6409_v11, %v9485_v9  ;;  %v6411_v9 = vld [vmem:[%s10623_s0 + $0xc8] sm:$0xff]  ;;  %v10031_v23 = vld [vmem:[%s10629_s6] ss:$0 sm:$0xff] }
 0x471   :  { %v3306_v36 = vpop.permute.xlu1 %3305 }
 0x472   :  { %v3513_v59 = vsel %vm408_vm0, %v2841_v62, %v3306_v36  ;;  %v3442_v40 = vpop.permute.xlu0 %3441  ;;  %v2851_v62 = vmul.f32 %v6414_v13, %v9614_v17  ;;  %v2853_v17 = vmul.f32 %v6415_v47, %v9636_v56 }
 0x473   :  { %v3545_v2 = vsel %vm441_vm1, %v3513_v59, %v3434_v25  ;;  %v6410_v25 = vld [vmem:[%s10623_s0 + $0xb0] sm:$0xff] }
 0x474   :  { %5600 = vmatprep.mubr.msk.f32.mxu1 %vm486_vm2, %v3545_v2  ;;  %v2847_v18 = vmul.f32 %v6410_v25, %v9520_v12  ;;  %v2850_v12 = vmul.f32 %v6411_v9, %v9541_v44 }
 0x475   :  { %v3312_v21 = vpop.permute.xlu1 %3311  ;;  %5601 = vmatmul.mubr.msk.f32.gmra.mxu1 %vm486_vm2, %v3546_v1 }
 0x476   :  { %v3448_v50 = vpop.permute.xlu0 %3447  ;;  %v3516_v48 = vsel %vm408_vm0, %v2844_v58, %v3312_v21 }
 0x477   :  { %v3548_v43 = vsel %vm441_vm1, %v3516_v48, %v3440_v41 }
 0x479   :  { %v3310_v42 = vpop.permute.xlu1 %3309 }
 0x47a   :  { %v3515_v51 = vsel %vm408_vm0, %v2843_v22, %v3310_v42  ;;  %v3446_v54 = vpop.permute.xlu0 %3445 }
 0x47b   :  { %v3547_v20 = vsel %vm441_vm1, %v3515_v51, %v3438_v5 }
 0x47c   :  { %5603 = vmatprep.mubr.msk.f32.mxu1 %vm486_vm2, %v3547_v20  ;;  %v6418_v20 = vld [vmem:[%s10623_s0 + $0xf8] sm:$0xff] }
 0x47d   :  { %v3316_v26 = vpop.permute.xlu1 %3315  ;;  %5604 = vmatmul.mubr.msk.f32.gmra.mxu1 %vm486_vm2, %v3548_v43  ;;  %v2856_v43 = vmul.f32 %v6418_v20, %v9670_v45  ;;  %v4327_v45 = vld [vmem:[%s10631_s8 + $0x10] sm:$0xff] }
 0x47e   :  { %v3452_v34 = vpop.permute.xlu0 %3451  ;;  %v3518_v37 = vsel %vm408_vm0, %v2846_v63, %v3316_v26 }
 0x47f   :  { %v3550_v16 = vsel %vm441_vm1, %v3518_v37, %v3444_v39  ;;  %v4326_v37 = vld [vmem:[%s10631_s8 + $0x8] sm:$0xff] }
 0x481   :  { %v3314_v8 = vpop.permute.xlu1 %3313 }
 0x482   :  { %v3517_v19 = vsel %vm408_vm0, %v2845_v57, %v3314_v8  ;;  %v3450_v61 = vpop.permute.xlu0 %3449 }
 0x483   :  { %v3549_v30 = vsel %vm441_vm1, %v3517_v19, %v3442_v40  ;;  %v4325_v19 = vld [vmem:[%s10631_s8] sm:$0xff] }
 0x484   :  { %5606 = vmatprep.mubr.msk.f32.mxu1 %vm486_vm2, %v3549_v30 }
 0x485   :  { %v3320_v24 = vpop.permute.xlu1 %3319  ;;  %5607 = vmatmul.mubr.msk.f32.gmra.mxu1 %vm486_vm2, %v3550_v16 }
 0x486   :  { %v3520_v6 = vsel %vm408_vm0, %v2848_v55, %v3320_v24  ;;  %v3456_v52 = vpop.permute.xlu0 %3455 }
 0x487   :  { %v3552_v10 = vsel %vm441_vm1, %v3520_v6, %v3448_v50  ;;  %v6416_v50 = vld [vmem:[%s10623_s0 + $0xe8] sm:$0xff] }
 0x488   :  { %v2854_v15 = vmul.f32 %v6416_v50, %v9634_v46 }
 0x489   :  { %v3318_v60 = vpop.permute.xlu1 %3317 }
 0x48a   :  { %v3519_v41 = vsel %vm408_vm0, %v2847_v18, %v3318_v60  ;;  %v3454_v49 = vpop.permute.xlu0 %3453 }
 0x48b   :  { %v3551_v32 = vsel %vm441_vm1, %v3519_v41, %v3446_v54  ;;  %v6417_v54 = vld [vmem:[%s10623_s0 + $0xf0] sm:$0xff] }
 0x48c   :  { %5609 = vmatprep.mubr.msk.f32.mxu1 %vm486_vm2, %v3551_v32  ;;  %v2855_v46 = vmul.f32 %v6417_v54, %v9656_v4  ;;  %v4328_v4 = vld [vmem:[%s10631_s8 + $0x18] sm:$0xff] }
 0x48d   :  { %v3324_v35 = vpop.permute.xlu1 %3323  ;;  %5610 = vmatmul.mubr.msk.f32.gmra.mxu1 %vm486_vm2, %v3552_v10  ;;  %5624 = vmatprep.subr.mxu0 %v4328_v4 }
 0x48e   :  { %v3522_v5 = vsel %vm408_vm0, %v2850_v12, %v3324_v35  ;;  %v3332_v44 = vpop.permute.xlu0 %3331  ;;  %5625 = vmatpush3.msra.mxu0 %v4328_v4 }
 0x48f   :  { %v3554_v39 = vsel %vm441_vm1, %v3522_v5, %v3452_v34  ;;  %v3526_v22 = vsel %vm408_vm0, %v2854_v15, %v3332_v44  ;;  %5626 = vmatprep.subr.mxu0 %v4327_v45 }
 0x490   :  { %5627 = vmatpush3.msra.mxu0 %v4327_v45 }
 0x491   :  { %v3322_v3 = vpop.permute.xlu1 %3321  ;;  %5628 = vmatprep.subr.mxu0 %v4326_v37 }
 0x492   :  { %v3521_v27 = vsel %vm408_vm0, %v2849_v33, %v3322_v3  ;;  %v3460_v2 = vpop.permute.xlu0 %3459  ;;  %5629 = vmatpush3.msra.mxu0 %v4326_v37 }
 0x493   :  { %v3553_v14 = vsel %vm441_vm1, %v3521_v27, %v3450_v61  ;;  %v3558_v51 = vsel %vm441_vm1, %v3526_v22, %v3460_v2  ;;  %5630 = vmatprep.subr.mxu0 %v4325_v19 }
 0x494   :  { %5612 = vmatprep.mubr.msk.f32.mxu1 %vm486_vm2, %v3553_v14  ;;  %5631 = vmatpush3.msra.mxu0 %v4325_v19 }
 0x495   :  { %v3328_v31 = vpop.permute.xlu1 %3327  ;;  %5613 = vmatmul.mubr.msk.f32.gmra.mxu1 %vm486_vm2, %v3554_v39 }
 0x496   :  { %v3524_v0 = vsel %vm408_vm0, %v2852_v29, %v3328_v31  ;;  %v3336_v48 = vpop.permute.xlu0 %3335 }
 0x497   :  { %v3556_v1 = vsel %vm441_vm1, %v3524_v0, %v3456_v52  ;;  %v3528_v63 = vsel %vm408_vm0, %v2856_v43, %v3336_v48 }
 0x499   :  { %v3326_v36 = vpop.permute.xlu1 %3325 }
 0x49a   :  { %v3523_v59 = vsel %vm408_vm0, %v2851_v62, %v3326_v36  ;;  %v3464_v26 = vpop.permute.xlu0 %3463  ;;  %v10042_v62 = vld [vmem:[%s10630_s7] ss:$0 sm:$0xff] }
 0x49b   :  { %v3555_v40 = vsel %vm441_vm1, %v3523_v59, %v3454_v49  ;;  %v3560_v57 = vsel %vm441_vm1, %v3528_v63, %v3464_v26 }
 0x49c   :  { %5615 = vmatprep.mubr.msk.f32.mxu1 %vm486_vm2, %v3555_v40  ;;  %v10052_v40 = vstv %s5187_s2 }
 0x49d   :  { %v3330_v21 = vpop.permute.xlu1 %3329  ;;  %5616 = vmatmul.mubr.msk.f32.gmra.mxu1 %vm486_vm2, %v3556_v1 }
 0x49e   :  { %v3525_v58 = vsel %vm408_vm0, %v2853_v17, %v3330_v21 }
 0x4a1   :  { %v3458_v53 = vpop.permute.xlu1 %3457 }
 0x4a2   :  { %v3557_v42 = vsel %vm441_vm1, %v3525_v58, %v3458_v53 }
 0x4a3   :  { %5618 = vmatprep.mubr.msk.f32.mxu1 %vm486_vm2, %v3557_v42 }
 0x4a4   :  { %5619 = vmatmul.mubr.msk.f32.gmra.mxu1 %vm486_vm2, %v3558_v51 }
 0x4a5   :  { %v3334_v56 = vpop.permute.xlu1 %3333 }
 0x4a6   :  { %v3527_v34 = vsel %vm408_vm0, %v2855_v46, %v3334_v56 }
 0x4a9   :  { %v3462_v28 = vpop.permute.xlu1 %3461 }
 0x4aa   :  { %v3559_v38 = vsel %vm441_vm1, %v3527_v34, %v3462_v28 }
 0x4ab   :  { %5621 = vmatprep.mubr.msk.f32.mxu1 %vm486_vm2, %v3559_v38 }
 0x4ac   :  { %5622 = vmatmul.mubr.msk.f32.gmra.mxu1 %vm486_vm2, %v3560_v57 }
 0x4f5   :  { %v9918_v8 = vpop.f32.mrf.mxu1 }
 0x4f6   :  { %4006 = vrot.lane.b32.xlu0 %v9918_v8, %s6441_s1  ;;  %v3902_v29 = vmul.f32 %v9918_v8, %v10031_v23 }
 0x4f7   :  { %v3735_v30 = vpop.f32.mrf.mxu1 }
 0x4f8   :  { %4004 = vrot.lane.b32.xlu1 %v3735_v30, %s6441_s1  ;;  %v3901_v0 = vmul.f32 %v10031_v23, %v3735_v30  ;;  %v3941_v59 = vadd.f32 %v10042_v62, %v3902_v29 }
 0x4fa   :  { %v3940_v21 = vadd.f32 %v10042_v62, %v3901_v0 }
 0x4fd   :  { %v9926_v16 = vpop.f32.mrf.mxu1 }
 0x4fe   :  { %4010 = vrot.lane.b32.xlu0 %v9926_v16, %s6441_s1  ;;  %v3904_v17 = vmul.f32 %v9926_v16, %v10031_v23 }
 0x4ff   :  { %v9930_v61 = vpop.f32.mrf.mxu1 }
 0x500   :  { %4008 = vrot.lane.b32.xlu1 %v9930_v61, %s6441_s1  ;;  %v3903_v53 = vmul.f32 %v10031_v23, %v9930_v61  ;;  %v3943_v54 = vadd.f32 %v10042_v62, %v3904_v17 }
 0x502   :  { %v3942_v28 = vadd.f32 %v10042_v62, %v3903_v53 }
 0x505   :  { %v9934_v24 = vpop.f32.mrf.mxu1 }
 0x506   :  { %4014 = vrot.lane.b32.xlu0 %v9934_v24, %s6441_s1  ;;  %v3906_v63 = vmul.f32 %v9934_v24, %v10031_v23 }
 0x507   :  { %v9938_v11 = vpop.f32.mrf.mxu1 }
 0x508   :  { %4012 = vrot.lane.b32.xlu1 %v9938_v11, %s6441_s1  ;;  %v3905_v8 = vmul.f32 %v10031_v23, %v9938_v11  ;;  %v3945_v61 = vadd.f32 %v10042_v62, %v3906_v63 }
 0x50a   :  { %v3944_v11 = vadd.f32 %v10042_v62, %v3905_v8 }
 0x50d   :  { %v9942_v55 = vpop.f32.mrf.mxu1 }
 0x50e   :  { %4018 = vrot.lane.b32.xlu0 %v9942_v55, %s6441_s1 }
 0x50f   :  { %v9946_v25 = vpop.f32.mrf.mxu1 }
 0x510   :  { %4016 = vrot.lane.b32.xlu1 %v9946_v25, %s6441_s1 }
 0x515   :  { %v9950_v18 = vpop.f32.mrf.mxu1 }
 0x516   :  { %4022 = vrot.lane.b32.xlu0 %v9950_v18, %s6441_s1 }
 0x517   :  { %v9954_v6 = vpop.f32.mrf.mxu1 }
 0x518   :  { %4020 = vrot.lane.b32.xlu1 %v9954_v6, %s6441_s1 }
 0x51d   :  { %v9958_v60 = vpop.f32.mrf.mxu1 }
 0x51e   :  { %4026 = vrot.lane.b32.xlu0 %v9958_v60, %s6441_s1 }
 0x51f   :  { %v9962_v41 = vpop.f32.mrf.mxu1 }
 0x520   :  { %4024 = vrot.lane.b32.xlu1 %v9962_v41, %s6441_s1 }
 0x525   :  { %v9966_v52 = vpop.f32.mrf.mxu1 }
 0x526   :  { %4030 = vrot.lane.b32.xlu0 %v9966_v52, %s6441_s1 }
 0x527   :  { %v9970_v32 = vpop.f32.mrf.mxu1 }
 0x528   :  { %4028 = vrot.lane.b32.xlu1 %v9970_v32, %s6441_s1 }
 0x52d   :  { %v9974_v10 = vpop.f32.mrf.mxu1 }
 0x52e   :  { %4034 = vrot.lane.b32.xlu0 %v9974_v10, %s6441_s1 }
 0x52f   :  { %v9978_v35 = vpop.f32.mrf.mxu1 }
 0x530   :  { %4032 = vrot.lane.b32.xlu1 %v9978_v35, %s6441_s1 }
 0x535   :  { %v9982_v9 = vpop.f32.mrf.mxu1 }
 0x536   :  { %4038 = vrot.lane.b32.xlu0 %v9982_v9, %s6441_s1 }
 0x537   :  { %v9986_v12 = vpop.f32.mrf.mxu1 }
 0x538   :  { %4036 = vrot.lane.b32.xlu1 %v9986_v12, %s6441_s1 }
 0x53d   :  { %v9990_v7 = vpop.f32.mrf.mxu1 }
 0x53e   :  { %4042 = vrot.lane.b32.xlu0 %v9990_v7, %s6441_s1 }
 0x53f   :  { %v9994_v33 = vpop.f32.mrf.mxu1 }
 0x540   :  { %4040 = vrot.lane.b32.xlu1 %v9994_v33, %s6441_s1 }
 0x545   :  { %v9998_v49 = vpop.f32.mrf.mxu1 }
 0x546   :  { %4046 = vrot.lane.b32.xlu0 %v9998_v49, %s6441_s1 }
 0x547   :  { %v10002_v5 = vpop.f32.mrf.mxu1 }
 0x548   :  { %4044 = vrot.lane.b32.xlu1 %v10002_v5, %s6441_s1 }
 0x54d   :  { %v10006_v3 = vpop.f32.mrf.mxu1 }
 0x54e   :  { %4050 = vrot.lane.b32.xlu0 %v10006_v3, %s6441_s1 }
 0x54f   :  { %v10010_v27 = vpop.f32.mrf.mxu1 }
 0x550   :  { %4048 = vrot.lane.b32.xlu1 %v10010_v27, %s6441_s1 }
 0x555   :  { %v10014_v14 = vpop.f32.mrf.mxu1 }
 0x556   :  { %4054 = vrot.lane.b32.xlu0 %v10014_v14, %s6441_s1 }
 0x557   :  { %v10018_v39 = vpop.f32.mrf.mxu1 }
 0x558   :  { %4052 = vrot.lane.b32.xlu1 %v10018_v39, %s6441_s1 }
 0x55d   :  { %v10022_v31 = vpop.f32.mrf.mxu1 }
 0x55e   :  { %4058 = vrot.lane.b32.xlu0 %v10022_v31, %s6441_s1 }
 0x55f   :  { %v10026_v44 = vpop.f32.mrf.mxu1 }
 0x560   :  { %4056 = vrot.lane.b32.xlu1 %v10026_v44, %s6441_s1 }
 0x564   :  { %v10037_v13 = vpop.f32.mrf.mxu1 }
 0x565   :  { %4062 = vrot.lane.b32.xlu0 %v10037_v13, %s6441_s1 }
 0x566   :  { %v10047_v36 = vpop.f32.mrf.mxu1 }
 0x567   :  { %4060 = vrot.lane.b32.xlu1 %v10047_v36, %s6441_s1 }
 0x568   :  { %v4007_v2 = vpop.permute.xlu0 %4006 }
 0x569   :  { %v4101_v1 = vadd.f32 %v4007_v2, %v3941_v59 }
 0x56a   :  { %v4005_v47 = vpop.permute.xlu1 %4004 }
 0x56b   :  { %vm4133_vm3 = vcmp.ge.f32.partialorder %v4101_v1, 0.0  ;;  %v4166_v50 = vmul.f32 %v10052_v40, %v4101_v1  ;;  %v4100_v15 = vadd.f32 %v4005_v47, %v3940_v21  ;;  %v4262_v26 = vmul.f32 0.5, %v4101_v1 }
 0x56c   :  { %v10058_v58 = vpop.f32.mrf.mxu1  ;;  %v3908_v21 = vmul.f32 %v9942_v55, %v10031_v23 }
 0x56d   :  { %v10062_v22 = vsel %vm4133_vm3, %v4101_v1, %v4166_v50  ;;  %vm4132_vm4 = vcmp.ge.f32.partialorder %v4100_v15, 0.0  ;;  %v4165_v48 = vmul.f32 %v10052_v40, %v4100_v15  ;;  %4066 = vrot.lane.b32.xlu0 %v10058_v58, %s6441_s1  ;;  %v4261_v46 = vmul.f32 0.5, %v4100_v15 }
 0x56e   :  { %v10067_v42 = vpop.f32.mrf.mxu1  ;;  %v4230_v51 = vmul.f32 0.5, %v10062_v22 }
 0x56f   :  { %v10070_v56 = vsel %vm4132_vm4, %v4100_v15, %v4165_v48  ;;  %4064 = vrot.lane.b32.xlu1 %v10067_v42, %s6441_s1  ;;  %v3907_v48 = vmul.f32 %v10031_v23, %v9946_v25 }
 0x570   :  { %v4011_v20 = vpop.permute.xlu0 %4010  ;;  %v4229_v43 = vmul.f32 0.5, %v10070_v56  ;;  %v4294_v4 = vadd.f32 %v4262_v26, %v4230_v51 }
 0x571   :  { %v4103_v34 = vadd.f32 %v4011_v20, %v3943_v54  ;;  %v3946_v25 = vadd.f32 %v10042_v62, %v3907_v48 }
 0x572   :  { %v4009_v38 = vpop.permute.xlu1 %4008  ;;  %v4293_v57 = vadd.f32 %v4261_v46, %v4229_v43  ;;  %v3947_v46 = vadd.f32 %v10042_v62, %v3908_v21 }
 0x573   :  { %vm4135_vm5 = vcmp.ge.f32.partialorder %v4103_v34, 0.0  ;;  %v4168_v45 = vmul.f32 %v10052_v40, %v4103_v34  ;;  %v4102_v37 = vadd.f32 %v4009_v38, %v3942_v28  ;;  %v4264_v2 = vmul.f32 0.5, %v4103_v34 }
 0x574   :  { %5632 = vmatprep.mubr.msk.f32.mxu0 %vm408_vm0, %v4293_v57  ;;  %v3910_v38 = vmul.f32 %v9950_v18, %v10031_v23 }
 0x575   :  { %v10083_v19 = vsel %vm4135_vm5, %v4103_v34, %v4168_v45  ;;  %vm4134_vm6 = vcmp.ge.f32.partialorder %v4102_v37, 0.0  ;;  %v4167_v30 = vmul.f32 %v10052_v40, %v4102_v37  ;;  %5633 = vmatmul.mubr.msk.f32.vlgmr.msra.gmra.mxu0 %vm408_vm0, %v4294_v4  ;;  %v4263_v29 = vmul.f32 0.5, %v4102_v37 }
 0x576   :  { %v4232_v24 = vmul.f32 0.5, %v10083_v19 }
 0x577   :  { %v10087_v16 = vsel %vm4134_vm6, %v4102_v37, %v4167_v30  ;;  %v3909_v30 = vmul.f32 %v10031_v23, %v9954_v6 }
 0x578   :  { %v4015_v0 = vpop.permute.xlu0 %4014  ;;  %v4231_v59 = vmul.f32 0.5, %v10087_v16  ;;  %v4296_v53 = vadd.f32 %v4264_v2, %v4232_v24 }
 0x579   :  { %v4105_v1 = vadd.f32 %v4015_v0, %v3945_v61  ;;  %v3948_v6 = vadd.f32 %v10042_v62, %v3909_v30 }
 0x57a   :  { %v4013_v47 = vpop.permute.xlu1 %4012  ;;  %v4295_v17 = vadd.f32 %v4263_v29, %v4231_v59  ;;  %v3949_v29 = vadd.f32 %v10042_v62, %v3910_v38 }
 0x57b   :  { %vm4137_vm7 = vcmp.ge.f32.partialorder %v4105_v1, 0.0  ;;  %v4170_v50 = vmul.f32 %v10052_v40, %v4105_v1  ;;  %v4104_v15 = vadd.f32 %v4013_v47, %v3944_v11  ;;  %v4266_v28 = vmul.f32 0.5, %v4105_v1 }
 0x57c   :  { %5635 = vmatprep.mubr.msk.f32.mxu0 %vm408_vm0, %v4295_v17  ;;  %v3912_v47 = vmul.f32 %v9958_v60, %v10031_v23 }
 0x57d   :  { %v10099_v51 = vsel %vm4137_vm7, %v4105_v1, %v4170_v50  ;;  %vm4136_vm8 = vcmp.ge.f32.partialorder %v4104_v15, 0.0  ;;  %v4169_v54 = vmul.f32 %v10052_v40, %v4104_v15  ;;  %5636 = vmatmul.mubr.msk.f32.gmra.mxu0 %vm408_vm0, %v4296_v53  ;;  %v4265_v43 = vmul.f32 0.5, %v4104_v15 }
 0x57e   :  { %v4234_v20 = vmul.f32 0.5, %v10099_v51 }
 0x57f   :  { %v10103_v55 = vsel %vm4136_vm8, %v4104_v15, %v4169_v54  ;;  %v3911_v54 = vmul.f32 %v10031_v23, %v9962_v41 }
 0x580   :  { %v4019_v26 = vpop.permute.xlu0 %4018  ;;  %v4233_v34 = vmul.f32 0.5, %v10103_v55  ;;  %v4298_v8 = vadd.f32 %v4266_v28, %v4234_v20 }
 0x581   :  { %v4107_v63 = vadd.f32 %v4019_v26, %v3947_v46  ;;  %v3950_v41 = vadd.f32 %v10042_v62, %v3911_v54 }
 0x582   :  { %v4017_v57 = vpop.permute.xlu1 %4016  ;;  %v4297_v4 = vadd.f32 %v4265_v43, %v4233_v34  ;;  %v3951_v43 = vadd.f32 %v10042_v62, %v3912_v47 }
 0x583   :  { %vm4139_vm9 = vcmp.ge.f32.partialorder %v4107_v63, 0.0  ;;  %v4172_v45 = vmul.f32 %v10052_v40, %v4107_v63  ;;  %v4106_v37 = vadd.f32 %v4017_v57, %v3946_v25  ;;  %v4268_v11 = vmul.f32 0.5, %v4107_v63 }
 0x584   :  { %5638 = vmatprep.mubr.msk.f32.mxu0 %vm408_vm0, %v4297_v4  ;;  %v3914_v57 = vmul.f32 %v9966_v52, %v10031_v23 }
 0x585   :  { %v10115_v61 = vsel %vm4139_vm9, %v4107_v63, %v4172_v45  ;;  %vm4138_vm10 = vcmp.ge.f32.partialorder %v4106_v37, 0.0  ;;  %v4171_v24 = vmul.f32 %v10052_v40, %v4106_v37  ;;  %5639 = vmatmul.mubr.msk.f32.gmra.mxu0 %vm408_vm0, %v4298_v8  ;;  %v4267_v59 = vmul.f32 0.5, %v4106_v37 }
 0x586   :  { %v4236_v0 = vmul.f32 0.5, %v10115_v61 }
 0x587   :  { %v10119_v18 = vsel %vm4138_vm10, %v4106_v37, %v4171_v24  ;;  %v3913_v24 = vmul.f32 %v10031_v23, %v9970_v32 }
 0x588   :  { %v4023_v2 = vpop.permute.xlu0 %4022  ;;  %v4235_v1 = vmul.f32 0.5, %v10119_v18  ;;  %v4300_v48 = vadd.f32 %v4268_v11, %v4236_v0 }
 0x589   :  { %v4109_v21 = vadd.f32 %v4023_v2, %v3949_v29  ;;  %v3952_v32 = vadd.f32 %v10042_v62, %v3913_v24 }
 0x58a   :  { %v4021_v17 = vpop.permute.xlu1 %4020  ;;  %v4299_v50 = vadd.f32 %v4267_v59, %v4235_v1  ;;  %v3953_v59 = vadd.f32 %v10042_v62, %v3914_v57 }
 0x58b   :  { %vm4141_vm11 = vcmp.ge.f32.partialorder %v4109_v21, 0.0  ;;  %v4174_v15 = vmul.f32 %v10052_v40, %v4109_v21  ;;  %v4108_v53 = vadd.f32 %v4021_v17, %v3948_v6  ;;  %v4270_v25 = vmul.f32 0.5, %v4109_v21 }
 0x58c   :  { %5641 = vmatprep.mubr.msk.f32.mxu0 %vm408_vm0, %v4299_v50  ;;  %v3916_v17 = vmul.f32 %v9974_v10, %v10031_v23 }
 0x58d   :  { %v10131_v46 = vsel %vm4141_vm11, %v4109_v21, %v4174_v15  ;;  %vm4140_vm12 = vcmp.ge.f32.partialorder %v4108_v53, 0.0  ;;  %v4173_v20 = vmul.f32 %v10052_v40, %v4108_v53  ;;  %5642 = vmatmul.mubr.msk.f32.gmra.mxu0 %vm408_vm0, %v4300_v48  ;;  %v4269_v34 = vmul.f32 0.5, %v4108_v53 }
 0x58e   :  { %v4238_v26 = vmul.f32 0.5, %v10131_v46 }
 0x58f   :  { %v10135_v60 = vsel %vm4140_vm12, %v4108_v53, %v4173_v20  ;;  %v3915_v20 = vmul.f32 %v10031_v23, %v9978_v35 }
 0x590   :  { %v4027_v28 = vpop.permute.xlu0 %4026  ;;  %v4237_v63 = vmul.f32 0.5, %v10135_v60  ;;  %v4302_v30 = vadd.f32 %v4270_v25, %v4238_v26 }
 0x591   :  { %v4111_v38 = vadd.f32 %v4027_v28, %v3951_v43  ;;  %v3954_v35 = vadd.f32 %v10042_v62, %v3915_v20 }
 0x592   :  { %v4025_v4 = vpop.permute.xlu1 %4024  ;;  %v4301_v45 = vadd.f32 %v4269_v34, %v4237_v63  ;;  %v3955_v34 = vadd.f32 %v10042_v62, %v3916_v17 }
 0x593   :  { %vm4143_vm13 = vcmp.ge.f32.partialorder %v4111_v38, 0.0  ;;  %v4176_v37 = vmul.f32 %v10052_v40, %v4111_v38  ;;  %v4110_v8 = vadd.f32 %v4025_v4, %v3950_v41  ;;  %v4272_v6 = vmul.f32 0.5, %v4111_v38 }
 0x594   :  { %5644 = vmatprep.mubr.msk.f32.mxu0 %vm408_vm0, %v4301_v45  ;;  %v3918_v4 = vmul.f32 %v9982_v9, %v10031_v23 }
 0x595   :  { %v10147_v29 = vsel %vm4143_vm13, %v4111_v38, %v4176_v37  ;;  %vm4142_vm14 = vcmp.ge.f32.partialorder %v4110_v8, 0.0  ;;  %v4175_v0 = vmul.f32 %v10052_v40, %v4110_v8  ;;  %5645 = vmatmul.mubr.msk.f32.gmra.mxu0 %vm408_vm0, %v4302_v30  ;;  %v4271_v1 = vmul.f32 0.5, %v4110_v8 }
 0x596   :  { %v4240_v2 = vmul.f32 0.5, %v10147_v29 }
 0x597   :  { %v10151_v52 = vsel %vm4142_vm14, %v4110_v8, %v4175_v0  ;;  %v3917_v0 = vmul.f32 %v10031_v23, %v9986_v12 }
 0x598   :  { %v4031_v11 = vpop.permute.xlu0 %4030  ;;  %v4239_v21 = vmul.f32 0.5, %v10151_v52  ;;  %v4304_v54 = vadd.f32 %v4272_v6, %v4240_v2 }
 0x599   :  { %v4113_v47 = vadd.f32 %v4031_v11, %v3953_v59  ;;  %v3956_v12 = vadd.f32 %v10042_v62, %v3917_v0 }
 0x59a   :  { %v4029_v50 = vpop.permute.xlu1 %4028  ;;  %v4303_v15 = vadd.f32 %v4271_v1, %v4239_v21  ;;  %v3957_v1 = vadd.f32 %v10042_v62, %v3918_v4 }
 0x59b   :  { %vm4145_vm15 = vcmp.ge.f32.partialorder %v4113_v47, 0.0  ;;  %v4178_v53 = vmul.f32 %v10052_v40, %v4113_v47  ;;  %v4112_v48 = vadd.f32 %v4029_v50, %v3952_v32  ;;  %v4274_v41 = vmul.f32 0.5, %v4113_v47 }
 0x59c   :  { %5647 = vmatprep.mubr.msk.f32.mxu0 %vm408_vm0, %v4303_v15  ;;  %v3920_v50 = vmul.f32 %v9990_v7, %v10031_v23 }
 0x59d   :  { %v10163_v43 = vsel %vm4145_vm15, %v4113_v47, %v4178_v53  ;;  %vm4144_vm1 = vcmp.ge.f32.partialorder %v4112_v48, 0.0  ;;  %v4177_v26 = vmul.f32 %v10052_v40, %v4112_v48  ;;  %5648 = vmatmul.mubr.msk.f32.gmra.mxu0 %vm408_vm0, %v4304_v54  ;;  %v4273_v63 = vmul.f32 0.5, %v4112_v48 }
 0x59e   :  { %v4242_v28 = vmul.f32 0.5, %v10163_v43 }
 0x59f   :  { %v10167_v10 = vsel %vm4144_vm1, %v4112_v48, %v4177_v26  ;;  %v3919_v26 = vmul.f32 %v10031_v23, %v9994_v33 }
 0x5a0   :  { %v4035_v25 = vpop.permute.xlu0 %4034  ;;  %v4241_v38 = vmul.f32 0.5, %v10167_v10  ;;  %v4306_v24 = vadd.f32 %v4274_v41, %v4242_v28 }
 0x5a1   :  { %v4115_v57 = vadd.f32 %v4035_v25, %v3955_v34  ;;  %v3958_v33 = vadd.f32 %v10042_v62, %v3919_v26  ;;  %v4747_v26 = vld [vmem:[%s10632_s9 + $0x8] sm:$0xff] }
 0x5a2   :  { %v4033_v45 = vpop.permute.xlu1 %4032  ;;  %v4305_v37 = vadd.f32 %v4273_v63, %v4241_v38  ;;  %v3959_v63 = vadd.f32 %v10042_v62, %v3920_v50 }
 0x5a3   :  { %vm4147_vm2 = vcmp.ge.f32.partialorder %v4115_v57, 0.0  ;;  %v4180_v8 = vmul.f32 %v10052_v40, %v4115_v57  ;;  %v4114_v30 = vadd.f32 %v4033_v45, %v3954_v35  ;;  %v4276_v32 = vmul.f32 0.5, %v4115_v57 }
 0x5a4   :  { %5650 = vmatprep.mubr.msk.f32.mxu0 %vm408_vm0, %v4305_v37  ;;  %v3922_v45 = vmul.f32 %v9998_v49, %v10031_v23 }
 0x5a5   :  { %v10179_v59 = vsel %vm4147_vm2, %v4115_v57, %v4180_v8  ;;  %vm4146_vm3 = vcmp.ge.f32.partialorder %v4114_v30, 0.0  ;;  %v4179_v2 = vmul.f32 %v10052_v40, %v4114_v30  ;;  %5651 = vmatmul.mubr.msk.f32.gmra.mxu0 %vm408_vm0, %v4306_v24  ;;  %v4275_v21 = vmul.f32 0.5, %v4114_v30 }
 0x5a6   :  { %v4244_v11 = vmul.f32 0.5, %v10179_v59 }
 0x5a7   :  { %v10183_v9 = vsel %vm4146_vm3, %v4114_v30, %v4179_v2  ;;  %v3921_v2 = vmul.f32 %v10031_v23, %v10002_v5  ;;  %v4749_v5 = vld [vmem:[%s10632_s9 + $0x18] sm:$0xff] }
 0x5a8   :  { %v4039_v6 = vpop.permute.xlu0 %4038  ;;  %v4243_v47 = vmul.f32 0.5, %v10183_v9  ;;  %v4308_v20 = vadd.f32 %v4276_v32, %v4244_v11  ;;  %5680 = vmatprep.subr.mxu1 %v4749_v5 }
 0x5a9   :  { %v4117_v17 = vadd.f32 %v4039_v6, %v3957_v1  ;;  %5681 = vmatpush3.msra.mxu1 %v4749_v5 }
 0x5aa   :  { %v4037_v15 = vpop.permute.xlu1 %4036  ;;  %v4307_v53 = vadd.f32 %v4275_v21, %v4243_v47  ;;  %v3961_v21 = vadd.f32 %v10042_v62, %v3922_v45 }
 0x5ab   :  { %vm4149_vm4 = vcmp.ge.f32.partialorder %v4117_v17, 0.0  ;;  %v4182_v48 = vmul.f32 %v10052_v40, %v4117_v17  ;;  %v4116_v54 = vadd.f32 %v4037_v15, %v3956_v12  ;;  %v4278_v35 = vmul.f32 0.5, %v4117_v17 }
 0x5ac   :  { %5653 = vmatprep.mubr.msk.f32.mxu0 %vm408_vm0, %v4307_v53  ;;  %v3960_v15 = vadd.f32 %v10042_v62, %v3921_v2  ;;  %v3924_v53 = vmul.f32 %v10006_v3, %v10031_v23  ;;  %v4746_v3 = vld [vmem:[%s10632_s9] sm:$0xff] }
 0x5ad   :  { %v10195_v34 = vsel %vm4149_vm4, %v4117_v17, %v4182_v48  ;;  %vm4148_vm5 = vcmp.ge.f32.partialorder %v4116_v54, 0.0  ;;  %v4181_v28 = vmul.f32 %v10052_v40, %v4116_v54  ;;  %5654 = vmatmul.mubr.msk.f32.gmra.mxu0 %vm408_vm0, %v4308_v20  ;;  %v4277_v38 = vmul.f32 0.5, %v4116_v54  ;;  %v4748_v20 = vld [vmem:[%s10632_s9 + $0x10] sm:$0xff] }
 0x5ae   :  { %v4246_v25 = vmul.f32 0.5, %v10195_v34  ;;  %5682 = vmatprep.subr.mxu1 %v4748_v20 }
 0x5af   :  { %v10199_v7 = vsel %vm4148_vm5, %v4116_v54, %v4181_v28  ;;  %5683 = vmatpush3.msra.mxu1 %v4748_v20 }
 0x5b0   :  { %v4043_v41 = vpop.permute.xlu0 %4042  ;;  %v4245_v57 = vmul.f32 0.5, %v10199_v7  ;;  %v4310_v0 = vadd.f32 %v4278_v35, %v4246_v25  ;;  %5684 = vmatprep.subr.mxu1 %v4747_v26 }
 0x5b1   :  { %v4119_v4 = vadd.f32 %v4043_v41, %v3959_v63  ;;  %5685 = vmatpush3.msra.mxu1 %v4747_v26  ;;  %v3928_v26 = vmul.f32 %v10022_v31, %v10031_v23 }
 0x5b2   :  { %v4041_v37 = vpop.permute.xlu1 %4040  ;;  %v4309_v8 = vadd.f32 %v4277_v38, %v4245_v57  ;;  %v3923_v38 = vmul.f32 %v10031_v23, %v10010_v27  ;;  %5686 = vmatprep.subr.mxu1 %v4746_v3 }
 0x5b3   :  { %vm4151_vm6 = vcmp.ge.f32.partialorder %v4119_v4, 0.0  ;;  %v4184_v30 = vmul.f32 %v10052_v40, %v4119_v4  ;;  %v4118_v24 = vadd.f32 %v4041_v37, %v3958_v33  ;;  %v4280_v12 = vmul.f32 0.5, %v4119_v4  ;;  %5687 = vmatpush3.msra.mxu1 %v4746_v3 }
 0x5b4   :  { %5656 = vmatprep.mubr.msk.f32.mxu0 %vm408_vm0, %v4309_v8 }
 0x5b5   :  { %v10211_v1 = vsel %vm4151_vm6, %v4119_v4, %v4184_v30  ;;  %vm4150_vm7 = vcmp.ge.f32.partialorder %v4118_v24, 0.0  ;;  %v4183_v11 = vmul.f32 %v10052_v40, %v4118_v24  ;;  %5657 = vmatmul.mubr.msk.f32.gmra.mxu0 %vm408_vm0, %v4310_v0  ;;  %v4279_v47 = vmul.f32 0.5, %v4118_v24 }
 0x5b6   :  { %v4248_v6 = vmul.f32 0.5, %v10211_v1  ;;  %v3963_v4 = vadd.f32 %v10042_v62, %v3924_v53  ;;  %v3926_v0 = vmul.f32 %v10014_v14, %v10031_v23 }
 0x5b7   :  { %v10215_v49 = vsel %vm4150_vm7, %v4118_v24, %v4183_v11  ;;  %v3962_v24 = vadd.f32 %v10042_v62, %v3923_v38 }
 0x5b8   :  { %v4047_v32 = vpop.permute.xlu0 %4046  ;;  %v4247_v17 = vmul.f32 0.5, %v10215_v49  ;;  %v4312_v25 = vadd.f32 %v4280_v12, %v4248_v6  ;;  %v3965_v12 = vadd.f32 %v10042_v62, %v3926_v0 }
 0x5b9   :  { %v4121_v50 = vadd.f32 %v4047_v32, %v3961_v21  ;;  %v3925_v32 = vmul.f32 %v10031_v23, %v10018_v39 }
 0x5ba   :  { %v4045_v48 = vpop.permute.xlu1 %4044  ;;  %v4311_v54 = vadd.f32 %v4279_v47, %v4247_v17 }
 0x5bb   :  { %vm4153_vm8 = vcmp.ge.f32.partialorder %v4121_v50, 0.0  ;;  %v4186_v28 = vmul.f32 %v10052_v40, %v4121_v50  ;;  %v4120_v63 = vadd.f32 %v4045_v48, %v3960_v15  ;;  %v4282_v8 = vmul.f32 0.5, %v4121_v50 }
 0x5bc   :  { %5659 = vmatprep.mubr.msk.f32.mxu0 %vm408_vm0, %v4311_v54  ;;  %v3964_v39 = vadd.f32 %v10042_v62, %v3925_v32 }
 0x5bd   :  { %v10239_v41 = vsel %vm4153_vm8, %v4121_v50, %v4186_v28  ;;  %vm4152_vm9 = vcmp.ge.f32.partialorder %v4120_v63, 0.0  ;;  %v4185_v57 = vmul.f32 %v10052_v40, %v4120_v63  ;;  %5660 = vmatmul.mubr.msk.f32.gmra.mxu0 %vm408_vm0, %v4312_v25  ;;  %v4281_v45 = vmul.f32 0.5, %v4120_v63 }
 0x5be   :  { %v4250_v33 = vmul.f32 0.5, %v10239_v41 }
 0x5bf   :  { %v10243_v35 = vsel %vm4152_vm9, %v4120_v63, %v4185_v57  ;;  %v3927_v57 = vmul.f32 %v10031_v23, %v10026_v44 }
 0x5c0   :  { %v4051_v37 = vpop.permute.xlu0 %4050  ;;  %v4249_v27 = vmul.f32 0.5, %v10243_v35  ;;  %v4314_v47 = vadd.f32 %v4282_v8, %v4250_v33 }
 0x5c1   :  { %v4123_v30 = vadd.f32 %v4051_v37, %v3963_v4  ;;  %v3966_v44 = vadd.f32 %v10042_v62, %v3927_v57 }
 0x5c2   :  { %v4049_v2 = vpop.permute.xlu1 %4048  ;;  %v4313_v11 = vadd.f32 %v4281_v45, %v4249_v27  ;;  %v3967_v45 = vadd.f32 %v10042_v62, %v3928_v26 }
 0x5c3   :  { %vm4155_vm10 = vcmp.ge.f32.partialorder %v4123_v30, 0.0  ;;  %v4188_v21 = vmul.f32 %v10052_v40, %v4123_v30  ;;  %v4122_v6 = vadd.f32 %v4049_v2, %v3962_v24  ;;  %v4284_v54 = vmul.f32 0.5, %v4123_v30 }
 0x5c4   :  { %5662 = vmatprep.mubr.msk.f32.mxu0 %vm408_vm0, %v4313_v11  ;;  %v3930_v2 = vmul.f32 %v10037_v13, %v10031_v23 }
 0x5c5   :  { %v10255_v17 = vsel %vm4155_vm10, %v4123_v30, %v4188_v21  ;;  %vm4154_vm11 = vcmp.ge.f32.partialorder %v4122_v6, 0.0  ;;  %v4187_v5 = vmul.f32 %v10052_v40, %v4122_v6  ;;  %5663 = vmatmul.mubr.msk.f32.gmra.mxu0 %vm408_vm0, %v4314_v47  ;;  %v4283_v15 = vmul.f32 0.5, %v4122_v6 }
 0x5c6   :  { %v4252_v50 = vmul.f32 0.5, %v10255_v17  ;;  %v3969_v13 = vadd.f32 %v10042_v62, %v3930_v2 }
 0x5c7   :  { %v10259_v14 = vsel %vm4154_vm11, %v4122_v6, %v4187_v5  ;;  %v3929_v5 = vmul.f32 %v10031_v23, %v10047_v36 }
 0x5c8   :  { %v4055_v53 = vpop.permute.xlu0 %4054  ;;  %v4251_v48 = vmul.f32 0.5, %v10259_v14  ;;  %v4316_v38 = vadd.f32 %v4284_v54, %v4252_v50 }
 0x5c9   :  { %v4125_v20 = vadd.f32 %v4055_v53, %v3965_v12  ;;  %v3968_v54 = vadd.f32 %v10042_v62, %v3929_v5 }
 0x5ca   :  { %v4053_v28 = vpop.permute.xlu1 %4052  ;;  %v4315_v63 = vadd.f32 %v4283_v15, %v4251_v48 }
 0x5cb   :  { %vm4157_vm12 = vcmp.ge.f32.partialorder %v4125_v20, 0.0  ;;  %v4190_v25 = vmul.f32 %v10052_v40, %v4125_v20  ;;  %v4124_v3 = vadd.f32 %v4053_v28, %v3964_v39  ;;  %v4286_v24 = vmul.f32 0.5, %v4125_v20 }
 0x5cc   :  { %5665 = vmatprep.mubr.msk.f32.mxu0 %vm408_vm0, %v4315_v63  ;;  %v3932_v39 = vmul.f32 %v10058_v58, %v10031_v23 }
 0x5cd   :  { %v10271_v4 = vsel %vm4157_vm12, %v4125_v20, %v4190_v25  ;;  %vm4156_vm13 = vcmp.ge.f32.partialorder %v4124_v3, 0.0  ;;  %v4189_v33 = vmul.f32 %v10052_v40, %v4124_v3  ;;  %5666 = vmatmul.mubr.msk.f32.gmra.mxu0 %vm408_vm0, %v4316_v38  ;;  %v4285_v27 = vmul.f32 0.5, %v4124_v3 }
 0x5ce   :  { %v4254_v37 = vmul.f32 0.5, %v10271_v4  ;;  %v3931_v38 = vmul.f32 %v10031_v23, %v10067_v42 }
 0x5cf   :  { %v10275_v31 = vsel %vm4156_vm13, %v4124_v3, %v4189_v33 }
 0x5d0   :  { %v4059_v8 = vpop.permute.xlu0 %4058  ;;  %v4253_v30 = vmul.f32 0.5, %v10275_v31  ;;  %v4318_v32 = vadd.f32 %v4286_v24, %v4254_v37 }
 0x5d1   :  { %v4127_v0 = vadd.f32 %v4059_v8, %v3967_v45 }
 0x5d2   :  { %v4057_v11 = vpop.permute.xlu1 %4056  ;;  %v4317_v21 = vadd.f32 %v4285_v27, %v4253_v30  ;;  %v3971_v27 = vadd.f32 %v10042_v62, %v3932_v39 }
 0x5d3   :  { %vm4159_vm14 = vcmp.ge.f32.partialorder %v4127_v0, 0.0  ;;  %v4192_v6 = vmul.f32 %v10052_v40, %v4127_v0  ;;  %v4126_v47 = vadd.f32 %v4057_v11, %v3966_v44  ;;  %v4288_v63 = vmul.f32 0.5, %v4127_v0 }
 0x5d4   :  { %5668 = vmatprep.mubr.msk.f32.mxu0 %vm408_vm0, %v4317_v21  ;;  %v3970_v44 = vadd.f32 %v10042_v62, %v3931_v38 }
 0x5d5   :  { %v10287_v12 = vsel %vm4159_vm14, %v4127_v0, %v4192_v6  ;;  %vm4158_vm15 = vcmp.ge.f32.partialorder %v4126_v47, 0.0  ;;  %v4191_v50 = vmul.f32 %v10052_v40, %v4126_v47  ;;  %5669 = vmatmul.mubr.msk.f32.gmra.mxu0 %vm408_vm0, %v4318_v32  ;;  %v4287_v26 = vmul.f32 0.5, %v4126_v47 }
 0x5d6   :  { %v4256_v36 = vmul.f32 0.5, %v10287_v12 }
 0x5d7   :  { %v10292_v15 = vsel %vm4158_vm15, %v4126_v47, %v4191_v50  ;;  %v4063_v53 = vpop.permute.xlu0 %4062 }
 0x5d8   :  { %v4129_v48 = vadd.f32 %v4063_v53, %v3969_v13  ;;  %v4255_v20 = vmul.f32 0.5, %v10292_v15  ;;  %v4320_v37 = vadd.f32 %v4288_v63, %v4256_v36 }
 0x5d9   :  { %v4061_v28 = vpop.permute.xlu1 %4060 }
 0x5da   :  { %vm4161_vm1 = vcmp.ge.f32.partialorder %v4129_v48, 0.0  ;;  %v4194_v25 = vmul.f32 %v10052_v40, %v4129_v48  ;;  %v4128_v3 = vadd.f32 %v4061_v28, %v3968_v54  ;;  %v4319_v57 = vadd.f32 %v4287_v26, %v4255_v20 }
 0x5db   :  { %v4290_v42 = vmul.f32 0.5, %v4129_v48 }
 0x5dc   :  { %v10302_v33 = vsel %vm4161_vm1, %v4129_v48, %v4194_v25  ;;  %vm4160_vm2 = vcmp.ge.f32.partialorder %v4128_v3, 0.0  ;;  %v4193_v45 = vmul.f32 %v10052_v40, %v4128_v3  ;;  %5671 = vmatprep.mubr.msk.f32.mxu0 %vm408_vm0, %v4319_v57  ;;  %v4289_v30 = vmul.f32 0.5, %v4128_v3 }
 0x5dd   :  { %5672 = vmatmul.mubr.msk.f32.gmra.mxu0 %vm408_vm0, %v4320_v37  ;;  %v4258_v8 = vmul.f32 0.5, %v10302_v33 }
 0x5de   :  { %v10306_v58 = vsel %vm4160_vm2, %v4128_v3, %v4193_v45 }
 0x5df   :  { %v4067_v24 = vpop.permute.xlu0 %4066  ;;  %v4257_v23 = vmul.f32 0.5, %v10306_v58  ;;  %v4322_v47 = vadd.f32 %v4290_v42, %v4258_v8 }
 0x5e0   :  { %v4131_v0 = vadd.f32 %v4067_v24, %v3971_v27 }
 0x5e1   :  { %v4065_v2 = vpop.permute.xlu1 %4064  ;;  %v4321_v11 = vadd.f32 %v4289_v30, %v4257_v23 }
 0x5e2   :  { %vm4163_vm3 = vcmp.ge.f32.partialorder %v4131_v0, 0.0  ;;  %v4196_v21 = vmul.f32 %v10052_v40, %v4131_v0  ;;  %v4130_v6 = vadd.f32 %v4065_v2, %v3970_v44  ;;  %v4292_v48 = vmul.f32 0.5, %v4131_v0 }
 0x5e3   :  { %5674 = vmatprep.mubr.msk.f32.mxu0 %vm408_vm0, %v4321_v11 }
 0x5e4   :  { %v10315_v32 = vsel %vm4163_vm3, %v4131_v0, %v4196_v21  ;;  %vm4162_vm4 = vcmp.ge.f32.partialorder %v4130_v6, 0.0  ;;  %v4195_v5 = vmul.f32 %v10052_v40, %v4130_v6  ;;  %5675 = vmatmul.mubr.msk.f32.gmra.mxu0 %vm408_vm0, %v4322_v47  ;;  %v4291_v13 = vmul.f32 0.5, %v4130_v6 }
 0x5e5   :  { %v4260_v62 = vmul.f32 0.5, %v10315_v32 }
 0x5e6   :  { %v10319_v50 = vsel %vm4162_vm4, %v4130_v6, %v4195_v5 }
 0x5e7   :  { %v4259_v53 = vmul.f32 0.5, %v10319_v50  ;;  %v4324_v20 = vadd.f32 %v4292_v48, %v4260_v62 }
 0x5e9   :  { %v4323_v54 = vadd.f32 %v4291_v13, %v4259_v53 }
 0x5eb   :  { %5677 = vmatprep.mubr.msk.f32.mxu0 %vm408_vm0, %v4323_v54 }
 0x5ec   :  { %5678 = vmatmul.mubr.msk.f32.gmra.mxu0 %vm408_vm0, %v4324_v20 }
 0x635   :  { %v5634_v36 = vpop.f32.mrf.mxu0 }
 0x636   :  { %v4497_v39 = vadd.f32 %v5634_v36, %v10062_v22 }
 0x637   :  { %v4491_v26 = vpop.f32.mrf.mxu0 }
 0x638   :  { %v4492_v28 = vadd.f32 %v4491_v26, %v10070_v56  ;;  %v4683_v63 = vmul.f32 %v4497_v39, %v10052_v40  ;;  %vm4651_vm5 = vcmp.ge.f32.partialorder %v4497_v39, 0.0 }
 0x63a   :  { %vm4650_vm6 = vcmp.ge.f32.partialorder %v4492_v28, 0.0  ;;  %v4682_v25 = vmul.f32 %v4492_v28, %v10052_v40  ;;  %v4715_v38 = vsel %vm4651_vm5, %v4497_v39, %v4683_v63 }
 0x63c   :  { %v4714_v3 = vsel %vm4650_vm6, %v4492_v28, %v4682_v25 }
 0x63d   :  { %v5637_v57 = vpop.f32.mrf.mxu0  ;;  %5688 = vmatprep.mubr.msk.f32.mxu1 %vm408_vm0, %v4714_v3 }
 0x63e   :  { %v4507_v45 = vadd.f32 %v5637_v57, %v10083_v19  ;;  %5689 = vmatmul.mubr.msk.f32.vlgmr.msra.gmra.mxu1 %vm408_vm0, %v4715_v38 }
 0x63f   :  { %v4501_v37 = vpop.f32.mrf.mxu0 }
 0x640   :  { %v4502_v22 = vadd.f32 %v4501_v37, %v10087_v16  ;;  %v4685_v56 = vmul.f32 %v4507_v45, %v10052_v40  ;;  %vm4653_vm7 = vcmp.ge.f32.partialorder %v4507_v45, 0.0 }
 0x642   :  { %vm4652_vm8 = vcmp.ge.f32.partialorder %v4502_v22, 0.0  ;;  %v4684_v27 = vmul.f32 %v4502_v22, %v10052_v40  ;;  %v4717_v24 = vsel %vm4653_vm7, %v4507_v45, %v4685_v56 }
 0x644   :  { %v4716_v8 = vsel %vm4652_vm8, %v4502_v22, %v4684_v27 }
 0x645   :  { %v5640_v30 = vpop.f32.mrf.mxu0  ;;  %5691 = vmatprep.mubr.msk.f32.mxu1 %vm408_vm0, %v4716_v8 }
 0x646   :  { %v4517_v23 = vadd.f32 %v5640_v30, %v10099_v51  ;;  %5692 = vmatmul.mubr.msk.f32.gmra.mxu1 %vm408_vm0, %v4717_v24 }
 0x647   :  { %v4511_v19 = vpop.f32.mrf.mxu0 }
 0x648   :  { %v4512_v42 = vadd.f32 %v4511_v19, %v10103_v55  ;;  %v4687_v16 = vmul.f32 %v4517_v23, %v10052_v40  ;;  %vm4655_vm9 = vcmp.ge.f32.partialorder %v4517_v23, 0.0 }
 0x64a   :  { %vm4654_vm10 = vcmp.ge.f32.partialorder %v4512_v42, 0.0  ;;  %v4686_v0 = vmul.f32 %v4512_v42, %v10052_v40  ;;  %v4719_v11 = vsel %vm4655_vm9, %v4517_v23, %v4687_v16 }
 0x64c   :  { %v4718_v44 = vsel %vm4654_vm10, %v4512_v42, %v4686_v0 }
 0x64d   :  { %v5643_v2 = vpop.f32.mrf.mxu0  ;;  %5694 = vmatprep.mubr.msk.f32.mxu1 %vm408_vm0, %v4718_v44 }
 0x64e   :  { %v4527_v21 = vadd.f32 %v5643_v2, %v10115_v61  ;;  %5695 = vmatmul.mubr.msk.f32.gmra.mxu1 %vm408_vm0, %v4719_v11 }
 0x64f   :  { %v4521_v51 = vpop.f32.mrf.mxu0 }
 0x650   :  { %v4522_v6 = vadd.f32 %v4521_v51, %v10119_v18  ;;  %v4689_v55 = vmul.f32 %v4527_v21, %v10052_v40  ;;  %vm4657_vm11 = vcmp.ge.f32.partialorder %v4527_v21, 0.0 }
 0x652   :  { %vm4656_vm12 = vcmp.ge.f32.partialorder %v4522_v6, 0.0  ;;  %v4688_v47 = vmul.f32 %v4522_v6, %v10052_v40  ;;  %v4721_v13 = vsel %vm4657_vm11, %v4527_v21, %v4689_v55 }
 0x654   :  { %v4720_v5 = vsel %vm4656_vm12, %v4522_v6, %v4688_v47 }
 0x655   :  { %v5646_v62 = vpop.f32.mrf.mxu0  ;;  %5697 = vmatprep.mubr.msk.f32.mxu1 %vm408_vm0, %v4720_v5 }
 0x656   :  { %v4537_v53 = vadd.f32 %v5646_v62, %v10131_v46  ;;  %5698 = vmatmul.mubr.msk.f32.gmra.mxu1 %vm408_vm0, %v4721_v13 }
 0x657   :  { %v4531_v61 = vpop.f32.mrf.mxu0 }
 0x658   :  { %v4532_v48 = vadd.f32 %v4531_v61, %v10135_v60  ;;  %v4691_v18 = vmul.f32 %v4537_v53, %v10052_v40  ;;  %vm4659_vm13 = vcmp.ge.f32.partialorder %v4537_v53, 0.0 }
 0x65a   :  { %vm4658_vm14 = vcmp.ge.f32.partialorder %v4532_v48, 0.0  ;;  %v4690_v54 = vmul.f32 %v4532_v48, %v10052_v40  ;;  %v4723_v39 = vsel %vm4659_vm13, %v4537_v53, %v4691_v18 }
 0x65c   :  { %v4722_v20 = vsel %vm4658_vm14, %v4532_v48, %v4690_v54 }
 0x65d   :  { %v5649_v36 = vpop.f32.mrf.mxu0  ;;  %5700 = vmatprep.mubr.msk.f32.mxu1 %vm408_vm0, %v4722_v20 }
 0x65e   :  { %v4547_v26 = vadd.f32 %v5649_v36, %v10147_v29  ;;  %5701 = vmatmul.mubr.msk.f32.gmra.mxu1 %vm408_vm0, %v4723_v39 }
 0x65f   :  { %v4541_v46 = vpop.f32.mrf.mxu0 }
 0x660   :  { %v4542_v28 = vadd.f32 %v4541_v46, %v10151_v52  ;;  %v4693_v60 = vmul.f32 %v4547_v26, %v10052_v40  ;;  %vm4661_vm15 = vcmp.ge.f32.partialorder %v4547_v26, 0.0 }
 0x662   :  { %vm4660_vm1 = vcmp.ge.f32.partialorder %v4542_v28, 0.0  ;;  %v4692_v63 = vmul.f32 %v4542_v28, %v10052_v40  ;;  %v4725_v38 = vsel %vm4661_vm15, %v4547_v26, %v4693_v60 }
 0x664   :  { %v4724_v25 = vsel %vm4660_vm1, %v4542_v28, %v4692_v63 }
 0x665   :  { %v5652_v3 = vpop.f32.mrf.mxu0  ;;  %5703 = vmatprep.mubr.msk.f32.mxu1 %vm408_vm0, %v4724_v25 }
 0x666   :  { %v4557_v57 = vadd.f32 %v5652_v3, %v10163_v43  ;;  %5704 = vmatmul.mubr.msk.f32.gmra.mxu1 %vm408_vm0, %v4725_v38 }
 0x667   :  { %v4551_v29 = vpop.f32.mrf.mxu0 }
 0x668   :  { %v4552_v45 = vadd.f32 %v4551_v29, %v10167_v10  ;;  %v4695_v52 = vmul.f32 %v4557_v57, %v10052_v40  ;;  %vm4663_vm2 = vcmp.ge.f32.partialorder %v4557_v57, 0.0 }
 0x66a   :  { %vm4662_vm3 = vcmp.ge.f32.partialorder %v4552_v45, 0.0  ;;  %v4694_v37 = vmul.f32 %v4552_v45, %v10052_v40  ;;  %v4727_v27 = vsel %vm4663_vm2, %v4557_v57, %v4695_v52 }
 0x66c   :  { %v4726_v22 = vsel %vm4662_vm3, %v4552_v45, %v4694_v37 }
 0x66d   :  { %v5655_v56 = vpop.f32.mrf.mxu0  ;;  %5706 = vmatprep.mubr.msk.f32.mxu1 %vm408_vm0, %v4726_v22 }
 0x66e   :  { %v4567_v8 = vadd.f32 %v5655_v56, %v10179_v59  ;;  %5707 = vmatmul.mubr.msk.f32.gmra.mxu1 %vm408_vm0, %v4727_v27 }
 0x66f   :  { %v4561_v43 = vpop.f32.mrf.mxu0 }
 0x670   :  { %v4562_v30 = vadd.f32 %v4561_v43, %v10183_v9  ;;  %v4697_v10 = vmul.f32 %v4567_v8, %v10052_v40  ;;  %vm4665_vm4 = vcmp.ge.f32.partialorder %v4567_v8, 0.0 }
 0x672   :  { %vm4664_vm5 = vcmp.ge.f32.partialorder %v4562_v30, 0.0  ;;  %v4696_v24 = vmul.f32 %v4562_v30, %v10052_v40  ;;  %v4729_v42 = vsel %vm4665_vm4, %v4567_v8, %v4697_v10 }
 0x674   :  { %v4728_v23 = vsel %vm4664_vm5, %v4562_v30, %v4696_v24 }
 0x675   :  { %v5658_v19 = vpop.f32.mrf.mxu0  ;;  %5709 = vmatprep.mubr.msk.f32.mxu1 %vm408_vm0, %v4728_v23 }
 0x676   :  { %v4577_v16 = vadd.f32 %v5658_v19, %v10195_v34  ;;  %5710 = vmatmul.mubr.msk.f32.gmra.mxu1 %vm408_vm0, %v4729_v42 }
 0x677   :  { %v4571_v59 = vpop.f32.mrf.mxu0 }
 0x678   :  { %v4572_v0 = vadd.f32 %v4571_v59, %v10199_v7  ;;  %v4699_v9 = vmul.f32 %v4577_v16, %v10052_v40  ;;  %vm4667_vm6 = vcmp.ge.f32.partialorder %v4577_v16, 0.0 }
 0x67a   :  { %vm4666_vm7 = vcmp.ge.f32.partialorder %v4572_v0, 0.0  ;;  %v4698_v44 = vmul.f32 %v4572_v0, %v10052_v40  ;;  %v4731_v21 = vsel %vm4667_vm6, %v4577_v16, %v4699_v9 }
 0x67c   :  { %v4730_v2 = vsel %vm4666_vm7, %v4572_v0, %v4698_v44  ;;  %vm5149_vm7 = vcmask 64512  }
 0x67d   :  { %v5661_v11 = vpop.f32.mrf.mxu0  ;;  %5712 = vmatprep.mubr.msk.f32.mxu1 %vm408_vm0, %v4730_v2 }
 0x67e   :  { %v4587_v51 = vadd.f32 %v5661_v11, %v10211_v1  ;;  %5713 = vmatmul.mubr.msk.f32.gmra.mxu1 %vm408_vm0, %v4731_v21 }
 0x67f   :  { %v4581_v34 = vpop.f32.mrf.mxu0 }
 0x680   :  { %v4582_v6 = vadd.f32 %v4581_v34, %v10215_v49  ;;  %v4701_v7 = vmul.f32 %v4587_v51, %v10052_v40  ;;  %vm4669_vm8 = vcmp.ge.f32.partialorder %v4587_v51, 0.0 }
 0x682   :  { %vm4668_vm9 = vcmp.ge.f32.partialorder %v4582_v6, 0.0  ;;  %v4700_v55 = vmul.f32 %v4582_v6, %v10052_v40  ;;  %v4733_v62 = vsel %vm4669_vm8, %v4587_v51, %v4701_v7 }
 0x684   :  { %v4732_v47 = vsel %vm4668_vm9, %v4582_v6, %v4700_v55 }
 0x685   :  { %v5664_v5 = vpop.f32.mrf.mxu0  ;;  %5715 = vmatprep.mubr.msk.f32.mxu1 %vm408_vm0, %v4732_v47 }
 0x686   :  { %v4597_v13 = vadd.f32 %v5664_v5, %v10239_v41  ;;  %5716 = vmatmul.mubr.msk.f32.gmra.mxu1 %vm408_vm0, %v4733_v62 }
 0x687   :  { %v4591_v1 = vpop.f32.mrf.mxu0 }
 0x688   :  { %v4592_v53 = vadd.f32 %v4591_v1, %v10243_v35  ;;  %v4703_v49 = vmul.f32 %v4597_v13, %v10052_v40  ;;  %vm4671_vm10 = vcmp.ge.f32.partialorder %v4597_v13, 0.0 }
 0x68a   :  { %vm4670_vm11 = vcmp.ge.f32.partialorder %v4592_v53, 0.0  ;;  %v4702_v61 = vmul.f32 %v4592_v53, %v10052_v40  ;;  %v4735_v54 = vsel %vm4671_vm10, %v4597_v13, %v4703_v49 }
 0x68c   :  { %v4734_v48 = vsel %vm4670_vm11, %v4592_v53, %v4702_v61 }
 0x68d   :  { %v5667_v18 = vpop.f32.mrf.mxu0  ;;  %5718 = vmatprep.mubr.msk.f32.mxu1 %vm408_vm0, %v4734_v48 }
 0x68e   :  { %v4607_v20 = vadd.f32 %v5667_v18, %v10255_v17  ;;  %5719 = vmatmul.mubr.msk.f32.gmra.mxu1 %vm408_vm0, %v4735_v54 }
 0x68f   :  { %v4601_v41 = vpop.f32.mrf.mxu0 }
 0x690   :  { %v4602_v36 = vadd.f32 %v4601_v41, %v10259_v14  ;;  %v4705_v35 = vmul.f32 %v4607_v20, %v10052_v40  ;;  %vm4673_vm12 = vcmp.ge.f32.partialorder %v4607_v20, 0.0 }
 0x692   :  { %vm4672_vm13 = vcmp.ge.f32.partialorder %v4602_v36, 0.0  ;;  %v4704_v39 = vmul.f32 %v4602_v36, %v10052_v40  ;;  %v4737_v28 = vsel %vm4673_vm12, %v4607_v20, %v4705_v35 }
 0x694   :  { %v4736_v26 = vsel %vm4672_vm13, %v4602_v36, %v4704_v39 }
 0x695   :  { %v5670_v46 = vpop.f32.mrf.mxu0  ;;  %5721 = vmatprep.mubr.msk.f32.mxu1 %vm408_vm0, %v4736_v26 }
 0x696   :  { %v4617_v60 = vadd.f32 %v5670_v46, %v10271_v4  ;;  %5722 = vmatmul.mubr.msk.f32.gmra.mxu1 %vm408_vm0, %v4737_v28 }
 0x697   :  { %v4611_v17 = vpop.f32.mrf.mxu0 }
 0x698   :  { %v4612_v63 = vadd.f32 %v4611_v17, %v10275_v31  ;;  %v4707_v14 = vmul.f32 %v4617_v60, %v10052_v40  ;;  %vm4675_vm14 = vcmp.ge.f32.partialorder %v4617_v60, 0.0 }
 0x69a   :  { %vm4674_vm15 = vcmp.ge.f32.partialorder %v4612_v63, 0.0  ;;  %v4706_v25 = vmul.f32 %v4612_v63, %v10052_v40  ;;  %v4739_v38 = vsel %vm4675_vm14, %v4617_v60, %v4707_v14 }
 0x69c   :  { %v4738_v3 = vsel %vm4674_vm15, %v4612_v63, %v4706_v25 }
 0x69d   :  { %5724 = vmatprep.mubr.msk.f32.mxu1 %vm408_vm0, %v4738_v3  ;;  %v5673_v57 = vpop.f32.mrf.mxu0 }
 0x69e   :  { %5725 = vmatmul.mubr.msk.f32.gmra.mxu1 %vm408_vm0, %v4739_v38  ;;  %v4627_v4 = vadd.f32 %v5673_v57, %v10287_v12 }
 0x69f   :  { %v4621_v29 = vpop.f32.mrf.mxu0 }
 0x6a0   :  { %v4622_v45 = vadd.f32 %v4621_v29, %v10292_v15  ;;  %v4709_v31 = vmul.f32 %v4627_v4, %v10052_v40  ;;  %vm4677_vm1 = vcmp.ge.f32.partialorder %v4627_v4, 0.0 }
 0x6a2   :  { %vm4676_vm2 = vcmp.ge.f32.partialorder %v4622_v45, 0.0  ;;  %v4708_v52 = vmul.f32 %v4622_v45, %v10052_v40  ;;  %v4741_v8 = vsel %vm4677_vm1, %v4627_v4, %v4709_v31 }
 0x6a4   :  { %v5676_v37 = vpop.f32.mrf.mxu0  ;;  %v4740_v56 = vsel %vm4676_vm2, %v4622_v45, %v4708_v52 }
 0x6a5   :  { %v4637_v22 = vadd.f32 %v5676_v37, %v10302_v33  ;;  %5727 = vmatprep.mubr.msk.f32.mxu1 %vm408_vm0, %v4740_v56 }
 0x6a6   :  { %v4631_v27 = vpop.f32.mrf.mxu0  ;;  %5728 = vmatmul.mubr.msk.f32.gmra.mxu1 %vm408_vm0, %v4741_v8 }
 0x6a7   :  { %v4632_v43 = vadd.f32 %v4631_v27, %v10306_v58  ;;  %v4711_v12 = vmul.f32 %v4637_v22, %v10052_v40  ;;  %vm4679_vm3 = vcmp.ge.f32.partialorder %v4637_v22, 0.0 }
 0x6a9   :  { %vm4678_vm4 = vcmp.ge.f32.partialorder %v4632_v43, 0.0  ;;  %v4710_v15 = vmul.f32 %v4632_v43, %v10052_v40  ;;  %v4743_v33 = vsel %vm4679_vm3, %v4637_v22, %v4711_v12 }
 0x6ab   :  { %v4742_v30 = vsel %vm4678_vm4, %v4632_v43, %v4710_v15 }
 0x6ac   :  { %v5679_v10 = vpop.f32.mrf.mxu0  ;;  %5730 = vmatprep.mubr.msk.f32.mxu1 %vm408_vm0, %v4742_v30 }
 0x6ad   :  { %v4647_v24 = vadd.f32 %v5679_v10, %v10315_v32  ;;  %5731 = vmatmul.mubr.msk.f32.gmra.mxu1 %vm408_vm0, %v4743_v33  ;;  %v10424_v32 = vld [vmem:[%s10633_s10] ss:$0 sm:$0xff] }
 0x6ae   :  { %v4641_v23 = vpop.f32.mrf.mxu0 }
 0x6af   :  { %v4642_v58 = vadd.f32 %v4641_v23, %v10319_v50  ;;  %v4713_v19 = vmul.f32 %v4647_v24, %v10052_v40  ;;  %vm4681_vm5 = vcmp.ge.f32.partialorder %v4647_v24, 0.0  ;;  %v10429_v50 = vld [vmem:[%s10634_s11] ss:$0 sm:$0xff] }
 0x6b1   :  { %vm4680_vm6 = vcmp.ge.f32.partialorder %v4642_v58, 0.0  ;;  %v4712_v42 = vmul.f32 %v4642_v58, %v10052_v40  ;;  %v4745_v59 = vsel %vm4681_vm5, %v4647_v24, %v4713_v19 }
 0x6b3   :  { %v4744_v16 = vsel %vm4680_vm6, %v4642_v58, %v4712_v42 }
 0x6b4   :  { %5733 = vmatprep.mubr.msk.f32.mxu1 %vm408_vm0, %v4744_v16 }
 0x6b5   :  { %5734 = vmatmul.mubr.msk.f32.gmra.mxu1 %vm408_vm0, %v4745_v59 }
 0x6fe   :  { %v5690_v0 = vpop.f32.mrf.mxu1 }
 0x6ff   :  { %v5079_v9 = vmul.f32 %v5690_v0, %v10424_v32 }
 0x700   :  { %v4912_v40 = vpop.f32.mrf.mxu1 }
 0x701   :  { %v5118_v44 = vadd.f32 %v10429_v50, %v5079_v9  ;;  %v5078_v2 = vmul.f32 %v10424_v32, %v4912_v40 }
 0x703   :  { %5151 = vst.msk [vmem:[%s10635_s12 + $0x8] sm:$0xff] %vm5149_vm7, %v5118_v44  ;;  %v5117_v11 = vadd.f32 %v10429_v50, %v5078_v2 }
 0x705   :  { %5150 = vst.msk [vmem:[%s10635_s12] sm:$0xff] %vm5149_vm7, %v5117_v11 }
 0x706   :  { %v5693_v21 = vpop.f32.mrf.mxu1 }
 0x707   :  { %v5081_v51 = vmul.f32 %v5693_v21, %v10424_v32 }
 0x708   :  { %v4922_v34 = vpop.f32.mrf.mxu1 }
 0x709   :  { %v5120_v6 = vadd.f32 %v10429_v50, %v5081_v51  ;;  %v5080_v7 = vmul.f32 %v10424_v32, %v4922_v34 }
 0x70b   :  { %5153 = vst.msk [vmem:[%s10635_s12 + $0x18] sm:$0xff] %vm5149_vm7, %v5120_v6  ;;  %v5119_v55 = vadd.f32 %v10429_v50, %v5080_v7 }
 0x70d   :  { %5152 = vst.msk [vmem:[%s10635_s12 + $0x10] sm:$0xff] %vm5149_vm7, %v5119_v55 }
 0x70e   :  { %v5696_v47 = vpop.f32.mrf.mxu1 }
 0x70f   :  { %v5083_v5 = vmul.f32 %v5696_v47, %v10424_v32 }
 0x710   :  { %v4932_v62 = vpop.f32.mrf.mxu1 }
 0x711   :  { %v5122_v13 = vadd.f32 %v10429_v50, %v5083_v5  ;;  %v5082_v1 = vmul.f32 %v10424_v32, %v4932_v62 }
 0x713   :  { %5155 = vst.msk [vmem:[%s10635_s12 + $0x28] sm:$0xff] %vm5149_vm7, %v5122_v13  ;;  %v5121_v53 = vadd.f32 %v10429_v50, %v5082_v1 }
 0x715   :  { %5154 = vst.msk [vmem:[%s10635_s12 + $0x20] sm:$0xff] %vm5149_vm7, %v5121_v53 }
 0x716   :  { %v5699_v49 = vpop.f32.mrf.mxu1 }
 0x717   :  { %v5085_v61 = vmul.f32 %v5699_v49, %v10424_v32 }
 0x718   :  { %v4942_v48 = vpop.f32.mrf.mxu1 }
 0x719   :  { %v5124_v18 = vadd.f32 %v10429_v50, %v5085_v61  ;;  %v5084_v54 = vmul.f32 %v10424_v32, %v4942_v48 }
 0x71b   :  { %5157 = vst.msk [vmem:[%s10635_s12 + $0x38] sm:$0xff] %vm5149_vm7, %v5124_v18  ;;  %v5123_v20 = vadd.f32 %v10429_v50, %v5084_v54 }
 0x71d   :  { %5156 = vst.msk [vmem:[%s10635_s12 + $0x30] sm:$0xff] %vm5149_vm7, %v5123_v20 }
 0x71e   :  { %v5702_v41 = vpop.f32.mrf.mxu1 }
 0x71f   :  { %v5087_v36 = vmul.f32 %v5702_v41, %v10424_v32 }
 0x720   :  { %v4952_v35 = vpop.f32.mrf.mxu1 }
 0x721   :  { %v5126_v39 = vadd.f32 %v10429_v50, %v5087_v36  ;;  %v5086_v26 = vmul.f32 %v10424_v32, %v4952_v35 }
 0x723   :  { %5159 = vst.msk [vmem:[%s10635_s12 + $0x48] sm:$0xff] %vm5149_vm7, %v5126_v39  ;;  %v5125_v46 = vadd.f32 %v10429_v50, %v5086_v26 }
 0x725   :  { %5158 = vst.msk [vmem:[%s10635_s12 + $0x40] sm:$0xff] %vm5149_vm7, %v5125_v46 }
 0x726   :  { %v5705_v28 = vpop.f32.mrf.mxu1 }
 0x727   :  { %v5089_v60 = vmul.f32 %v5705_v28, %v10424_v32 }
 0x728   :  { %v4962_v17 = vpop.f32.mrf.mxu1 }
 0x729   :  { %v5128_v63 = vadd.f32 %v10429_v50, %v5089_v60  ;;  %v5088_v14 = vmul.f32 %v10424_v32, %v4962_v17 }
 0x72b   :  { %5161 = vst.msk [vmem:[%s10635_s12 + $0x58] sm:$0xff] %vm5149_vm7, %v5128_v63  ;;  %v5127_v25 = vadd.f32 %v10429_v50, %v5088_v14 }
 0x72d   :  { %5160 = vst.msk [vmem:[%s10635_s12 + $0x50] sm:$0xff] %vm5149_vm7, %v5127_v25 }
 0x72e   :  { %v5708_v3 = vpop.f32.mrf.mxu1 }
 0x72f   :  { %v5091_v38 = vmul.f32 %v5708_v3, %v10424_v32 }
 0x730   :  { %v4972_v57 = vpop.f32.mrf.mxu1 }
 0x731   :  { %v5130_v4 = vadd.f32 %v10429_v50, %v5091_v38  ;;  %v5090_v29 = vmul.f32 %v10424_v32, %v4972_v57 }
 0x733   :  { %5163 = vst.msk [vmem:[%s10635_s12 + $0x68] sm:$0xff] %vm5149_vm7, %v5130_v4  ;;  %v5129_v45 = vadd.f32 %v10429_v50, %v5090_v29 }
 0x735   :  { %5162 = vst.msk [vmem:[%s10635_s12 + $0x60] sm:$0xff] %vm5149_vm7, %v5129_v45 }
 0x736   :  { %v5711_v31 = vpop.f32.mrf.mxu1 }
 0x737   :  { %v5093_v52 = vmul.f32 %v5711_v31, %v10424_v32 }
 0x738   :  { %v4982_v37 = vpop.f32.mrf.mxu1 }
 0x739   :  { %v5132_v22 = vadd.f32 %v10429_v50, %v5093_v52  ;;  %v5092_v56 = vmul.f32 %v10424_v32, %v4982_v37 }
 0x73b   :  { %5165 = vst.msk [vmem:[%s10635_s12 + $0x78] sm:$0xff] %vm5149_vm7, %v5132_v22  ;;  %v5131_v27 = vadd.f32 %v10429_v50, %v5092_v56 }
 0x73d   :  { %5164 = vst.msk [vmem:[%s10635_s12 + $0x70] sm:$0xff] %vm5149_vm7, %v5131_v27 }
 0x73e   :  { %v5714_v8 = vpop.f32.mrf.mxu1 }
 0x73f   :  { %v5095_v43 = vmul.f32 %v5714_v8, %v10424_v32 }
 0x740   :  { %v4992_v12 = vpop.f32.mrf.mxu1 }
 0x741   :  { %v5134_v15 = vadd.f32 %v10429_v50, %v5095_v43  ;;  %v5094_v30 = vmul.f32 %v10424_v32, %v4992_v12 }
 0x743   :  { %5167 = vst.msk [vmem:[%s10635_s12 + $0x88] sm:$0xff] %vm5149_vm7, %v5134_v15  ;;  %v5133_v10 = vadd.f32 %v10429_v50, %v5094_v30 }
 0x745   :  { %5166 = vst.msk [vmem:[%s10635_s12 + $0x80] sm:$0xff] %vm5149_vm7, %v5133_v10 }
 0x746   :  { %v5717_v33 = vpop.f32.mrf.mxu1 }
 0x747   :  { %v5097_v24 = vmul.f32 %v5717_v33, %v10424_v32 }
 0x748   :  { %v5002_v23 = vpop.f32.mrf.mxu1 }
 0x749   :  { %v5136_v58 = vadd.f32 %v10429_v50, %v5097_v24  ;;  %v5096_v19 = vmul.f32 %v10424_v32, %v5002_v23 }
 0x74b   :  { %5169 = vst.msk [vmem:[%s10635_s12 + $0x98] sm:$0xff] %vm5149_vm7, %v5136_v58  ;;  %v5135_v42 = vadd.f32 %v10429_v50, %v5096_v19 }
 0x74d   :  { %5168 = vst.msk [vmem:[%s10635_s12 + $0x90] sm:$0xff] %vm5149_vm7, %v5135_v42 }
 0x74e   :  { %v5720_v16 = vpop.f32.mrf.mxu1 }
 0x74f   :  { %v5099_v59 = vmul.f32 %v5720_v16, %v10424_v32 }
 0x750   :  { %v5012_v0 = vpop.f32.mrf.mxu1 }
 0x751   :  { %v5138_v9 = vadd.f32 %v10429_v50, %v5099_v59  ;;  %v5098_v40 = vmul.f32 %v10424_v32, %v5012_v0 }
 0x753   :  { %5171 = vst.msk [vmem:[%s10635_s12 + $0xa8] sm:$0xff] %vm5149_vm7, %v5138_v9  ;;  %v5137_v44 = vadd.f32 %v10429_v50, %v5098_v40 }
 0x755   :  { %5170 = vst.msk [vmem:[%s10635_s12 + $0xa0] sm:$0xff] %vm5149_vm7, %v5137_v44 }
 0x756   :  { %v5723_v2 = vpop.f32.mrf.mxu1 }
 0x757   :  { %v5101_v11 = vmul.f32 %v5723_v2, %v10424_v32 }
 0x758   :  { %v5022_v21 = vpop.f32.mrf.mxu1 }
 0x759   :  { %v5140_v51 = vadd.f32 %v10429_v50, %v5101_v11  ;;  %v5100_v34 = vmul.f32 %v10424_v32, %v5022_v21 }
 0x75b   :  { %5173 = vst.msk [vmem:[%s10635_s12 + $0xb8] sm:$0xff] %vm5149_vm7, %v5140_v51  ;;  %v5139_v6 = vadd.f32 %v10429_v50, %v5100_v34 }
 0x75d   :  { %5172 = vst.msk [vmem:[%s10635_s12 + $0xb0] sm:$0xff] %vm5149_vm7, %v5139_v6 }
 0x75e   :  { %v5726_v7 = vpop.f32.mrf.mxu1 }
 0x75f   :  { %v5103_v55 = vmul.f32 %v5726_v7, %v10424_v32 }
 0x760   :  { %v5032_v47 = vpop.f32.mrf.mxu1 }
 0x761   :  { %v5142_v5 = vadd.f32 %v10429_v50, %v5103_v55  ;;  %v5102_v62 = vmul.f32 %v10424_v32, %v5032_v47 }
 0x763   :  { %5175 = vst.msk [vmem:[%s10635_s12 + $0xc8] sm:$0xff] %vm5149_vm7, %v5142_v5  ;;  %v5141_v13 = vadd.f32 %v10429_v50, %v5102_v62 }
 0x765   :  { %5174 = vst.msk [vmem:[%s10635_s12 + $0xc0] sm:$0xff] %vm5149_vm7, %v5141_v13 }
 0x766   :  { %v5729_v1 = vpop.f32.mrf.mxu1 }
 0x767   :  { %v5105_v53 = vmul.f32 %v5729_v1, %v10424_v32 }
 0x768   :  { %v5042_v49 = vpop.f32.mrf.mxu1 }
 0x769   :  { %v5144_v61 = vadd.f32 %v10429_v50, %v5105_v53  ;;  %v5104_v48 = vmul.f32 %v10424_v32, %v5042_v49 }
 0x76b   :  { %5177 = vst.msk [vmem:[%s10635_s12 + $0xd8] sm:$0xff] %vm5149_vm7, %v5144_v61  ;;  %v5143_v18 = vadd.f32 %v10429_v50, %v5104_v48 }
 0x76d   :  { %v5732_v54 = vpop.f32.mrf.mxu1  ;;  %5176 = vst.msk [vmem:[%s10635_s12 + $0xd0] sm:$0xff] %vm5149_vm7, %v5143_v18 }
 0x76e   :  { %v5107_v20 = vmul.f32 %v5732_v54, %v10424_v32 }
 0x76f   :  { %v5052_v41 = vpop.f32.mrf.mxu1 }
 0x770   :  { %v5146_v36 = vadd.f32 %v10429_v50, %v5107_v20  ;;  %v5106_v35 = vmul.f32 %v10424_v32, %v5052_v41 }
 0x772   :  { %5179 = vst.msk [vmem:[%s10635_s12 + $0xe8] sm:$0xff] %vm5149_vm7, %v5146_v36  ;;  %v5145_v39 = vadd.f32 %v10429_v50, %v5106_v35 }
 0x774   :  { %5178 = vst.msk [vmem:[%s10635_s12 + $0xe0] sm:$0xff] %vm5149_vm7, %v5145_v39 }
 0x775   :  { %v5735_v26 = vpop.f32.mrf.mxu1 }
 0x776   :  { %v5109_v46 = vmul.f32 %v5735_v26, %v10424_v32 }
 0x777   :  { %v5062_v28 = vpop.f32.mrf.mxu1 }
 0x778   :  { %v5148_v60 = vadd.f32 %v10429_v50, %v5109_v46  ;;  %v5108_v17 = vmul.f32 %v10424_v32, %v5062_v28 }
 0x77a   :  { %5181 = vst.msk [vmem:[%s10635_s12 + $0xf8] sm:$0xff] %vm5149_vm7, %v5148_v60  ;;  %v5147_v63 = vadd.f32 %v10429_v50, %v5108_v17 }
 0x77c   :  { %5180 = vst.msk [vmem:[%s10635_s12 + $0xf0] sm:$0xff] %vm5149_vm7, %v5147_v63 }
 0x77d   :  { %5186 = vsyncpa [#allocation3], 1 }

</bundles_post_ra>
